<compile_context>
chip_gen: v5e
topology: v5e:2x2
jax: 0.10.0
libtpu: 0.0.40
codegen_flags: <defaults>
</compile_context>

<pallas_src>
import functools

import numpy as np
import jax
import jax.numpy as jnp
from jax.experimental import pallas as pl
from jax.experimental.pallas import tpu as pltpu


# ----------------------------------------------------------------------------
# Pallas kernels
# ----------------------------------------------------------------------------
def _stage1_kernel(p_ref, w_ref, b_ref, o_ref, *, phase_rows):
    """conv1 im2col GEMM + bias + ReLU + fused 2x2 average pool."""
    h = jnp.dot(p_ref[...], w_ref[...], preferred_element_type=jnp.float32)
    h = jnp.maximum(h + b_ref[...], 0.0)                       # (4*phase_rows, 6)
    # The four pool phases are contiguous, 8-aligned row blocks -> pooling is
    # three aligned VPU adds (no strided access, no extra HBM traffic).
    q = phase_rows
    pooled = 0.25 * (h[0:q] + h[q:2 * q] + h[2 * q:3 * q] + h[3 * q:4 * q])
    o_ref[...] = pooled.astype(o_ref.dtype)


def _stage2_kernel(p_ref, w2_ref, b2_ref, w3_ref, b3_ref, w4_ref, b4_ref,
                   w5_ref, b5_ref, o_ref, *, phase_rows, bp, n_spatial):
    """conv2 GEMM + ReLU + fused avg-pool + fc1 + fc2 + fc3 (all in one kernel)."""
    f32 = jnp.float32
    bf16 = jnp.bfloat16
    # conv2 as GEMM (MXU) + bias + ReLU (VPU).
    h = jnp.dot(p_ref[...], w2_ref[...], preferred_element_type=f32)
    h = jnp.maximum(h + b2_ref[...], 0.0)                      # (4*phase_rows, 16)
    # fused 2x2 average pool (phase blocks contiguous & 8-aligned).
    q = phase_rows
    z = 0.25 * (h[0:q] + h[q:2 * q] + h[2 * q:3 * q] + h[3 * q:4 * q])  # (n_spatial*bp, 16)
    # fc1: contraction over (spatial, channel). Spatial blocks are bp(=8)-row
    # aligned, so this is n_spatial aligned (bp,16)@(16,120) MXU matmuls.
    acc = jnp.zeros((bp, w3_ref.shape[-1]), f32)
    for s in range(n_spatial):
        blk = z[s * bp:(s + 1) * bp, :].astype(bf16)
        acc = acc + jnp.dot(blk, w3_ref[s], preferred_element_type=f32)
    h3 = jnp.maximum(acc + b3_ref[...], 0.0)                   # (bp, 120)
    h4 = jnp.dot(h3.astype(bf16), w4_ref[...], preferred_element_type=f32)
    h4 = jnp.maximum(h4 + b4_ref[...], 0.0)                    # (bp, 84)
    h5 = jnp.dot(h4.astype(bf16), w5_ref[...], preferred_element_type=f32)
    h5 = h5 + b5_ref[...]                                      # (bp, num_classes)
    o_ref[...] = h5[:o_ref.shape[0], :]                        # drop batch padding


# ----------------------------------------------------------------------------
# Glue helpers (tiny XLA ops: one gather + one small transpose per conv stage)
# ----------------------------------------------------------------------------
def _phase_im2col_indices(out_hw, k, in_w):
    """Static int32 table (4, out_hw*out_hw, k*k): flattened input-spatial index
    for pool-phase-major im2col rows; row = (phase, (i,j)), col = (kh,kw)."""
    phases = ((0, 0), (0, 1), (1, 0), (1, 1))
    i = np.arange(out_hw)
    kk = np.arange(k)
    idx = np.empty((4, out_hw * out_hw, k * k), np.int32)
    for ph, (pi, pj) in enumerate(phases):
        rows = 2 * i[:, None, None, None] + pi + kk[None, None, :, None]   # (oh,1,kh,1)
        cols = 2 * i[None, :, None, None] + pj + kk[None, None, None, :]   # (1,ow,1,kw)
        idx[ph] = (rows * in_w + cols).reshape(out_hw * out_hw, k * k)
    return idx


def _full_specs(*arrays):
    """Whole-array VMEM blocks for a grid=(1,) call."""
    return [pl.BlockSpec(a.shape, lambda i, nd=a.ndim: (0,) * nd) for a in arrays]


# ----------------------------------------------------------------------------
# LeNet forward
# ----------------------------------------------------------------------------
def lenet_forward(x, params):
    B = x.shape[0]
    assert x.shape[1:] == (1, 28, 28), "LeNet expects (B, 1, 28, 28) input"
    bf16, f32 = jnp.bfloat16, jnp.float32

    # --- weight preprocessing: re-order the tiny weights, not the activations --
    w1 = params["conv1_w"].reshape(6, 25).T.astype(bf16)                    # (25, 6)
    b1 = params["conv1_b"].reshape(1, 6).astype(f32)
    w2 = params["conv2_w"].transpose(2, 3, 1, 0).reshape(150, 16).astype(bf16)  # (150, 16)
    b2 = params["conv2_b"].reshape(1, 16).astype(f32)
    # fc1 columns permuted from torch's (c, h, w)-minor flatten to our (h*w, c):
    w3 = params["fc1_w"].reshape(120, 16, 25).transpose(2, 1, 0).astype(bf16)   # (25, 16, 120)
    b3 = params["fc1_b"].reshape(1, 120).astype(f32)
    w4 = params["fc2_w"].T.astype(bf16)                                     # (120, 84)
    b4 = params["fc2_b"].reshape(1, 84).astype(f32)
    w5 = params["fc3_w"].T.astype(bf16)                                     # (84, C)
    b5 = params["fc3_b"].reshape(1, -1).astype(f32)
    num_classes = w5.shape[1]

    # --- stage 1: conv1 + ReLU + avgpool (one fused kernel) --------------------
    idx1 = jnp.asarray(_phase_im2col_indices(14, 5, 32))                    # (4, 196, 25)
    xpad = jnp.pad(x[:, 0].astype(bf16), ((0, 0), (2, 2), (2, 2)))          # (B, 32, 32)
    g1 = xpad.reshape(B, 32 * 32)[:, idx1]                                  # (B, 4, 196, 25)
    p1 = g1.transpose(1, 0, 2, 3).reshape(4 * B * 196, 25)                  # pool-phase major

    m1 = B * 196
    z1 = pl.pallas_call(
        functools.partial(_stage1_kernel, phase_rows=m1),
        out_shape=jax.ShapeDtypeStruct((m1, 6), bf16),
        grid=(1,),
        in_specs=_full_specs(p1, w1, b1),
        out_specs=pl.BlockSpec((m1, 6), lambda i: (0, 0)),
        compiler_params=pltpu.CompilerParams(dimension_semantics=("arbitrary",)),
    )(p1, w1, b1)                                                           # (B*14*14, 6)

    # --- stage 2: conv2 + ReLU + avgpool + fc1 + fc2 + fc3 (one fused kernel) --
    bp = -(-B // 8) * 8                                  # batch rows padded to a sublane tile
    idx2 = jnp.asarray(_phase_im2col_indices(5, 5, 14))                     # (4, 25, 25)
    x1 = z1.reshape(B, 196, 6)                                              # rows were (b,i,j)
    g2 = x1[:, idx2, :]                                                     # (B, 4, 25, 25, 6)
    g2 = g2.transpose(1, 2, 0, 3, 4).reshape(4, 25, B, 150)                 # (phase, s, b, khw*c)
    g2 = jnp.pad(g2, ((0, 0), (0, 0), (0, bp - B), (0, 0)))                 # pad batch -> bp
    p2 = g2.reshape(4 * 25 * bp, 150)                                       # pool-phase major

    m2 = 25 * bp
    out = pl.pallas_call(
        functools.partial(_stage2_kernel, phase_rows=m2, bp=bp, n_spatial=25),
        out_shape=jax.ShapeDtypeStruct((B, num_classes), f32),
        grid=(1,),
        in_specs=_full_specs(p2, w2, b2, w3, b3, w4, b4, w5, b5),
        out_specs=pl.BlockSpec((B, num_classes), lambda i: (0, 0)),
        compiler_params=pltpu.CompilerParams(dimension_semantics=("arbitrary",)),
    )(p2, w2, b2, w3, b3, w4, b4, w5, b5)
    return out


def init_params(key, num_classes=10):
    ks = jax.random.split(key, 8)
    scale = 0.05
    f32 = jnp.float32
    return {
        "conv1_w": scale * jax.random.normal(ks[0], (6, 1, 5, 5), f32),
        "conv1_b": scale * jax.random.normal(ks[1], (6,), f32),
        "conv2_w": scale * jax.random.normal(ks[2], (16, 6, 5, 5), f32),
        "conv2_b": scale * jax.random.normal(ks[3], (16,), f32),
        "fc1_w": scale * jax.random.normal(ks[4], (120, 16 * 5 * 5), f32),
        "fc1_b": scale * jax.random.normal(ks[5], (120,), f32),
        "fc2_w": scale * jax.random.normal(ks[6], (84, 120), f32),
        "fc2_b": scale * jax.random.normal(ks[7], (84,), f32),
        "fc3_w": scale * jax.random.normal(jax.random.fold_in(key, 100),
                                           (num_classes, 84), f32),
        "fc3_b": scale * jax.random.normal(jax.random.fold_in(key, 101),
                                           (num_classes,), f32),
    }


if __name__ == "__main__":
    # LeNet requires 28x28 single-channel input (fc1 expects 16*5*5 features).
    x = jax.random.normal(jax.random.PRNGKey(0), (2, 1, 28, 28), dtype=jnp.float32)
    params = init_params(jax.random.PRNGKey(1))

    out = jax.jit(lenet_forward)(x, params)
    out = jax.block_until_ready(out)
    assert out.shape == (2, 10) and out.dtype == jnp.float32
    print("KERNEL_OK")
</pallas_src>

<mosaic_0001>
module attributes {stable_mosaic.version = 11 : i64} {
  func.func @_stage1_kernel(%arg0: i32, %arg1: memref<1568x25xbf16, #tpu.memory_space<vmem>>, %arg2: memref<25x6xbf16, #tpu.memory_space<vmem>>, %arg3: memref<1x6xf32, #tpu.memory_space<vmem>>, %arg4: memref<392x6xbf16, #tpu.memory_space<vmem>>) attributes {dimension_semantics = [#tpu.dimension_semantics<arbitrary>], iteration_bounds = array<i64: 1>, scalar_prefetch = 0 : i64, scratch_operands = 0 : i64, tpu.core_type = #tpu.core_type<tc>, window_params = [{pipeline_mode = #tpu.pipeline_mode<synchronous>, transform_indices = @transform_0, window_bounds = array<i64: 1568, 25>}, {pipeline_mode = #tpu.pipeline_mode<synchronous>, transform_indices = @transform_1, window_bounds = array<i64: 25, 6>}, {pipeline_mode = #tpu.pipeline_mode<synchronous>, transform_indices = @transform_2, window_bounds = array<i64: 1, 6>}, {pipeline_mode = #tpu.pipeline_mode<synchronous>, transform_indices = @transform_3, window_bounds = array<i64: 392, 6>}]} {
    %c0 = arith.constant 0 : index
    %c0_0 = arith.constant 0 : index
    %0 = vector.load %arg1[%c0, %c0_0] : memref<1568x25xbf16, #tpu.memory_space<vmem>>, vector<1568x25xbf16>
    %c0_1 = arith.constant 0 : index
    %c0_2 = arith.constant 0 : index
    %1 = vector.load %arg2[%c0_1, %c0_2] : memref<25x6xbf16, #tpu.memory_space<vmem>>, vector<25x6xbf16>
    %cst = arith.constant dense<0.000000e+00> : vector<1568x6xf32>
    %2 = tpu.matmul %0, %1, %cst {dimension_numbers = #tpu.dot_dimension_numbers<[1], [0], [0], [1], [0, 0, 1, 1], [], []>} : vector<1568x25xbf16>, vector<25x6xbf16>, vector<1568x6xf32> -> vector<1568x6xf32>
    %c0_3 = arith.constant 0 : index
    %c0_4 = arith.constant 0 : index
    %3 = vector.load %arg3[%c0_3, %c0_4] : memref<1x6xf32, #tpu.memory_space<vmem>>, vector<1x6xf32>
    %4 = vector.broadcast %3 : vector<1x6xf32> to vector<1568x6xf32>
    %5 = arith.addf %2, %4 : vector<1568x6xf32>
    %cst_5 = arith.constant 0.000000e+00 : f32
    %6 = vector.broadcast %cst_5 : f32 to vector<1568x6xf32>
    %7 = arith.maximumf %5, %6 : vector<1568x6xf32>
    %8 = vector.extract_strided_slice %7 {offsets = [0, 0], sizes = [392, 6], strides = [1, 1]} : vector<1568x6xf32> to vector<392x6xf32>
    %9 = vector.extract_strided_slice %7 {offsets = [392, 0], sizes = [392, 6], strides = [1, 1]} : vector<1568x6xf32> to vector<392x6xf32>
    %10 = arith.addf %8, %9 : vector<392x6xf32>
    %11 = vector.extract_strided_slice %7 {offsets = [784, 0], sizes = [392, 6], strides = [1, 1]} : vector<1568x6xf32> to vector<392x6xf32>
    %12 = arith.addf %10, %11 : vector<392x6xf32>
    %13 = vector.extract_strided_slice %7 {offsets = [1176, 0], sizes = [392, 6], strides = [1, 1]} : vector<1568x6xf32> to vector<392x6xf32>
    %14 = arith.addf %12, %13 : vector<392x6xf32>
    %cst_6 = arith.constant 2.500000e-01 : f32
    %15 = vector.broadcast %cst_6 : f32 to vector<392x6xf32>
    %16 = arith.mulf %15, %14 : vector<392x6xf32>
    %17 = arith.truncf %16 : vector<392x6xf32> to vector<392x6xbf16>
    %c0_7 = arith.constant 0 : index
    %c0_8 = arith.constant 0 : index
    %18 = vector.load %arg4[%c0_7, %c0_8] : memref<392x6xbf16, #tpu.memory_space<vmem>>, vector<392x6xbf16>
    tpu.vector_store %arg4[%c0_7, %c0_8], %17 {strides = array<i32>} : memref<392x6xbf16, #tpu.memory_space<vmem>>, vector<392x6xbf16>,
    return
  }
  func.func @transform_0(%arg0: i32) -> (i32, i32) {
    %c0_i32 = arith.constant 0 : i32
    %c0_i32_0 = arith.constant 0 : i32
    %c0_i32_1 = arith.constant 0 : i32
    return %c0_i32, %c0_i32_0 : i32, i32
  }
  func.func @transform_1(%arg0: i32) -> (i32, i32) {
    %c0_i32 = arith.constant 0 : i32
    %c0_i32_0 = arith.constant 0 : i32
    %c0_i32_1 = arith.constant 0 : i32
    return %c0_i32, %c0_i32_0 : i32, i32
  }
  func.func @transform_2(%arg0: i32) -> (i32, i32) {
    %c0_i32 = arith.constant 0 : i32
    %c0_i32_0 = arith.constant 0 : i32
    %c0_i32_1 = arith.constant 0 : i32
    return %c0_i32, %c0_i32_0 : i32, i32
  }
  func.func @transform_3(%arg0: i32) -> (i32, i32) {
    %c0_i32 = arith.constant 0 : i32
    %c0_i32_0 = arith.constant 0 : i32
    %c0_i32_1 = arith.constant 0 : i32
    return %c0_i32, %c0_i32_0 : i32, i32
  }
}

module attributes {stable_mosaic.version = 11 : i64} {
  func.func @_stage2_kernel(%arg0: i32, %arg1: memref<800x150xbf16, #tpu.memory_space<vmem>>, %arg2: memref<150x16xbf16, #tpu.memory_space<vmem>>, %arg3: memref<1x16xf32, #tpu.memory_space<vmem>>, %arg4: memref<25x16x120xbf16, #tpu.memory_space<vmem>>, %arg5: memref<1x120xf32, #tpu.memory_space<vmem>>, %arg6: memref<120x84xbf16, #tpu.memory_space<vmem>>, %arg7: memref<1x84xf32, #tpu.memory_space<vmem>>, %arg8: memref<84x10xbf16, #tpu.memory_space<vmem>>, %arg9: memref<1x10xf32, #tpu.memory_space<vmem>>, %arg10: memref<2x10xf32, #tpu.memory_space<vmem>>) attributes {dimension_semantics = [#tpu.dimension_semantics<arbitrary>], iteration_bounds = array<i64: 1>, scalar_prefetch = 0 : i64, scratch_operands = 0 : i64, tpu.core_type = #tpu.core_type<tc>, window_params = [{pipeline_mode = #tpu.pipeline_mode<synchronous>, transform_indices = @transform_0, window_bounds = array<i64: 800, 150>}, {pipeline_mode = #tpu.pipeline_mode<synchronous>, transform_indices = @transform_1, window_bounds = array<i64: 150, 16>}, {pipeline_mode = #tpu.pipeline_mode<synchronous>, transform_indices = @transform_2, window_bounds = array<i64: 1, 16>}, {pipeline_mode = #tpu.pipeline_mode<synchronous>, transform_indices = @transform_3, window_bounds = array<i64: 25, 16, 120>}, {pipeline_mode = #tpu.pipeline_mode<synchronous>, transform_indices = @transform_4, window_bounds = array<i64: 1, 120>}, {pipeline_mode = #tpu.pipeline_mode<synchronous>, transform_indices = @transform_5, window_bounds = array<i64: 120, 84>}, {pipeline_mode = #tpu.pipeline_mode<synchronous>, transform_indices = @transform_6, window_bounds = array<i64: 1, 84>}, {pipeline_mode = #tpu.pipeline_mode<synchronous>, transform_indices = @transform_7, window_bounds = array<i64: 84, 10>}, {pipeline_mode = #tpu.pipeline_mode<synchronous>, transform_indices = @transform_8, window_bounds = array<i64: 1, 10>}, {pipeline_mode = #tpu.pipeline_mode<synchronous>, transform_indices = @transform_9, window_bounds = array<i64: 2, 10>}]} {
    %c0 = arith.constant 0 : index
    %c0_0 = arith.constant 0 : index
    %0 = vector.load %arg1[%c0, %c0_0] : memref<800x150xbf16, #tpu.memory_space<vmem>>, vector<800x150xbf16>
    %c0_1 = arith.constant 0 : index
    %c0_2 = arith.constant 0 : index
    %1 = vector.load %arg2[%c0_1, %c0_2] : memref<150x16xbf16, #tpu.memory_space<vmem>>, vector<150x16xbf16>
    %cst = arith.constant dense<0.000000e+00> : vector<800x16xf32>
    %2 = tpu.matmul %0, %1, %cst {dimension_numbers = #tpu.dot_dimension_numbers<[1], [0], [0], [1], [0, 0, 1, 1], [], []>} : vector<800x150xbf16>, vector<150x16xbf16>, vector<800x16xf32> -> vector<800x16xf32>
    %c0_3 = arith.constant 0 : index
    %c0_4 = arith.constant 0 : index
    %3 = vector.load %arg3[%c0_3, %c0_4] : memref<1x16xf32, #tpu.memory_space<vmem>>, vector<1x16xf32>
    %4 = vector.broadcast %3 : vector<1x16xf32> to vector<800x16xf32>
    %5 = arith.addf %2, %4 : vector<800x16xf32>
    %cst_5 = arith.constant 0.000000e+00 : f32
    %6 = vector.broadcast %cst_5 : f32 to vector<800x16xf32>
    %7 = arith.maximumf %5, %6 : vector<800x16xf32>
    %8 = vector.extract_strided_slice %7 {offsets = [0, 0], sizes = [200, 16], strides = [1, 1]} : vector<800x16xf32> to vector<200x16xf32>
    %9 = vector.extract_strided_slice %7 {offsets = [200, 0], sizes = [200, 16], strides = [1, 1]} : vector<800x16xf32> to vector<200x16xf32>
    %10 = arith.addf %8, %9 : vector<200x16xf32>
    %11 = vector.extract_strided_slice %7 {offsets = [400, 0], sizes = [200, 16], strides = [1, 1]} : vector<800x16xf32> to vector<200x16xf32>
    %12 = arith.addf %10, %11 : vector<200x16xf32>
    %13 = vector.extract_strided_slice %7 {offsets = [600, 0], sizes = [200, 16], strides = [1, 1]} : vector<800x16xf32> to vector<200x16xf32>
    %14 = arith.addf %12, %13 : vector<200x16xf32>
    %cst_6 = arith.constant 2.500000e-01 : f32
    %15 = vector.broadcast %cst_6 : f32 to vector<200x16xf32>
    %16 = arith.mulf %15, %14 : vector<200x16xf32>
    %cst_7 = arith.constant 0.000000e+00 : f32
    %17 = vector.broadcast %cst_7 : f32 to vector<8x120xf32>
    %18 = vector.extract_strided_slice %16 {offsets = [0, 0], sizes = [8, 16], strides = [1, 1]} : vector<200x16xf32> to vector<8x16xf32>
    %19 = arith.truncf %18 : vector<8x16xf32> to vector<8x16xbf16>
    %c0_8 = arith.constant 0 : index
    %c0_9 = arith.constant 0 : index
    %c0_10 = arith.constant 0 : index
    %20 = vector.load %arg4[%c0_8, %c0_9, %c0_10] : memref<25x16x120xbf16, #tpu.memory_space<vmem>>, vector<1x16x120xbf16>
    %21 = vector.shape_cast %20 : vector<1x16x120xbf16> to vector<16x120xbf16>
    %cst_11 = arith.constant dense<0.000000e+00> : vector<8x120xf32>
    %22 = tpu.matmul %19, %21, %cst_11 {dimension_numbers = #tpu.dot_dimension_numbers<[1], [0], [0], [1], [0, 0, 1, 1], [], []>} : vector<8x16xbf16>, vector<16x120xbf16>, vector<8x120xf32> -> vector<8x120xf32>
    %23 = arith.addf %17, %22 : vector<8x120xf32>
    %24 = vector.extract_strided_slice %16 {offsets = [8, 0], sizes = [8, 16], strides = [1, 1]} : vector<200x16xf32> to vector<8x16xf32>
    %25 = arith.truncf %24 : vector<8x16xf32> to vector<8x16xbf16>
    %c1 = arith.constant 1 : index
    %c0_12 = arith.constant 0 : index
    %c0_13 = arith.constant 0 : index
    %26 = vector.load %arg4[%c1, %c0_12, %c0_13] : memref<25x16x120xbf16, #tpu.memory_space<vmem>>, vector<1x16x120xbf16>
    %27 = vector.shape_cast %26 : vector<1x16x120xbf16> to vector<16x120xbf16>
    %cst_14 = arith.constant dense<0.000000e+00> : vector<8x120xf32>
    %28 = tpu.matmul %25, %27, %cst_14 {dimension_numbers = #tpu.dot_dimension_numbers<[1], [0], [0], [1], [0, 0, 1, 1], [], []>} : vector<8x16xbf16>, vector<16x120xbf16>, vector<8x120xf32> -> vector<8x120xf32>
    %29 = arith.addf %23, %28 : vector<8x120xf32>
    %30 = vector.extract_strided_slice %16 {offsets = [16, 0], sizes = [8, 16], strides = [1, 1]} : vector<200x16xf32> to vector<8x16xf32>
    %31 = arith.truncf %30 : vector<8x16xf32> to vector<8x16xbf16>
    %c2 = arith.constant 2 : index
    %c0_15 = arith.constant 0 : index
    %c0_16 = arith.constant 0 : index
    %32 = vector.load %arg4[%c2, %c0_15, %c0_16] : memref<25x16x120xbf16, #tpu.memory_space<vmem>>, vector<1x16x120xbf16>
    %33 = vector.shape_cast %32 : vector<1x16x120xbf16> to vector<16x120xbf16>
    %cst_17 = arith.constant dense<0.000000e+00> : vector<8x120xf32>
    %34 = tpu.matmul %31, %33, %cst_17 {dimension_numbers = #tpu.dot_dimension_numbers<[1], [0], [0], [1], [0, 0, 1, 1], [], []>} : vector<8x16xbf16>, vector<16x120xbf16>, vector<8x120xf32> -> vector<8x120xf32>
    %35 = arith.addf %29, %34 : vector<8x120xf32>
    %36 = vector.extract_strided_slice %16 {offsets = [24, 0], sizes = [8, 16], strides = [1, 1]} : vector<200x16xf32> to vector<8x16xf32>
    %37 = arith.truncf %36 : vector<8x16xf32> to vector<8x16xbf16>
    %c3 = arith.constant 3 : index
    %c0_18 = arith.constant 0 : index
    %c0_19 = arith.constant 0 : index
    %38 = vector.load %arg4[%c3, %c0_18, %c0_19] : memref<25x16x120xbf16, #tpu.memory_space<vmem>>, vector<1x16x120xbf16>
    %39 = vector.shape_cast %38 : vector<1x16x120xbf16> to vector<16x120xbf16>
    %cst_20 = arith.constant dense<0.000000e+00> : vector<8x120xf32>
    %40 = tpu.matmul %37, %39, %cst_20 {dimension_numbers = #tpu.dot_dimension_numbers<[1], [0], [0], [1], [0, 0, 1, 1], [], []>} : vector<8x16xbf16>, vector<16x120xbf16>, vector<8x120xf32> -> vector<8x120xf32>
    %41 = arith.addf %35, %40 : vector<8x120xf32>
    %42 = vector.extract_strided_slice %16 {offsets = [32, 0], sizes = [8, 16], strides = [1, 1]} : vector<200x16xf32> to vector<8x16xf32>
    %43 = arith.truncf %42 : vector<8x16xf32> to vector<8x16xbf16>
    %c4 = arith.constant 4 : index
    %c0_21 = arith.constant 0 : index
    %c0_22 = arith.constant 0 : index
    %44 = vector.load %arg4[%c4, %c0_21, %c0_22] : memref<25x16x120xbf16, #tpu.memory_space<vmem>>, vector<1x16x120xbf16>
    %45 = vector.shape_cast %44 : vector<1x16x120xbf16> to vector<16x120xbf16>
    %cst_23 = arith.constant dense<0.000000e+00> : vector<8x120xf32>
    %46 = tpu.matmul %43, %45, %cst_23 {dimension_numbers = #tpu.dot_dimension_numbers<[1], [0], [0], [1], [0, 0, 1, 1], [], []>} : vector<8x16xbf16>, vector<16x120xbf16>, vector<8x120xf32> -> vector<8x120xf32>
    %47 = arith.addf %41, %46 : vector<8x120xf32>
    %48 = vector.extract_strided_slice %16 {offsets = [40, 0], sizes = [8, 16], strides = [1, 1]} : vector<200x16xf32> to vector<8x16xf32>
    %49 = arith.truncf %48 : vector<8x16xf32> to vector<8x16xbf16>
    %c5 = arith.constant 5 : index
    %c0_24 = arith.constant 0 : index
    %c0_25 = arith.constant 0 : index
    %50 = vector.load %arg4[%c5, %c0_24, %c0_25] : memref<25x16x120xbf16, #tpu.memory_space<vmem>>, vector<1x16x120xbf16>
    %51 = vector.shape_cast %50 : vector<1x16x120xbf16> to vector<16x120xbf16>
    %cst_26 = arith.constant dense<0.000000e+00> : vector<8x120xf32>
    %52 = tpu.matmul %49, %51, %cst_26 {dimension_numbers = #tpu.dot_dimension_numbers<[1], [0], [0], [1], [0, 0, 1, 1], [], []>} : vector<8x16xbf16>, vector<16x120xbf16>, vector<8x120xf32> -> vector<8x120xf32>
    %53 = arith.addf %47, %52 : vector<8x120xf32>
    %54 = vector.extract_strided_slice %16 {offsets = [48, 0], sizes = [8, 16], strides = [1, 1]} : vector<200x16xf32> to vector<8x16xf32>
    %55 = arith.truncf %54 : vector<8x16xf32> to vector<8x16xbf16>
    %c6 = arith.constant 6 : index
    %c0_27 = arith.constant 0 : index
    %c0_28 = arith.constant 0 : index
    %56 = vector.load %arg4[%c6, %c0_27, %c0_28] : memref<25x16x120xbf16, #tpu.memory_space<vmem>>, vector<1x16x120xbf16>
    %57 = vector.shape_cast %56 : vector<1x16x120xbf16> to vector<16x120xbf16>
    %cst_29 = arith.constant dense<0.000000e+00> : vector<8x120xf32>
    %58 = tpu.matmul %55, %57, %cst_29 {dimension_numbers = #tpu.dot_dimension_numbers<[1], [0], [0], [1], [0, 0, 1, 1], [], []>} : vector<8x16xbf16>, vector<16x120xbf16>, vector<8x120xf32> -> vector<8x120xf32>
    %59 = arith.addf %53, %58 : vector<8x120xf32>
    %60 = vector.extract_strided_slice %16 {offsets = [56, 0], sizes = [8, 16], strides = [1, 1]} : vector<200x16xf32> to vector<8x16xf32>
    %61 = arith.truncf %60 : vector<8x16xf32> to vector<8x16xbf16>
    %c7 = arith.constant 7 : index
    %c0_30 = arith.constant 0 : index
    %c0_31 = arith.constant 0 : index
    %62 = vector.load %arg4[%c7, %c0_30, %c0_31] : memref<25x16x120xbf16, #tpu.memory_space<vmem>>, vector<1x16x120xbf16>
    %63 = vector.shape_cast %62 : vector<1x16x120xbf16> to vector<16x120xbf16>
    %cst_32 = arith.constant dense<0.000000e+00> : vector<8x120xf32>
    %64 = tpu.matmul %61, %63, %cst_32 {dimension_numbers = #tpu.dot_dimension_numbers<[1], [0], [0], [1], [0, 0, 1, 1], [], []>} : vector<8x16xbf16>, vector<16x120xbf16>, vector<8x120xf32> -> vector<8x120xf32>
    %65 = arith.addf %59, %64 : vector<8x120xf32>
    %66 = vector.extract_strided_slice %16 {offsets = [64, 0], sizes = [8, 16], strides = [1, 1]} : vector<200x16xf32> to vector<8x16xf32>
    %67 = arith.truncf %66 : vector<8x16xf32> to vector<8x16xbf16>
    %c8 = arith.constant 8 : index
    %c0_33 = arith.constant 0 : index
    %c0_34 = arith.constant 0 : index
    %68 = vector.load %arg4[%c8, %c0_33, %c0_34] : memref<25x16x120xbf16, #tpu.memory_space<vmem>>, vector<1x16x120xbf16>
    %69 = vector.shape_cast %68 : vector<1x16x120xbf16> to vector<16x120xbf16>
    %cst_35 = arith.constant dense<0.000000e+00> : vector<8x120xf32>
    %70 = tpu.matmul %67, %69, %cst_35 {dimension_numbers = #tpu.dot_dimension_numbers<[1], [0], [0], [1], [0, 0, 1, 1], [], []>} : vector<8x16xbf16>, vector<16x120xbf16>, vector<8x120xf32> -> vector<8x120xf32>
    %71 = arith.addf %65, %70 : vector<8x120xf32>
    %72 = vector.extract_strided_slice %16 {offsets = [72, 0], sizes = [8, 16], strides = [1, 1]} : vector<200x16xf32> to vector<8x16xf32>
    %73 = arith.truncf %72 : vector<8x16xf32> to vector<8x16xbf16>
    %c9 = arith.constant 9 : index
    %c0_36 = arith.constant 0 : index
    %c0_37 = arith.constant 0 : index
    %74 = vector.load %arg4[%c9, %c0_36, %c0_37] : memref<25x16x120xbf16, #tpu.memory_space<vmem>>, vector<1x16x120xbf16>
    %75 = vector.shape_cast %74 : vector<1x16x120xbf16> to vector<16x120xbf16>
    %cst_38 = arith.constant dense<0.000000e+00> : vector<8x120xf32>
    %76 = tpu.matmul %73, %75, %cst_38 {dimension_numbers = #tpu.dot_dimension_numbers<[1], [0], [0], [1], [0, 0, 1, 1], [], []>} : vector<8x16xbf16>, vector<16x120xbf16>, vector<8x120xf32> -> vector<8x120xf32>
    %77 = arith.addf %71, %76 : vector<8x120xf32>
    %78 = vector.extract_strided_slice %16 {offsets = [80, 0], sizes = [8, 16], strides = [1, 1]} : vector<200x16xf32> to vector<8x16xf32>
    %79 = arith.truncf %78 : vector<8x16xf32> to vector<8x16xbf16>
    %c10 = arith.constant 10 : index
    %c0_39 = arith.constant 0 : index
    %c0_40 = arith.constant 0 : index
    %80 = vector.load %arg4[%c10, %c0_39, %c0_40] : memref<25x16x120xbf16, #tpu.memory_space<vmem>>, vector<1x16x120xbf16>
    %81 = vector.shape_cast %80 : vector<1x16x120xbf16> to vector<16x120xbf16>
    %cst_41 = arith.constant dense<0.000000e+00> : vector<8x120xf32>
    %82 = tpu.matmul %79, %81, %cst_41 {dimension_numbers = #tpu.dot_dimension_numbers<[1], [0], [0], [1], [0, 0, 1, 1], [], []>} : vector<8x16xbf16>, vector<16x120xbf16>, vector<8x120xf32> -> vector<8x120xf32>
    %83 = arith.addf %77, %82 : vector<8x120xf32>
    %84 = vector.extract_strided_slice %16 {offsets = [88, 0], sizes = [8, 16], strides = [1, 1]} : vector<200x16xf32> to vector<8x16xf32>
    %85 = arith.truncf %84 : vector<8x16xf32> to vector<8x16xbf16>
    %c11 = arith.constant 11 : index
    %c0_42 = arith.constant 0 : index
    %c0_43 = arith.constant 0 : index
    %86 = vector.load %arg4[%c11, %c0_42, %c0_43] : memref<25x16x120xbf16, #tpu.memory_space<vmem>>, vector<1x16x120xbf16>
    %87 = vector.shape_cast %86 : vector<1x16x120xbf16> to vector<16x120xbf16>
    %cst_44 = arith.constant dense<0.000000e+00> : vector<8x120xf32>
    %88 = tpu.matmul %85, %87, %cst_44 {dimension_numbers = #tpu.dot_dimension_numbers<[1], [0], [0], [1], [0, 0, 1, 1], [], []>} : vector<8x16xbf16>, vector<16x120xbf16>, vector<8x120xf32> -> vector<8x120xf32>
    %89 = arith.addf %83, %88 : vector<8x120xf32>
    %90 = vector.extract_strided_slice %16 {offsets = [96, 0], sizes = [8, 16], strides = [1, 1]} : vector<200x16xf32> to vector<8x16xf32>
    %91 = arith.truncf %90 : vector<8x16xf32> to vector<8x16xbf16>
    %c12 = arith.constant 12 : index
    %c0_45 = arith.constant 0 : index
    %c0_46 = arith.constant 0 : index
    %92 = vector.load %arg4[%c12, %c0_45, %c0_46] : memref<25x16x120xbf16, #tpu.memory_space<vmem>>, vector<1x16x120xbf16>
    %93 = vector.shape_cast %92 : vector<1x16x120xbf16> to vector<16x120xbf16>
    %cst_47 = arith.constant dense<0.000000e+00> : vector<8x120xf32>
    %94 = tpu.matmul %91, %93, %cst_47 {dimension_numbers = #tpu.dot_dimension_numbers<[1], [0], [0], [1], [0, 0, 1, 1], [], []>} : vector<8x16xbf16>, vector<16x120xbf16>, vector<8x120xf32> -> vector<8x120xf32>
    %95 = arith.addf %89, %94 : vector<8x120xf32>
    %96 = vector.extract_strided_slice %16 {offsets = [104, 0], sizes = [8, 16], strides = [1, 1]} : vector<200x16xf32> to vector<8x16xf32>
    %97 = arith.truncf %96 : vector<8x16xf32> to vector<8x16xbf16>
    %c13 = arith.constant 13 : index
    %c0_48 = arith.constant 0 : index
    %c0_49 = arith.constant 0 : index
    %98 = vector.load %arg4[%c13, %c0_48, %c0_49] : memref<25x16x120xbf16, #tpu.memory_space<vmem>>, vector<1x16x120xbf16>
    %99 = vector.shape_cast %98 : vector<1x16x120xbf16> to vector<16x120xbf16>
    %cst_50 = arith.constant dense<0.000000e+00> : vector<8x120xf32>
    %100 = tpu.matmul %97, %99, %cst_50 {dimension_numbers = #tpu.dot_dimension_numbers<[1], [0], [0], [1], [0, 0, 1, 1], [], []>} : vector<8x16xbf16>, vector<16x120xbf16>, vector<8x120xf32> -> vector<8x120xf32>
    %101 = arith.addf %95, %100 : vector<8x120xf32>
    %102 = vector.extract_strided_slice %16 {offsets = [112, 0], sizes = [8, 16], strides = [1, 1]} : vector<200x16xf32> to vector<8x16xf32>
    %103 = arith.truncf %102 : vector<8x16xf32> to vector<8x16xbf16>
    %c14 = arith.constant 14 : index
    %c0_51 = arith.constant 0 : index
    %c0_52 = arith.constant 0 : index
    %104 = vector.load %arg4[%c14, %c0_51, %c0_52] : memref<25x16x120xbf16, #tpu.memory_space<vmem>>, vector<1x16x120xbf16>
    %105 = vector.shape_cast %104 : vector<1x16x120xbf16> to vector<16x120xbf16>
    %cst_53 = arith.constant dense<0.000000e+00> : vector<8x120xf32>
    %106 = tpu.matmul %103, %105, %cst_53 {dimension_numbers = #tpu.dot_dimension_numbers<[1], [0], [0], [1], [0, 0, 1, 1], [], []>} : vector<8x16xbf16>, vector<16x120xbf16>, vector<8x120xf32> -> vector<8x120xf32>
    %107 = arith.addf %101, %106 : vector<8x120xf32>
    %108 = vector.extract_strided_slice %16 {offsets = [120, 0], sizes = [8, 16], strides = [1, 1]} : vector<200x16xf32> to vector<8x16xf32>
    %109 = arith.truncf %108 : vector<8x16xf32> to vector<8x16xbf16>
    %c15 = arith.constant 15 : index
    %c0_54 = arith.constant 0 : index
    %c0_55 = arith.constant 0 : index
    %110 = vector.load %arg4[%c15, %c0_54, %c0_55] : memref<25x16x120xbf16, #tpu.memory_space<vmem>>, vector<1x16x120xbf16>
    %111 = vector.shape_cast %110 : vector<1x16x120xbf16> to vector<16x120xbf16>
    %cst_56 = arith.constant dense<0.000000e+00> : vector<8x120xf32>
    %112 = tpu.matmul %109, %111, %cst_56 {dimension_numbers = #tpu.dot_dimension_numbers<[1], [0], [0], [1], [0, 0, 1, 1], [], []>} : vector<8x16xbf16>, vector<16x120xbf16>, vector<8x120xf32> -> vector<8x120xf32>
    %113 = arith.addf %107, %112 : vector<8x120xf32>
    %114 = vector.extract_strided_slice %16 {offsets = [128, 0], sizes = [8, 16], strides = [1, 1]} : vector<200x16xf32> to vector<8x16xf32>
    %115 = arith.truncf %114 : vector<8x16xf32> to vector<8x16xbf16>
    %c16 = arith.constant 16 : index
    %c0_57 = arith.constant 0 : index
    %c0_58 = arith.constant 0 : index
    %116 = vector.load %arg4[%c16, %c0_57, %c0_58] : memref<25x16x120xbf16, #tpu.memory_space<vmem>>, vector<1x16x120xbf16>
    %117 = vector.shape_cast %116 : vector<1x16x120xbf16> to vector<16x120xbf16>
    %cst_59 = arith.constant dense<0.000000e+00> : vector<8x120xf32>
    %118 = tpu.matmul %115, %117, %cst_59 {dimension_numbers = #tpu.dot_dimension_numbers<[1], [0], [0], [1], [0, 0, 1, 1], [], []>} : vector<8x16xbf16>, vector<16x120xbf16>, vector<8x120xf32> -> vector<8x120xf32>
    %119 = arith.addf %113, %118 : vector<8x120xf32>
    %120 = vector.extract_strided_slice %16 {offsets = [136, 0], sizes = [8, 16], strides = [1, 1]} : vector<200x16xf32> to vector<8x16xf32>
    %121 = arith.truncf %120 : vector<8x16xf32> to vector<8x16xbf16>
    %c17 = arith.constant 17 : index
    %c0_60 = arith.constant 0 : index
    %c0_61 = arith.constant 0 : index
    %122 = vector.load %arg4[%c17, %c0_60, %c0_61] : memref<25x16x120xbf16, #tpu.memory_space<vmem>>, vector<1x16x120xbf16>
    %123 = vector.shape_cast %122 : vector<1x16x120xbf16> to vector<16x120xbf16>
    %cst_62 = arith.constant dense<0.000000e+00> : vector<8x120xf32>
    %124 = tpu.matmul %121, %123, %cst_62 {dimension_numbers = #tpu.dot_dimension_numbers<[1], [0], [0], [1], [0, 0, 1, 1], [], []>} : vector<8x16xbf16>, vector<16x120xbf16>, vector<8x120xf32> -> vector<8x120xf32>
    %125 = arith.addf %119, %124 : vector<8x120xf32>
    %126 = vector.extract_strided_slice %16 {offsets = [144, 0], sizes = [8, 16], strides = [1, 1]} : vector<200x16xf32> to vector<8x16xf32>
    %127 = arith.truncf %126 : vector<8x16xf32> to vector<8x16xbf16>
    %c18 = arith.constant 18 : index
    %c0_63 = arith.constant 0 : index
    %c0_64 = arith.constant 0 : index
    %128 = vector.load %arg4[%c18, %c0_63, %c0_64] : memref<25x16x120xbf16, #tpu.memory_space<vmem>>, vector<1x16x120xbf16>
    %129 = vector.shape_cast %128 : vector<1x16x120xbf16> to vector<16x120xbf16>
    %cst_65 = arith.constant dense<0.000000e+00> : vector<8x120xf32>
    %130 = tpu.matmul %127, %129, %cst_65 {dimension_numbers = #tpu.dot_dimension_numbers<[1], [0], [0], [1], [0, 0, 1, 1], [], []>} : vector<8x16xbf16>, vector<16x120xbf16>, vector<8x120xf32> -> vector<8x120xf32>
    %131 = arith.addf %125, %130 : vector<8x120xf32>
    %132 = vector.extract_strided_slice %16 {offsets = [152, 0], sizes = [8, 16], strides = [1, 1]} : vector<200x16xf32> to vector<8x16xf32>
    %133 = arith.truncf %132 : vector<8x16xf32> to vector<8x16xbf16>
    %c19 = arith.constant 19 : index
    %c0_66 = arith.constant 0 : index
    %c0_67 = arith.constant 0 : index
    %134 = vector.load %arg4[%c19, %c0_66, %c0_67] : memref<25x16x120xbf16, #tpu.memory_space<vmem>>, vector<1x16x120xbf16>
    %135 = vector.shape_cast %134 : vector<1x16x120xbf16> to vector<16x120xbf16>
    %cst_68 = arith.constant dense<0.000000e+00> : vector<8x120xf32>
    %136 = tpu.matmul %133, %135, %cst_68 {dimension_numbers = #tpu.dot_dimension_numbers<[1], [0], [0], [1], [0, 0, 1, 1], [], []>} : vector<8x16xbf16>, vector<16x120xbf16>, vector<8x120xf32> -> vector<8x120xf32>
    %137 = arith.addf %131, %136 : vector<8x120xf32>
    %138 = vector.extract_strided_slice %16 {offsets = [160, 0], sizes = [8, 16], strides = [1, 1]} : vector<200x16xf32> to vector<8x16xf32>
    %139 = arith.truncf %138 : vector<8x16xf32> to vector<8x16xbf16>
    %c20 = arith.constant 20 : index
    %c0_69 = arith.constant 0 : index
    %c0_70 = arith.constant 0 : index
    %140 = vector.load %arg4[%c20, %c0_69, %c0_70] : memref<25x16x120xbf16, #tpu.memory_space<vmem>>, vector<1x16x120xbf16>
    %141 = vector.shape_cast %140 : vector<1x16x120xbf16> to vector<16x120xbf16>
    %cst_71 = arith.constant dense<0.000000e+00> : vector<8x120xf32>
    %142 = tpu.matmul %139, %141, %cst_71 {dimension_numbers = #tpu.dot_dimension_numbers<[1], [0], [0], [1], [0, 0, 1, 1], [], []>} : vector<8x16xbf16>, vector<16x120xbf16>, vector<8x120xf32> -> vector<8x120xf32>
    %143 = arith.addf %137, %142 : vector<8x120xf32>
    %144 = vector.extract_strided_slice %16 {offsets = [168, 0], sizes = [8, 16], strides = [1, 1]} : vector<200x16xf32> to vector<8x16xf32>
    %145 = arith.truncf %144 : vector<8x16xf32> to vector<8x16xbf16>
    %c21 = arith.constant 21 : index
    %c0_72 = arith.constant 0 : index
    %c0_73 = arith.constant 0 : index
    %146 = vector.load %arg4[%c21, %c0_72, %c0_73] : memref<25x16x120xbf16, #tpu.memory_space<vmem>>, vector<1x16x120xbf16>
    %147 = vector.shape_cast %146 : vector<1x16x120xbf16> to vector<16x120xbf16>
    %cst_74 = arith.constant dense<0.000000e+00> : vector<8x120xf32>
    %148 = tpu.matmul %145, %147, %cst_74 {dimension_numbers = #tpu.dot_dimension_numbers<[1], [0], [0], [1], [0, 0, 1, 1], [], []>} : vector<8x16xbf16>, vector<16x120xbf16>, vector<8x120xf32> -> vector<8x120xf32>
    %149 = arith.addf %143, %148 : vector<8x120xf32>
    %150 = vector.extract_strided_slice %16 {offsets = [176, 0], sizes = [8, 16], strides = [1, 1]} : vector<200x16xf32> to vector<8x16xf32>
    %151 = arith.truncf %150 : vector<8x16xf32> to vector<8x16xbf16>
    %c22 = arith.constant 22 : index
    %c0_75 = arith.constant 0 : index
    %c0_76 = arith.constant 0 : index
    %152 = vector.load %arg4[%c22, %c0_75, %c0_76] : memref<25x16x120xbf16, #tpu.memory_space<vmem>>, vector<1x16x120xbf16>
    %153 = vector.shape_cast %152 : vector<1x16x120xbf16> to vector<16x120xbf16>
    %cst_77 = arith.constant dense<0.000000e+00> : vector<8x120xf32>
    %154 = tpu.matmul %151, %153, %cst_77 {dimension_numbers = #tpu.dot_dimension_numbers<[1], [0], [0], [1], [0, 0, 1, 1], [], []>} : vector<8x16xbf16>, vector<16x120xbf16>, vector<8x120xf32> -> vector<8x120xf32>
    %155 = arith.addf %149, %154 : vector<8x120xf32>
    %156 = vector.extract_strided_slice %16 {offsets = [184, 0], sizes = [8, 16], strides = [1, 1]} : vector<200x16xf32> to vector<8x16xf32>
    %157 = arith.truncf %156 : vector<8x16xf32> to vector<8x16xbf16>
    %c23 = arith.constant 23 : index
    %c0_78 = arith.constant 0 : index
    %c0_79 = arith.constant 0 : index
    %158 = vector.load %arg4[%c23, %c0_78, %c0_79] : memref<25x16x120xbf16, #tpu.memory_space<vmem>>, vector<1x16x120xbf16>
    %159 = vector.shape_cast %158 : vector<1x16x120xbf16> to vector<16x120xbf16>
    %cst_80 = arith.constant dense<0.000000e+00> : vector<8x120xf32>
    %160 = tpu.matmul %157, %159, %cst_80 {dimension_numbers = #tpu.dot_dimension_numbers<[1], [0], [0], [1], [0, 0, 1, 1], [], []>} : vector<8x16xbf16>, vector<16x120xbf16>, vector<8x120xf32> -> vector<8x120xf32>
    %161 = arith.addf %155, %160 : vector<8x120xf32>
    %162 = vector.extract_strided_slice %16 {offsets = [192, 0], sizes = [8, 16], strides = [1, 1]} : vector<200x16xf32> to vector<8x16xf32>
    %163 = arith.truncf %162 : vector<8x16xf32> to vector<8x16xbf16>
    %c24 = arith.constant 24 : index
    %c0_81 = arith.constant 0 : index
    %c0_82 = arith.constant 0 : index
    %164 = vector.load %arg4[%c24, %c0_81, %c0_82] : memref<25x16x120xbf16, #tpu.memory_space<vmem>>, vector<1x16x120xbf16>
    %165 = vector.shape_cast %164 : vector<1x16x120xbf16> to vector<16x120xbf16>
    %cst_83 = arith.constant dense<0.000000e+00> : vector<8x120xf32>
    %166 = tpu.matmul %163, %165, %cst_83 {dimension_numbers = #tpu.dot_dimension_numbers<[1], [0], [0], [1], [0, 0, 1, 1], [], []>} : vector<8x16xbf16>, vector<16x120xbf16>, vector<8x120xf32> -> vector<8x120xf32>
    %167 = arith.addf %161, %166 : vector<8x120xf32>
    %c0_84 = arith.constant 0 : index
    %c0_85 = arith.constant 0 : index
    %168 = vector.load %arg5[%c0_84, %c0_85] : memref<1x120xf32, #tpu.memory_space<vmem>>, vector<1x120xf32>
    %169 = vector.broadcast %168 : vector<1x120xf32> to vector<8x120xf32>
    %170 = arith.addf %167, %169 : vector<8x120xf32>
    %cst_86 = arith.constant 0.000000e+00 : f32
    %171 = vector.broadcast %cst_86 : f32 to vector<8x120xf32>
    %172 = arith.maximumf %170, %171 : vector<8x120xf32>
    %173 = arith.truncf %172 : vector<8x120xf32> to vector<8x120xbf16>
    %c0_87 = arith.constant 0 : index
    %c0_88 = arith.constant 0 : index
    %174 = vector.load %arg6[%c0_87, %c0_88] : memref<120x84xbf16, #tpu.memory_space<vmem>>, vector<120x84xbf16>
    %cst_89 = arith.constant dense<0.000000e+00> : vector<8x84xf32>
    %175 = tpu.matmul %173, %174, %cst_89 {dimension_numbers = #tpu.dot_dimension_numbers<[1], [0], [0], [1], [0, 0, 1, 1], [], []>} : vector<8x120xbf16>, vector<120x84xbf16>, vector<8x84xf32> -> vector<8x84xf32>
    %c0_90 = arith.constant 0 : index
    %c0_91 = arith.constant 0 : index
    %176 = vector.load %arg7[%c0_90, %c0_91] : memref<1x84xf32, #tpu.memory_space<vmem>>, vector<1x84xf32>
    %177 = vector.broadcast %176 : vector<1x84xf32> to vector<8x84xf32>
    %178 = arith.addf %175, %177 : vector<8x84xf32>
    %cst_92 = arith.constant 0.000000e+00 : f32
    %179 = vector.broadcast %cst_92 : f32 to vector<8x84xf32>
    %180 = arith.maximumf %178, %179 : vector<8x84xf32>
    %181 = arith.truncf %180 : vector<8x84xf32> to vector<8x84xbf16>
    %c0_93 = arith.constant 0 : index
    %c0_94 = arith.constant 0 : index
    %182 = vector.load %arg8[%c0_93, %c0_94] : memref<84x10xbf16, #tpu.memory_space<vmem>>, vector<84x10xbf16>
    %cst_95 = arith.constant dense<0.000000e+00> : vector<8x10xf32>
    %183 = tpu.matmul %181, %182, %cst_95 {dimension_numbers = #tpu.dot_dimension_numbers<[1], [0], [0], [1], [0, 0, 1, 1], [], []>} : vector<8x84xbf16>, vector<84x10xbf16>, vector<8x10xf32> -> vector<8x10xf32>
    %c0_96 = arith.constant 0 : index
    %c0_97 = arith.constant 0 : index
    %184 = vector.load %arg9[%c0_96, %c0_97] : memref<1x10xf32, #tpu.memory_space<vmem>>, vector<1x10xf32>
    %185 = vector.broadcast %184 : vector<1x10xf32> to vector<8x10xf32>
    %186 = arith.addf %183, %185 : vector<8x10xf32>
    %187 = vector.extract_strided_slice %186 {offsets = [0, 0], sizes = [2, 10], strides = [1, 1]} : vector<8x10xf32> to vector<2x10xf32>
    %c0_98 = arith.constant 0 : index
    %c0_99 = arith.constant 0 : index
    %188 = vector.load %arg10[%c0_98, %c0_99] : memref<2x10xf32, #tpu.memory_space<vmem>>, vector<2x10xf32>
    tpu.vector_store %arg10[%c0_98, %c0_99], %187 {strides = array<i32>} : memref<2x10xf32, #tpu.memory_space<vmem>>, vector<2x10xf32>,
    return
  }
  func.func @transform_0(%arg0: i32) -> (i32, i32) {
    %c0_i32 = arith.constant 0 : i32
    %c0_i32_0 = arith.constant 0 : i32
    %c0_i32_1 = arith.constant 0 : i32
    return %c0_i32, %c0_i32_0 : i32, i32
  }
  func.func @transform_1(%arg0: i32) -> (i32, i32) {
    %c0_i32 = arith.constant 0 : i32
    %c0_i32_0 = arith.constant 0 : i32
    %c0_i32_1 = arith.constant 0 : i32
    return %c0_i32, %c0_i32_0 : i32, i32
  }
  func.func @transform_2(%arg0: i32) -> (i32, i32) {
    %c0_i32 = arith.constant 0 : i32
    %c0_i32_0 = arith.constant 0 : i32
    %c0_i32_1 = arith.constant 0 : i32
    return %c0_i32, %c0_i32_0 : i32, i32
  }
  func.func @transform_3(%arg0: i32) -> (i32, i32, i32) {
    %c0_i32 = arith.constant 0 : i32
    %c0_i32_0 = arith.constant 0 : i32
    %c0_i32_1 = arith.constant 0 : i32
    %c0_i32_2 = arith.constant 0 : i32
    return %c0_i32, %c0_i32_0, %c0_i32_1 : i32, i32, i32
  }
  func.func @transform_4(%arg0: i32) -> (i32, i32) {
    %c0_i32 = arith.constant 0 : i32
    %c0_i32_0 = arith.constant 0 : i32
    %c0_i32_1 = arith.constant 0 : i32
    return %c0_i32, %c0_i32_0 : i32, i32
  }
  func.func @transform_5(%arg0: i32) -> (i32, i32) {
    %c0_i32 = arith.constant 0 : i32
    %c0_i32_0 = arith.constant 0 : i32
    %c0_i32_1 = arith.constant 0 : i32
    return %c0_i32, %c0_i32_0 : i32, i32
  }
  func.func @transform_6(%arg0: i32) -> (i32, i32) {
    %c0_i32 = arith.constant 0 : i32
    %c0_i32_0 = arith.constant 0 : i32
    %c0_i32_1 = arith.constant 0 : i32
    return %c0_i32, %c0_i32_0 : i32, i32
  }
  func.func @transform_7(%arg0: i32) -> (i32, i32) {
    %c0_i32 = arith.constant 0 : i32
    %c0_i32_0 = arith.constant 0 : i32
    %c0_i32_1 = arith.constant 0 : i32
    return %c0_i32, %c0_i32_0 : i32, i32
  }
  func.func @transform_8(%arg0: i32) -> (i32, i32) {
    %c0_i32 = arith.constant 0 : i32
    %c0_i32_0 = arith.constant 0 : i32
    %c0_i32_1 = arith.constant 0 : i32
    return %c0_i32, %c0_i32_0 : i32, i32
  }
  func.func @transform_9(%arg0: i32) -> (i32, i32) {
    %c0_i32 = arith.constant 0 : i32
    %c0_i32_0 = arith.constant 0 : i32
    %c0_i32_1 = arith.constant 0 : i32
    return %c0_i32, %c0_i32_0 : i32, i32
  }
}

</mosaic_0001>

<bundles_post_ra>
// kernel: lenet_forward.2
= control target key start
LH: loop header
LB: loop body
LE: loop exit
PB: predicated region body
PF: predicated region fallthrough
CT: control target
= control target key end

     0   :  { %vm1015_vm0 = vcmask 1043456   ;;  %vm1016_vm1 = vcmask 1044480   ;;  %v2623_v2 = vmov 65535   ;;  %vm720_vm2 = vcmask 203776   ;;  %s3456_s1 = inlined_call_operand.vmem [shape: bf16[25,6], index: 1, kind: input, shape index: {}]   ;;  %s3457_s2 = inlined_call_operand.vmem [shape: f32[1,6], index: 2, kind: input, shape index: {}]   ;;  %s3458_s0 = inlined_call_operand.vmem [shape: bf16[1568,25], index: 0, kind: input, shape index: {}]   ;;  %s3459_s3 = inlined_call_operand.vmem [shape: bf16[392,6], index: 3, kind: output, shape index: {}]  }
   0x1   :  { %v2414_v0 = vld [vmem:[%s3456_s1 + $0x8] sm:$0xf]  ;;  %v2613_v1 = vld [vmem:[%s3456_s1 + $0x8] sm:$0x10]  ;;  %v1017_v3 = vsel %vm1015_vm0, 4294967295, %v2623_v2  ;;  %v2612_v7 = vld [vmem:[%s3456_s1] sm:$0xff] }
   0x2   :  { %v2415_v4 = vor.u32 %v2613_v1, %v2414_v0  ;;  %v1018_v5 = vsel %vm1016_vm1, %v1017_v3, 0  ;;  %v2514_v8 = vld [vmem:[%s3458_s0] sm:$0xff]  ;;  %v2539_v9 = vld [vmem:[%s3458_s0 + $0xc8] sm:$0xff]  ;;  %v2564_v10 = vld [vmem:[%s3458_s0 + $0x190] sm:$0xff]  ;;  %vm1962_vm3 = vcmask 44032  }
   0x3   :  { %v2589_v11 = vld [vmem:[%s3458_s0 + $0x258] sm:$0xff]  ;;  %v2515_v12 = vld [vmem:[%s3458_s0 + $0x8] sm:$0xff]  ;;  %v2540_v13 = vld [vmem:[%s3458_s0 + $0xd0] sm:$0xff] }
   0x4   :  { %v1020_v6 = vand.u32 %v2415_v4, %v1018_v5  ;;  %v2565_v14 = vld [vmem:[%s3458_s0 + $0x198] sm:$0xff]  ;;  %v2590_v15 = vld [vmem:[%s3458_s0 + $0x260] sm:$0xff]  ;;  %v2516_v16 = vld [vmem:[%s3458_s0 + $0x10] sm:$0xff] }
   0x5   :  { %v2541_v17 = vld [vmem:[%s3458_s0 + $0xd8] sm:$0xff]  ;;  %v2566_v18 = vld [vmem:[%s3458_s0 + $0x1a0] sm:$0xff]  ;;  %v2591_v19 = vld [vmem:[%s3458_s0 + $0x268] sm:$0xff] }
   0x6   :  { %1028 = vmatpush.bf16.msra.mxu0 %v1020_v6  ;;  %2614 = vmatpush.bf16.msra.mxu1 %v1020_v6  ;;  %v2517_v20 = vld [vmem:[%s3458_s0 + $0x18] sm:$0xff]  ;;  %v2542_v21 = vld [vmem:[%s3458_s0 + $0xe0] sm:$0xff]  ;;  %v2567_v22 = vld [vmem:[%s3458_s0 + $0x1a8] sm:$0xff] }
   0x7   :  { %2615 = vmatpush.bf16.msra.mxu2 %v1020_v6  ;;  %2616 = vmatpush.bf16.msra.mxu3 %v1020_v6  ;;  %v2592_v23 = vld [vmem:[%s3458_s0 + $0x270] sm:$0xff]  ;;  %v2518_v24 = vld [vmem:[%s3458_s0 + $0x20] sm:$0xff]  ;;  %v2543_v25 = vld [vmem:[%s3458_s0 + $0xe8] sm:$0xff] }
   0x8   :  { %v2568_v26 = vld [vmem:[%s3458_s0 + $0x1b0] sm:$0xff]  ;;  %v2593_v27 = vld [vmem:[%s3458_s0 + $0x278] sm:$0xff]  ;;  %v2519_v28 = vld [vmem:[%s3458_s0 + $0x28] sm:$0xff] }
   0x9   :  { %v2544_v29 = vld [vmem:[%s3458_s0 + $0xf0] sm:$0xff]  ;;  %v2569_v30 = vld [vmem:[%s3458_s0 + $0x1b8] sm:$0xff]  ;;  %v2594_v31 = vld [vmem:[%s3458_s0 + $0x280] sm:$0xff] }
   0xa   :  { %1029 = vmatpush.bf16.msra.mxu0 %v2612_v7  ;;  %2617 = vmatpush.bf16.msra.mxu1 %v2612_v7  ;;  %v2520_v32 = vld [vmem:[%s3458_s0 + $0x30] sm:$0xff]  ;;  %v2545_v33 = vld [vmem:[%s3458_s0 + $0xf8] sm:$0xff]  ;;  %v2570_v34 = vld [vmem:[%s3458_s0 + $0x1c0] sm:$0xff] }
   0xb   :  { %2618 = vmatpush.bf16.msra.mxu2 %v2612_v7  ;;  %2619 = vmatpush.bf16.msra.mxu3 %v2612_v7  ;;  %v2595_v35 = vld [vmem:[%s3458_s0 + $0x288] sm:$0xff]  ;;  %v2521_v36 = vld [vmem:[%s3458_s0 + $0x38] sm:$0xff]  ;;  %v2546_v37 = vld [vmem:[%s3458_s0 + $0x100] sm:$0xff] }
   0xc   :  { %v2571_v38 = vld [vmem:[%s3458_s0 + $0x1c8] sm:$0xff]  ;;  %v2596_v39 = vld [vmem:[%s3458_s0 + $0x290] sm:$0xff]  ;;  %v2522_v40 = vld [vmem:[%s3458_s0 + $0x40] sm:$0xff] }
   0xd   :  { %2416 = vmatmul.msk.bf16.vlgmr.msra.gmra.mxu0 %vm720_vm2, %v2514_v8  ;;  %2441 = vmatmul.msk.bf16.vlgmr.msra.gmra.mxu1 %vm720_vm2, %v2539_v9  ;;  %v2547_v41 = vld [vmem:[%s3458_s0 + $0x108] sm:$0xff]  ;;  %v2572_v44 = vld [vmem:[%s3458_s0 + $0x1d0] sm:$0xff]  ;;  %v2597_v45 = vld [vmem:[%s3458_s0 + $0x298] sm:$0xff] }
   0xe   :  { %2466 = vmatmul.msk.bf16.vlgmr.msra.gmra.mxu2 %vm720_vm2, %v2564_v10  ;;  %2491 = vmatmul.msk.bf16.vlgmr.msra.gmra.mxu3 %vm720_vm2, %v2589_v11  ;;  %v2802_v46 = vld [vmem:[%s3457_s2] ss:$0 sm:$0xff]  ;;  %v2523_v58 = vld [vmem:[%s3458_s0 + $0x48] sm:$0xff]  ;;  %v2548_v59 = vld [vmem:[%s3458_s0 + $0x110] sm:$0xff] }
   0xf   :  { %v2573_v63 = vld [vmem:[%s3458_s0 + $0x1d8] sm:$0xff]  ;;  %v2598_v0 = vld [vmem:[%s3458_s0 + $0x2a0] sm:$0xff] }
  0x1d   :  { %2417 = vmatmul.msk.bf16.gmra.mxu0 %vm720_vm2, %v2515_v12  ;;  %2442 = vmatmul.msk.bf16.gmra.mxu1 %vm720_vm2, %v2540_v13 }
  0x1e   :  { %2467 = vmatmul.msk.bf16.gmra.mxu2 %vm720_vm2, %v2565_v14  ;;  %2492 = vmatmul.msk.bf16.gmra.mxu3 %vm720_vm2, %v2590_v15 }
  0x2d   :  { %2418 = vmatmul.msk.bf16.gmra.mxu0 %vm720_vm2, %v2516_v16  ;;  %2443 = vmatmul.msk.bf16.gmra.mxu1 %vm720_vm2, %v2541_v17 }
  0x2e   :  { %2468 = vmatmul.msk.bf16.gmra.mxu2 %vm720_vm2, %v2566_v18  ;;  %2493 = vmatmul.msk.bf16.gmra.mxu3 %vm720_vm2, %v2591_v19 }
  0x3d   :  { %2419 = vmatmul.msk.bf16.gmra.mxu0 %vm720_vm2, %v2517_v20  ;;  %2444 = vmatmul.msk.bf16.gmra.mxu1 %vm720_vm2, %v2542_v21 }
  0x3e   :  { %2469 = vmatmul.msk.bf16.gmra.mxu2 %vm720_vm2, %v2567_v22  ;;  %2494 = vmatmul.msk.bf16.gmra.mxu3 %vm720_vm2, %v2592_v23 }
  0x4d   :  { %2420 = vmatmul.msk.bf16.gmra.mxu0 %vm720_vm2, %v2518_v24  ;;  %2445 = vmatmul.msk.bf16.gmra.mxu1 %vm720_vm2, %v2543_v25  ;;  %v2524_v24 = vld [vmem:[%s3458_s0 + $0x50] sm:$0xff]  ;;  %v2549_v25 = vld [vmem:[%s3458_s0 + $0x118] sm:$0xff] }
  0x4e   :  { %2470 = vmatmul.msk.bf16.gmra.mxu2 %vm720_vm2, %v2568_v26  ;;  %2495 = vmatmul.msk.bf16.gmra.mxu3 %vm720_vm2, %v2593_v27 }
  0x5d   :  { %2421 = vmatmul.msk.bf16.gmra.mxu0 %vm720_vm2, %v2519_v28  ;;  %2446 = vmatmul.msk.bf16.gmra.mxu1 %vm720_vm2, %v2544_v29  ;;  %v2574_v29 = vld [vmem:[%s3458_s0 + $0x1e0] sm:$0xff] }
  0x5e   :  { %2471 = vmatmul.msk.bf16.gmra.mxu2 %vm720_vm2, %v2569_v30  ;;  %2496 = vmatmul.msk.bf16.gmra.mxu3 %vm720_vm2, %v2594_v31  ;;  %v2599_v30 = vld [vmem:[%s3458_s0 + $0x2a8] sm:$0xff] }
  0x6d   :  { %2422 = vmatmul.msk.bf16.gmra.mxu0 %vm720_vm2, %v2520_v32  ;;  %2447 = vmatmul.msk.bf16.gmra.mxu1 %vm720_vm2, %v2545_v33 }
  0x6e   :  { %2472 = vmatmul.msk.bf16.gmra.mxu2 %vm720_vm2, %v2570_v34  ;;  %2497 = vmatmul.msk.bf16.gmra.mxu3 %vm720_vm2, %v2595_v35 }
  0x7d   :  { %2423 = vmatmul.msk.bf16.gmra.mxu0 %vm720_vm2, %v2521_v36  ;;  %2448 = vmatmul.msk.bf16.gmra.mxu1 %vm720_vm2, %v2546_v37 }
  0x7e   :  { %2473 = vmatmul.msk.bf16.gmra.mxu2 %vm720_vm2, %v2571_v38  ;;  %2498 = vmatmul.msk.bf16.gmra.mxu3 %vm720_vm2, %v2596_v39 }
  0x8a   :  { %v2787_v42 = vpop.f32.mrf.mxu0  ;;  %v1156_v43 = vpop.f32.mrf.mxu1 }
  0x8b   :  { %v1157_v47 = vadd.f32 %v2802_v46, %v1156_v43 }
  0x8d   :  { %2424 = vmatmul.msk.bf16.gmra.mxu0 %vm720_vm2, %v2522_v40  ;;  %2449 = vmatmul.msk.bf16.gmra.mxu1 %vm720_vm2, %v2547_v41  ;;  %v1571_v53 = vmax.f32 %v1157_v47, 0.0 }
  0x8e   :  { %2474 = vmatmul.msk.bf16.gmra.mxu2 %vm720_vm2, %v2572_v44  ;;  %2499 = vmatmul.msk.bf16.gmra.mxu3 %vm720_vm2, %v2597_v45 }
  0x91   :  { %v1281_v48 = vpop.f32.mrf.mxu2  ;;  %v1406_v49 = vpop.f32.mrf.mxu3 }
  0x92   :  { %v1033_v50 = vpop.f32.mrf.mxu0  ;;  %v1158_v51 = vpop.f32.mrf.mxu1  ;;  %v1282_v1 = vadd.f32 %v2802_v46, %v1281_v48  ;;  %v1407_v15 = vadd.f32 %v2802_v46, %v1406_v49 }
  0x93   :  { %v1034_v52 = vadd.f32 %v2802_v46, %v1033_v50  ;;  %v1159_v56 = vadd.f32 %v2802_v46, %v1158_v51 }
  0x94   :  { %v1621_v5 = vmax.f32 %v1282_v1, 0.0  ;;  %v1671_v20 = vmax.f32 %v1407_v15, 0.0  ;;  %v2525_v1 = vld [vmem:[%s3458_s0 + $0x58] sm:$0xff] }
  0x95   :  { %v1522_v54 = vmax.f32 %v1034_v52, 0.0  ;;  %v1572_v3 = vmax.f32 %v1159_v56, 0.0 }
  0x97   :  { %v2806_v55 = vadd.f32 %v1571_v53, %v1522_v54 }
  0x99   :  { %v1283_v57 = vpop.f32.mrf.mxu2  ;;  %v1408_v60 = vpop.f32.mrf.mxu3 }
  0x9a   :  { %v1036_v61 = vpop.f32.mrf.mxu0  ;;  %v1161_v62 = vpop.f32.mrf.mxu1  ;;  %v1284_v13 = vadd.f32 %v2802_v46, %v1283_v57  ;;  %v1409_v34 = vadd.f32 %v2802_v46, %v1408_v60 }
  0x9b   :  { %v1037_v2 = vadd.f32 %v2802_v46, %v1036_v61  ;;  %v1162_v7 = vadd.f32 %v2802_v46, %v1161_v62 }
  0x9c   :  { %v1622_v18 = vmax.f32 %v1284_v13, 0.0  ;;  %v1672_v41 = vmax.f32 %v1409_v34, 0.0 }
  0x9d   :  { %v1523_v4 = vmax.f32 %v1037_v2, 0.0  ;;  %2425 = vmatmul.msk.bf16.gmra.mxu0 %vm720_vm2, %v2523_v58  ;;  %2450 = vmatmul.msk.bf16.gmra.mxu1 %vm720_vm2, %v2548_v59  ;;  %v1573_v16 = vmax.f32 %v1162_v7, 0.0  ;;  %v2550_v2 = vld [vmem:[%s3458_s0 + $0x120] sm:$0xff]  ;;  %v2600_v7 = vld [vmem:[%s3458_s0 + $0x2b0] sm:$0xff] }
  0x9e   :  { %2475 = vmatmul.msk.bf16.gmra.mxu2 %vm720_vm2, %v2573_v63  ;;  %2500 = vmatmul.msk.bf16.gmra.mxu3 %vm720_vm2, %v2598_v0 }
  0x9f   :  { %v1719_v6 = vadd.f32 %v1572_v3, %v1523_v4 }
  0xa1   :  { %v1286_v8 = vpop.f32.mrf.mxu2  ;;  %v1411_v9 = vpop.f32.mrf.mxu3  ;;  %v2828_v10 = vadd.f32 %v1719_v6, %v1621_v5  ;;  %v2575_v6 = vld [vmem:[%s3458_s0 + $0x1e8] sm:$0xff] }
  0xa2   :  { %v1038_v11 = vpop.f32.mrf.mxu0  ;;  %v1163_v12 = vpop.f32.mrf.mxu1  ;;  %v1287_v31 = vadd.f32 %v2802_v46, %v1286_v8  ;;  %v1412_v53 = vadd.f32 %v2802_v46, %v1411_v9 }
  0xa3   :  { %v1039_v14 = vadd.f32 %v2802_v46, %v1038_v11  ;;  %v1164_v21 = vadd.f32 %v2802_v46, %v1163_v12 }
  0xa4   :  { %v1623_v38 = vmax.f32 %v1287_v31, 0.0  ;;  %v1673_v61 = vmax.f32 %v1412_v53, 0.0 }
  0xa5   :  { %v1524_v17 = vmax.f32 %v1039_v14, 0.0  ;;  %v1574_v35 = vmax.f32 %v1164_v21, 0.0 }
  0xa7   :  { %v1720_v19 = vadd.f32 %v1573_v16, %v1524_v17 }
  0xa9   :  { %v1769_v22 = vadd.f32 %v1720_v19, %v1622_v18  ;;  %v1288_v23 = vpop.f32.mrf.mxu2  ;;  %v1413_v26 = vpop.f32.mrf.mxu3 }
  0xaa   :  { %v1041_v27 = vpop.f32.mrf.mxu0  ;;  %v1166_v28 = vpop.f32.mrf.mxu1  ;;  %v1289_v50 = vadd.f32 %v2802_v46, %v1288_v23  ;;  %v1414_v12 = vadd.f32 %v2802_v46, %v1413_v26 }
  0xab   :  { %v1818_v32 = vadd.f32 %v1769_v22, %v1671_v20  ;;  %v1042_v33 = vadd.f32 %v2802_v46, %v1041_v27  ;;  %v1167_v44 = vadd.f32 %v2802_v46, %v1166_v28 }
  0xac   :  { %v1624_v58 = vmax.f32 %v1289_v50, 0.0  ;;  %v1674_v19 = vmax.f32 %v1414_v12, 0.0 }
  0xad   :  { %v1867_v36 = vmul.f32 0.25, %v1818_v32  ;;  %v1525_v37 = vmax.f32 %v1042_v33, 0.0  ;;  %2426 = vmatmul.msk.bf16.gmra.mxu0 %vm720_vm2, %v2524_v24  ;;  %2451 = vmatmul.msk.bf16.gmra.mxu1 %vm720_vm2, %v2549_v25  ;;  %v1575_v54 = vmax.f32 %v1167_v44, 0.0 }
  0xae   :  { %2476 = vmatmul.msk.bf16.gmra.mxu2 %vm720_vm2, %v2574_v29  ;;  %2501 = vmatmul.msk.bf16.gmra.mxu3 %vm720_vm2, %v2599_v30 }
  0xaf   :  { %v1916_v39 = vpack.c.bf16 %v1867_v36, %v1867_v36  ;;  %v1721_v40 = vadd.f32 %v1574_v35, %v1525_v37 }
  0xb1   :  { %1966 = vst.msk [vmem:[%s3459_s3 + $0xc] sm:$0xf] %vm1962_vm3, %v1916_v39  ;;  %v1770_v43 = vadd.f32 %v1721_v40, %v1623_v38  ;;  %v1291_v45 = vpop.f32.mrf.mxu2  ;;  %v1416_v47 = vpop.f32.mrf.mxu3  ;;  %v2526_v40 = vld [vmem:[%s3458_s0 + $0x60] sm:$0xff] }
  0xb2   :  { %v1043_v48 = vpop.f32.mrf.mxu0  ;;  %v1168_v49 = vpop.f32.mrf.mxu1  ;;  %v1292_v8 = vadd.f32 %v2802_v46, %v1291_v45  ;;  %v1417_v29 = vadd.f32 %v2802_v46, %v1416_v47  ;;  %v2576_v47 = vld [vmem:[%s3458_s0 + $0x1f0] sm:$0xff] }
  0xb3   :  { %v1819_v51 = vadd.f32 %v1770_v43, %v1672_v41  ;;  %v1044_v52 = vadd.f32 %v2802_v46, %v1043_v48  ;;  %v1169_v62 = vadd.f32 %v2802_v46, %v1168_v49  ;;  %v2551_v41 = vld [vmem:[%s3458_s0 + $0x128] sm:$0xff]  ;;  %v2601_v48 = vld [vmem:[%s3458_s0 + $0x2b8] sm:$0xff] }
  0xb4   :  { %v1625_v16 = vmax.f32 %v1292_v8, 0.0  ;;  %v1675_v36 = vmax.f32 %v1417_v29, 0.0 }
  0xb5   :  { %v1868_v56 = vmul.f32 0.25, %v1819_v51  ;;  %v1526_v57 = vmax.f32 %v1044_v52, 0.0  ;;  %v1576_v13 = vmax.f32 %v1169_v62, 0.0 }
  0xb7   :  { %v1917_v59 = vpack.c.bf16 %v1868_v56, %v1868_v56  ;;  %v1722_v60 = vadd.f32 %v1575_v54, %v1526_v57 }
  0xb9   :  { %1967 = vst.msk [vmem:[%s3459_s3 + $0x10] sm:$0xf] %vm1962_vm3, %v1917_v59  ;;  %v1771_v63 = vadd.f32 %v1722_v60, %v1624_v58  ;;  %v1293_v0 = vpop.f32.mrf.mxu2  ;;  %v1418_v3 = vpop.f32.mrf.mxu3 }
  0xba   :  { %v1046_v4 = vpop.f32.mrf.mxu0  ;;  %v1171_v5 = vpop.f32.mrf.mxu1  ;;  %v1294_v26 = vadd.f32 %v2802_v46, %v1293_v0  ;;  %v1419_v52 = vadd.f32 %v2802_v46, %v1418_v3 }
  0xbb   :  { %v1820_v9 = vadd.f32 %v1771_v63, %v1673_v61  ;;  %v1047_v11 = vadd.f32 %v2802_v46, %v1046_v4  ;;  %v1172_v21 = vadd.f32 %v2802_v46, %v1171_v5 }
  0xbc   :  { %v1626_v33 = vmax.f32 %v1294_v26, 0.0  ;;  %v1676_v60 = vmax.f32 %v1419_v52, 0.0 }
  0xbd   :  { %v1869_v14 = vmul.f32 0.25, %v1820_v9  ;;  %v1527_v15 = vmax.f32 %v1047_v11, 0.0  ;;  %2427 = vmatmul.msk.bf16.gmra.mxu0 %vm720_vm2, %v2525_v1  ;;  %2452 = vmatmul.msk.bf16.gmra.mxu1 %vm720_vm2, %v2550_v2  ;;  %v1577_v30 = vmax.f32 %v1172_v21, 0.0 }
  0xbe   :  { %2477 = vmatmul.msk.bf16.gmra.mxu2 %vm720_vm2, %v2575_v6  ;;  %2502 = vmatmul.msk.bf16.gmra.mxu3 %vm720_vm2, %v2600_v7 }
  0xbf   :  { %v1918_v17 = vpack.c.bf16 %v1869_v14, %v1869_v14  ;;  %v1723_v18 = vadd.f32 %v1576_v13, %v1527_v15 }
  0xc1   :  { %1968 = vst.msk [vmem:[%s3459_s3 + $0x14] sm:$0xf] %vm1962_vm3, %v1918_v17  ;;  %v1772_v20 = vadd.f32 %v1723_v18, %v1625_v16  ;;  %v1296_v22 = vpop.f32.mrf.mxu2  ;;  %v1421_v23 = vpop.f32.mrf.mxu3  ;;  %v2527_v18 = vld [vmem:[%s3458_s0 + $0x68] sm:$0xff] }
  0xc2   :  { %v1048_v24 = vpop.f32.mrf.mxu0  ;;  %v1173_v25 = vpop.f32.mrf.mxu1  ;;  %v1297_v49 = vadd.f32 %v2802_v46, %v1296_v22  ;;  %v1422_v6 = vadd.f32 %v2802_v46, %v1421_v23  ;;  %v2577_v23 = vld [vmem:[%s3458_s0 + $0x1f8] sm:$0xff] }
  0xc3   :  { %v1821_v27 = vadd.f32 %v1772_v20, %v1674_v19  ;;  %v1049_v28 = vadd.f32 %v2802_v46, %v1048_v24  ;;  %v1174_v37 = vadd.f32 %v2802_v46, %v1173_v25  ;;  %v2552_v19 = vld [vmem:[%s3458_s0 + $0x130] sm:$0xff]  ;;  %v2602_v24 = vld [vmem:[%s3458_s0 + $0x2c0] sm:$0xff] }
  0xc4   :  { %v1627_v57 = vmax.f32 %v1297_v49, 0.0  ;;  %v1677_v14 = vmax.f32 %v1422_v6, 0.0 }
  0xc5   :  { %v1870_v31 = vmul.f32 0.25, %v1821_v27  ;;  %v1528_v32 = vmax.f32 %v1049_v28, 0.0  ;;  %v1578_v53 = vmax.f32 %v1174_v37, 0.0 }
  0xc7   :  { %v1919_v34 = vpack.c.bf16 %v1870_v31, %v1870_v31  ;;  %v1724_v35 = vadd.f32 %v1577_v30, %v1528_v32 }
  0xc9   :  { %1969 = vst.msk [vmem:[%s3459_s3 + $0x18] sm:$0xf] %vm1962_vm3, %v1919_v34  ;;  %v1773_v38 = vadd.f32 %v1724_v35, %v1626_v33  ;;  %v1298_v39 = vpop.f32.mrf.mxu2  ;;  %v1423_v43 = vpop.f32.mrf.mxu3 }
  0xca   :  { %v1051_v44 = vpop.f32.mrf.mxu0  ;;  %v1176_v45 = vpop.f32.mrf.mxu1  ;;  %v1299_v3 = vadd.f32 %v2802_v46, %v1298_v39  ;;  %v1424_v28 = vadd.f32 %v2802_v46, %v1423_v43 }
  0xcb   :  { %v1822_v50 = vadd.f32 %v1773_v38, %v1675_v36  ;;  %v1052_v51 = vadd.f32 %v2802_v46, %v1051_v44  ;;  %v1177_v62 = vadd.f32 %v2802_v46, %v1176_v45 }
  0xcc   :  { %v1628_v11 = vmax.f32 %v1299_v3, 0.0  ;;  %v1678_v35 = vmax.f32 %v1424_v28, 0.0 }
  0xcd   :  { %v1871_v54 = vmul.f32 0.25, %v1822_v50  ;;  %v1529_v56 = vmax.f32 %v1052_v51, 0.0  ;;  %2428 = vmatmul.msk.bf16.gmra.mxu0 %vm720_vm2, %v2526_v40  ;;  %2453 = vmatmul.msk.bf16.gmra.mxu1 %vm720_vm2, %v2551_v41  ;;  %v1579_v7 = vmax.f32 %v1177_v62, 0.0 }
  0xce   :  { %2478 = vmatmul.msk.bf16.gmra.mxu2 %vm720_vm2, %v2576_v47  ;;  %2503 = vmatmul.msk.bf16.gmra.mxu3 %vm720_vm2, %v2601_v48 }
  0xcf   :  { %v1920_v58 = vpack.c.bf16 %v1871_v54, %v1871_v54  ;;  %v1725_v59 = vadd.f32 %v1578_v53, %v1529_v56 }
  0xd1   :  { %1970 = vst.msk [vmem:[%s3459_s3 + $0x1c] sm:$0xf] %vm1962_vm3, %v1920_v58  ;;  %v1774_v61 = vadd.f32 %v1725_v59, %v1627_v57  ;;  %v1301_v63 = vpop.f32.mrf.mxu2  ;;  %v1426_v0 = vpop.f32.mrf.mxu3  ;;  %v2528_v59 = vld [vmem:[%s3458_s0 + $0x70] sm:$0xff] }
  0xd2   :  { %v1053_v1 = vpop.f32.mrf.mxu0  ;;  %v1178_v2 = vpop.f32.mrf.mxu1  ;;  %v1302_v25 = vadd.f32 %v2802_v46, %v1301_v63  ;;  %v1427_v47 = vadd.f32 %v2802_v46, %v1426_v0  ;;  %v2578_v0 = vld [vmem:[%s3458_s0 + $0x200] sm:$0xff] }
  0xd3   :  { %v1823_v4 = vadd.f32 %v1774_v61, %v1676_v60  ;;  %v1054_v5 = vadd.f32 %v2802_v46, %v1053_v1  ;;  %v1179_v15 = vadd.f32 %v2802_v46, %v1178_v2  ;;  %v2553_v60 = vld [vmem:[%s3458_s0 + $0x138] sm:$0xff]  ;;  %v2603_v1 = vld [vmem:[%s3458_s0 + $0x2c8] sm:$0xff] }
  0xd4   :  { %v1629_v32 = vmax.f32 %v1302_v25, 0.0  ;;  %v1679_v54 = vmax.f32 %v1427_v47, 0.0 }
  0xd5   :  { %v1872_v8 = vmul.f32 0.25, %v1823_v4  ;;  %v1530_v9 = vmax.f32 %v1054_v5, 0.0  ;;  %v1580_v29 = vmax.f32 %v1179_v15, 0.0 }
  0xd7   :  { %v1921_v12 = vpack.c.bf16 %v1872_v8, %v1872_v8  ;;  %v1726_v13 = vadd.f32 %v1579_v7, %v1530_v9 }
  0xd9   :  { %1971 = vst.msk [vmem:[%s3459_s3 + $0x20] sm:$0xf] %vm1962_vm3, %v1921_v12  ;;  %v1775_v16 = vadd.f32 %v1726_v13, %v1628_v11  ;;  %v1303_v17 = vpop.f32.mrf.mxu2  ;;  %v1428_v20 = vpop.f32.mrf.mxu3 }
  0xda   :  { %v1056_v21 = vpop.f32.mrf.mxu0  ;;  %v1181_v22 = vpop.f32.mrf.mxu1  ;;  %v1304_v43 = vadd.f32 %v2802_v46, %v1303_v17  ;;  %v1429_v5 = vadd.f32 %v2802_v46, %v1428_v20 }
  0xdb   :  { %v1824_v26 = vadd.f32 %v1775_v16, %v1677_v14  ;;  %v1057_v27 = vadd.f32 %v2802_v46, %v1056_v21  ;;  %v1182_v37 = vadd.f32 %v2802_v46, %v1181_v22 }
  0xdc   :  { %v1630_v51 = vmax.f32 %v1304_v43, 0.0  ;;  %v1680_v13 = vmax.f32 %v1429_v5, 0.0 }
  0xdd   :  { %v1873_v30 = vmul.f32 0.25, %v1824_v26  ;;  %v1531_v31 = vmax.f32 %v1057_v27, 0.0  ;;  %2429 = vmatmul.msk.bf16.gmra.mxu0 %vm720_vm2, %v2527_v18  ;;  %2454 = vmatmul.msk.bf16.gmra.mxu1 %vm720_vm2, %v2552_v19  ;;  %v1581_v48 = vmax.f32 %v1182_v37, 0.0 }
  0xde   :  { %2479 = vmatmul.msk.bf16.gmra.mxu2 %vm720_vm2, %v2577_v23  ;;  %2504 = vmatmul.msk.bf16.gmra.mxu3 %vm720_vm2, %v2602_v24 }
  0xdf   :  { %v1922_v33 = vpack.c.bf16 %v1873_v30, %v1873_v30  ;;  %v1727_v34 = vadd.f32 %v1580_v29, %v1531_v31 }
  0xe1   :  { %1972 = vst.msk [vmem:[%s3459_s3 + $0x24] sm:$0xf] %vm1962_vm3, %v1922_v33  ;;  %v1776_v36 = vadd.f32 %v1727_v34, %v1629_v32  ;;  %v1306_v38 = vpop.f32.mrf.mxu2  ;;  %v1431_v39 = vpop.f32.mrf.mxu3  ;;  %v2529_v34 = vld [vmem:[%s3458_s0 + $0x78] sm:$0xff] }
  0xe2   :  { %v1058_v40 = vpop.f32.mrf.mxu0  ;;  %v1183_v41 = vpop.f32.mrf.mxu1  ;;  %v1307_v2 = vadd.f32 %v2802_v46, %v1306_v38  ;;  %v1432_v23 = vadd.f32 %v2802_v46, %v1431_v39  ;;  %v2579_v39 = vld [vmem:[%s3458_s0 + $0x208] sm:$0xff] }
  0xe3   :  { %v1825_v44 = vadd.f32 %v1776_v36, %v1678_v35  ;;  %v1059_v45 = vadd.f32 %v2802_v46, %v1058_v40  ;;  %v1184_v56 = vadd.f32 %v2802_v46, %v1183_v41  ;;  %v2554_v35 = vld [vmem:[%s3458_s0 + $0x140] sm:$0xff]  ;;  %v2604_v40 = vld [vmem:[%s3458_s0 + $0x2d0] sm:$0xff] }
  0xe4   :  { %v1631_v9 = vmax.f32 %v1307_v2, 0.0  ;;  %v1681_v30 = vmax.f32 %v1432_v23, 0.0 }
  0xe5   :  { %v1874_v49 = vmul.f32 0.25, %v1825_v44  ;;  %v1532_v50 = vmax.f32 %v1059_v45, 0.0  ;;  %v1582_v6 = vmax.f32 %v1184_v56, 0.0 }
  0xe7   :  { %v1923_v52 = vpack.c.bf16 %v1874_v49, %v1874_v49  ;;  %v1728_v53 = vadd.f32 %v1581_v48, %v1532_v50 }
  0xe9   :  { %1973 = vst.msk [vmem:[%s3459_s3 + $0x28] sm:$0xf] %vm1962_vm3, %v1923_v52  ;;  %v1777_v57 = vadd.f32 %v1728_v53, %v1630_v51  ;;  %v1308_v58 = vpop.f32.mrf.mxu2  ;;  %v1433_v61 = vpop.f32.mrf.mxu3 }
  0xea   :  { %v1061_v62 = vpop.f32.mrf.mxu0  ;;  %v1186_v63 = vpop.f32.mrf.mxu1  ;;  %v1309_v20 = vadd.f32 %v2802_v46, %v1308_v58  ;;  %v1434_v45 = vadd.f32 %v2802_v46, %v1433_v61 }
  0xeb   :  { %v1826_v3 = vadd.f32 %v1777_v57, %v1679_v54  ;;  %v1062_v4 = vadd.f32 %v2802_v46, %v1061_v62  ;;  %v1187_v15 = vadd.f32 %v2802_v46, %v1186_v63 }
  0xec   :  { %v1632_v27 = vmax.f32 %v1309_v20, 0.0  ;;  %v1682_v53 = vmax.f32 %v1434_v45, 0.0 }
  0xed   :  { %v1875_v7 = vmul.f32 0.25, %v1826_v3  ;;  %v1533_v8 = vmax.f32 %v1062_v4, 0.0  ;;  %2430 = vmatmul.msk.bf16.gmra.mxu0 %vm720_vm2, %v2528_v59  ;;  %2455 = vmatmul.msk.bf16.gmra.mxu1 %vm720_vm2, %v2553_v60  ;;  %v1583_v24 = vmax.f32 %v1187_v15, 0.0 }
  0xee   :  { %2480 = vmatmul.msk.bf16.gmra.mxu2 %vm720_vm2, %v2578_v0  ;;  %2505 = vmatmul.msk.bf16.gmra.mxu3 %vm720_vm2, %v2603_v1 }
  0xef   :  { %v1924_v11 = vpack.c.bf16 %v1875_v7, %v1875_v7  ;;  %v1729_v12 = vadd.f32 %v1582_v6, %v1533_v8 }
  0xf1   :  { %1974 = vst.msk [vmem:[%s3459_s3 + $0x2c] sm:$0xf] %vm1962_vm3, %v1924_v11  ;;  %v1778_v14 = vadd.f32 %v1729_v12, %v1631_v9  ;;  %v1311_v16 = vpop.f32.mrf.mxu2  ;;  %v1436_v17 = vpop.f32.mrf.mxu3  ;;  %v2530_v12 = vld [vmem:[%s3458_s0 + $0x80] sm:$0xff] }
  0xf2   :  { %v1063_v18 = vpop.f32.mrf.mxu0  ;;  %v1188_v19 = vpop.f32.mrf.mxu1  ;;  %v1312_v41 = vadd.f32 %v2802_v46, %v1311_v16  ;;  %v1437_v0 = vadd.f32 %v2802_v46, %v1436_v17  ;;  %v2580_v17 = vld [vmem:[%s3458_s0 + $0x210] sm:$0xff] }
  0xf3   :  { %v1827_v21 = vadd.f32 %v1778_v14, %v1680_v13  ;;  %v1064_v22 = vadd.f32 %v2802_v46, %v1063_v18  ;;  %v1189_v31 = vadd.f32 %v2802_v46, %v1188_v19  ;;  %v2555_v13 = vld [vmem:[%s3458_s0 + $0x148] sm:$0xff]  ;;  %v2605_v18 = vld [vmem:[%s3458_s0 + $0x2d8] sm:$0xff] }
  0xf4   :  { %v1633_v50 = vmax.f32 %v1312_v41, 0.0  ;;  %v1683_v7 = vmax.f32 %v1437_v0, 0.0 }
  0xf5   :  { %v1876_v25 = vmul.f32 0.25, %v1827_v21  ;;  %v1534_v26 = vmax.f32 %v1064_v22, 0.0  ;;  %v1584_v47 = vmax.f32 %v1189_v31, 0.0 }
  0xf7   :  { %v1925_v28 = vpack.c.bf16 %v1876_v25, %v1876_v25  ;;  %v1730_v29 = vadd.f32 %v1583_v24, %v1534_v26 }
  0xf9   :  { %1975 = vst.msk [vmem:[%s3459_s3 + $0x30] sm:$0xf] %vm1962_vm3, %v1925_v28  ;;  %v1779_v32 = vadd.f32 %v1730_v29, %v1632_v27  ;;  %v1313_v33 = vpop.f32.mrf.mxu2  ;;  %v1438_v36 = vpop.f32.mrf.mxu3 }
  0xfa   :  { %v1066_v37 = vpop.f32.mrf.mxu0  ;;  %v1191_v38 = vpop.f32.mrf.mxu1  ;;  %v1314_v61 = vadd.f32 %v2802_v46, %v1313_v33  ;;  %v1439_v22 = vadd.f32 %v2802_v46, %v1438_v36 }
  0xfb   :  { %v1828_v43 = vadd.f32 %v1779_v32, %v1681_v30  ;;  %v1067_v44 = vadd.f32 %v2802_v46, %v1066_v37  ;;  %v1192_v56 = vadd.f32 %v2802_v46, %v1191_v38 }
  0xfc   :  { %v1634_v4 = vmax.f32 %v1314_v61, 0.0  ;;  %v1684_v29 = vmax.f32 %v1439_v22, 0.0 }
  0xfd   :  { %v1877_v48 = vmul.f32 0.25, %v1828_v43  ;;  %v1535_v49 = vmax.f32 %v1067_v44, 0.0  ;;  %2431 = vmatmul.msk.bf16.gmra.mxu0 %vm720_vm2, %v2529_v34  ;;  %2456 = vmatmul.msk.bf16.gmra.mxu1 %vm720_vm2, %v2554_v35  ;;  %v1585_v1 = vmax.f32 %v1192_v56, 0.0 }
  0xfe   :  { %2481 = vmatmul.msk.bf16.gmra.mxu2 %vm720_vm2, %v2579_v39  ;;  %2506 = vmatmul.msk.bf16.gmra.mxu3 %vm720_vm2, %v2604_v40 }
  0xff   :  { %v1926_v51 = vpack.c.bf16 %v1877_v48, %v1877_v48  ;;  %v1731_v52 = vadd.f32 %v1584_v47, %v1535_v49 }
 0x101   :  { %1976 = vst.msk [vmem:[%s3459_s3 + $0x34] sm:$0xf] %vm1962_vm3, %v1926_v51  ;;  %v1780_v54 = vadd.f32 %v1731_v52, %v1633_v50  ;;  %v1316_v57 = vpop.f32.mrf.mxu2  ;;  %v1441_v58 = vpop.f32.mrf.mxu3  ;;  %v2531_v52 = vld [vmem:[%s3458_s0 + $0x88] sm:$0xff] }
 0x102   :  { %v1068_v59 = vpop.f32.mrf.mxu0  ;;  %v1193_v60 = vpop.f32.mrf.mxu1  ;;  %v1317_v19 = vadd.f32 %v2802_v46, %v1316_v57  ;;  %v1442_v39 = vadd.f32 %v2802_v46, %v1441_v58  ;;  %v2581_v58 = vld [vmem:[%s3458_s0 + $0x218] sm:$0xff] }
 0x103   :  { %v1829_v62 = vadd.f32 %v1780_v54, %v1682_v53  ;;  %v1069_v63 = vadd.f32 %v2802_v46, %v1068_v59  ;;  %v1194_v8 = vadd.f32 %v2802_v46, %v1193_v60  ;;  %v2556_v53 = vld [vmem:[%s3458_s0 + $0x150] sm:$0xff]  ;;  %v2606_v59 = vld [vmem:[%s3458_s0 + $0x2e0] sm:$0xff] }
 0x104   :  { %v1635_v26 = vmax.f32 %v1317_v19, 0.0  ;;  %v1685_v48 = vmax.f32 %v1442_v39, 0.0 }
 0x105   :  { %v1878_v2 = vmul.f32 0.25, %v1829_v62  ;;  %v1536_v3 = vmax.f32 %v1069_v63, 0.0  ;;  %v1586_v23 = vmax.f32 %v1194_v8, 0.0 }
 0x107   :  { %v1927_v5 = vpack.c.bf16 %v1878_v2, %v1878_v2  ;;  %v1732_v6 = vadd.f32 %v1585_v1, %v1536_v3 }
 0x109   :  { %1977 = vst.msk [vmem:[%s3459_s3 + $0x38] sm:$0xf] %vm1962_vm3, %v1927_v5  ;;  %v1781_v9 = vadd.f32 %v1732_v6, %v1634_v4  ;;  %v1318_v11 = vpop.f32.mrf.mxu2  ;;  %v1443_v14 = vpop.f32.mrf.mxu3 }
 0x10a   :  { %v1071_v15 = vpop.f32.mrf.mxu0  ;;  %v1196_v16 = vpop.f32.mrf.mxu1  ;;  %v1319_v36 = vadd.f32 %v2802_v46, %v1318_v11  ;;  %v1444_v63 = vadd.f32 %v2802_v46, %v1443_v14 }
 0x10b   :  { %v1830_v20 = vadd.f32 %v1781_v9, %v1683_v7  ;;  %v1072_v21 = vadd.f32 %v2802_v46, %v1071_v15  ;;  %v1197_v31 = vadd.f32 %v2802_v46, %v1196_v16 }
 0x10c   :  { %v1636_v44 = vmax.f32 %v1319_v36, 0.0  ;;  %v1686_v6 = vmax.f32 %v1444_v63, 0.0 }
 0x10d   :  { %v1879_v24 = vmul.f32 0.25, %v1830_v20  ;;  %v1537_v25 = vmax.f32 %v1072_v21, 0.0  ;;  %2432 = vmatmul.msk.bf16.gmra.mxu0 %vm720_vm2, %v2530_v12  ;;  %2457 = vmatmul.msk.bf16.gmra.mxu1 %vm720_vm2, %v2555_v13  ;;  %v1587_v40 = vmax.f32 %v1197_v31, 0.0 }
 0x10e   :  { %2482 = vmatmul.msk.bf16.gmra.mxu2 %vm720_vm2, %v2580_v17  ;;  %2507 = vmatmul.msk.bf16.gmra.mxu3 %vm720_vm2, %v2605_v18 }
 0x10f   :  { %v1928_v27 = vpack.c.bf16 %v1879_v24, %v1879_v24  ;;  %v1733_v28 = vadd.f32 %v1586_v23, %v1537_v25 }
 0x111   :  { %1978 = vst.msk [vmem:[%s3459_s3 + $0x3c] sm:$0xf] %vm1962_vm3, %v1928_v27  ;;  %v1782_v30 = vadd.f32 %v1733_v28, %v1635_v26  ;;  %v1321_v32 = vpop.f32.mrf.mxu2  ;;  %v1446_v33 = vpop.f32.mrf.mxu3  ;;  %v2532_v28 = vld [vmem:[%s3458_s0 + $0x90] sm:$0xff] }
 0x112   :  { %v1073_v34 = vpop.f32.mrf.mxu0  ;;  %v1198_v35 = vpop.f32.mrf.mxu1  ;;  %v1322_v60 = vadd.f32 %v2802_v46, %v1321_v32  ;;  %v1447_v17 = vadd.f32 %v2802_v46, %v1446_v33  ;;  %v2582_v33 = vld [vmem:[%s3458_s0 + $0x220] sm:$0xff] }
 0x113   :  { %v1831_v37 = vadd.f32 %v1782_v30, %v1684_v29  ;;  %v1074_v38 = vadd.f32 %v2802_v46, %v1073_v34  ;;  %v1199_v49 = vadd.f32 %v2802_v46, %v1198_v35  ;;  %v2557_v29 = vld [vmem:[%s3458_s0 + $0x158] sm:$0xff]  ;;  %v2607_v34 = vld [vmem:[%s3458_s0 + $0x2e8] sm:$0xff] }
 0x114   :  { %v1637_v3 = vmax.f32 %v1322_v60, 0.0  ;;  %v1687_v24 = vmax.f32 %v1447_v17, 0.0 }
 0x115   :  { %v1880_v41 = vmul.f32 0.25, %v1831_v37  ;;  %v1538_v43 = vmax.f32 %v1074_v38, 0.0  ;;  %v1588_v0 = vmax.f32 %v1199_v49, 0.0 }
 0x117   :  { %v1929_v45 = vpack.c.bf16 %v1880_v41, %v1880_v41  ;;  %v1734_v47 = vadd.f32 %v1587_v40, %v1538_v43 }
 0x119   :  { %1979 = vst.msk [vmem:[%s3459_s3 + $0x40] sm:$0xf] %vm1962_vm3, %v1929_v45  ;;  %v1783_v50 = vadd.f32 %v1734_v47, %v1636_v44  ;;  %v1323_v51 = vpop.f32.mrf.mxu2  ;;  %v1448_v54 = vpop.f32.mrf.mxu3 }
 0x11a   :  { %v1076_v56 = vpop.f32.mrf.mxu0  ;;  %v1201_v57 = vpop.f32.mrf.mxu1  ;;  %v1324_v14 = vadd.f32 %v2802_v46, %v1323_v51  ;;  %v1449_v38 = vadd.f32 %v2802_v46, %v1448_v54 }
 0x11b   :  { %v1832_v61 = vadd.f32 %v1783_v50, %v1685_v48  ;;  %v1077_v62 = vadd.f32 %v2802_v46, %v1076_v56  ;;  %v1202_v8 = vadd.f32 %v2802_v46, %v1201_v57 }
 0x11c   :  { %v1638_v21 = vmax.f32 %v1324_v14, 0.0  ;;  %v1688_v47 = vmax.f32 %v1449_v38, 0.0 }
 0x11d   :  { %v1881_v1 = vmul.f32 0.25, %v1832_v61  ;;  %v1539_v2 = vmax.f32 %v1077_v62, 0.0  ;;  %2433 = vmatmul.msk.bf16.gmra.mxu0 %vm720_vm2, %v2531_v52  ;;  %2458 = vmatmul.msk.bf16.gmra.mxu1 %vm720_vm2, %v2556_v53  ;;  %v1589_v18 = vmax.f32 %v1202_v8, 0.0 }
 0x11e   :  { %2483 = vmatmul.msk.bf16.gmra.mxu2 %vm720_vm2, %v2581_v58  ;;  %2508 = vmatmul.msk.bf16.gmra.mxu3 %vm720_vm2, %v2606_v59 }
 0x11f   :  { %v1930_v4 = vpack.c.bf16 %v1881_v1, %v1881_v1  ;;  %v1735_v5 = vadd.f32 %v1588_v0, %v1539_v2 }
 0x121   :  { %1980 = vst.msk [vmem:[%s3459_s3 + $0x44] sm:$0xf] %vm1962_vm3, %v1930_v4  ;;  %v1784_v7 = vadd.f32 %v1735_v5, %v1637_v3  ;;  %v1326_v9 = vpop.f32.mrf.mxu2  ;;  %v1451_v11 = vpop.f32.mrf.mxu3  ;;  %v2533_v5 = vld [vmem:[%s3458_s0 + $0x98] sm:$0xff] }
 0x122   :  { %v1078_v12 = vpop.f32.mrf.mxu0  ;;  %v1203_v13 = vpop.f32.mrf.mxu1  ;;  %v1327_v35 = vadd.f32 %v2802_v46, %v1326_v9  ;;  %v1452_v58 = vadd.f32 %v2802_v46, %v1451_v11  ;;  %v2583_v11 = vld [vmem:[%s3458_s0 + $0x228] sm:$0xff] }
 0x123   :  { %v1833_v15 = vadd.f32 %v1784_v7, %v1686_v6  ;;  %v1079_v16 = vadd.f32 %v2802_v46, %v1078_v12  ;;  %v1204_v25 = vadd.f32 %v2802_v46, %v1203_v13  ;;  %v2558_v6 = vld [vmem:[%s3458_s0 + $0x160] sm:$0xff]  ;;  %v2608_v12 = vld [vmem:[%s3458_s0 + $0x2f0] sm:$0xff] }
 0x124   :  { %v1639_v43 = vmax.f32 %v1327_v35, 0.0  ;;  %v1689_v1 = vmax.f32 %v1452_v58, 0.0 }
 0x125   :  { %v1882_v19 = vmul.f32 0.25, %v1833_v15  ;;  %v1540_v20 = vmax.f32 %v1079_v16, 0.0  ;;  %v1590_v39 = vmax.f32 %v1204_v25, 0.0 }
 0x127   :  { %v1931_v22 = vpack.c.bf16 %v1882_v19, %v1882_v19  ;;  %v1736_v23 = vadd.f32 %v1589_v18, %v1540_v20 }
 0x129   :  { %1981 = vst.msk [vmem:[%s3459_s3 + $0x48] sm:$0xf] %vm1962_vm3, %v1931_v22  ;;  %v1785_v26 = vadd.f32 %v1736_v23, %v1638_v21  ;;  %v1328_v27 = vpop.f32.mrf.mxu2  ;;  %v1453_v30 = vpop.f32.mrf.mxu3 }
 0x12a   :  { %v1081_v31 = vpop.f32.mrf.mxu0  ;;  %v1206_v32 = vpop.f32.mrf.mxu1  ;;  %v1329_v54 = vadd.f32 %v2802_v46, %v1328_v27  ;;  %v1454_v16 = vadd.f32 %v2802_v46, %v1453_v30 }
 0x12b   :  { %v1834_v36 = vadd.f32 %v1785_v26, %v1687_v24  ;;  %v1082_v37 = vadd.f32 %v2802_v46, %v1081_v31  ;;  %v1207_v49 = vadd.f32 %v2802_v46, %v1206_v32 }
 0x12c   :  { %v1640_v62 = vmax.f32 %v1329_v54, 0.0  ;;  %v1690_v23 = vmax.f32 %v1454_v16, 0.0 }
 0x12d   :  { %v1883_v40 = vmul.f32 0.25, %v1834_v36  ;;  %v1541_v41 = vmax.f32 %v1082_v37, 0.0  ;;  %2434 = vmatmul.msk.bf16.gmra.mxu0 %vm720_vm2, %v2532_v28  ;;  %2459 = vmatmul.msk.bf16.gmra.mxu1 %vm720_vm2, %v2557_v29  ;;  %v1591_v59 = vmax.f32 %v1207_v49, 0.0 }
 0x12e   :  { %2484 = vmatmul.msk.bf16.gmra.mxu2 %vm720_vm2, %v2582_v33  ;;  %2509 = vmatmul.msk.bf16.gmra.mxu3 %vm720_vm2, %v2607_v34 }
 0x12f   :  { %v1932_v44 = vpack.c.bf16 %v1883_v40, %v1883_v40  ;;  %v1737_v45 = vadd.f32 %v1590_v39, %v1541_v41 }
 0x131   :  { %1982 = vst.msk [vmem:[%s3459_s3 + $0x4c] sm:$0xf] %vm1962_vm3, %v1932_v44  ;;  %v1786_v48 = vadd.f32 %v1737_v45, %v1639_v43  ;;  %v1331_v50 = vpop.f32.mrf.mxu2  ;;  %v1456_v51 = vpop.f32.mrf.mxu3  ;;  %v2534_v45 = vld [vmem:[%s3458_s0 + $0xa0] sm:$0xff] }
 0x132   :  { %v1083_v52 = vpop.f32.mrf.mxu0  ;;  %v1208_v53 = vpop.f32.mrf.mxu1  ;;  %v1332_v13 = vadd.f32 %v2802_v46, %v1331_v50  ;;  %v1457_v33 = vadd.f32 %v2802_v46, %v1456_v51  ;;  %v2584_v51 = vld [vmem:[%s3458_s0 + $0x230] sm:$0xff] }
 0x133   :  { %v1835_v56 = vadd.f32 %v1786_v48, %v1688_v47  ;;  %v1084_v57 = vadd.f32 %v2802_v46, %v1083_v52  ;;  %v1209_v2 = vadd.f32 %v2802_v46, %v1208_v53  ;;  %v2559_v47 = vld [vmem:[%s3458_s0 + $0x168] sm:$0xff]  ;;  %v2609_v52 = vld [vmem:[%s3458_s0 + $0x2f8] sm:$0xff] }
 0x134   :  { %v1641_v20 = vmax.f32 %v1332_v13, 0.0  ;;  %v1691_v40 = vmax.f32 %v1457_v33, 0.0 }
 0x135   :  { %v1884_v60 = vmul.f32 0.25, %v1835_v56  ;;  %v1542_v61 = vmax.f32 %v1084_v57, 0.0  ;;  %v1592_v17 = vmax.f32 %v1209_v2, 0.0 }
 0x137   :  { %v1933_v63 = vpack.c.bf16 %v1884_v60, %v1884_v60  ;;  %v1738_v0 = vadd.f32 %v1591_v59, %v1542_v61 }
 0x139   :  { %1983 = vst.msk [vmem:[%s3459_s3 + $0x50] sm:$0xf] %vm1962_vm3, %v1933_v63  ;;  %v1787_v3 = vadd.f32 %v1738_v0, %v1640_v62  ;;  %v1333_v4 = vpop.f32.mrf.mxu2  ;;  %v1458_v7 = vpop.f32.mrf.mxu3 }
 0x13a   :  { %v1086_v8 = vpop.f32.mrf.mxu0  ;;  %v1211_v9 = vpop.f32.mrf.mxu1  ;;  %v1334_v30 = vadd.f32 %v2802_v46, %v1333_v4  ;;  %v1459_v57 = vadd.f32 %v2802_v46, %v1458_v7 }
 0x13b   :  { %v1836_v14 = vadd.f32 %v1787_v3, %v1689_v1  ;;  %v1087_v15 = vadd.f32 %v2802_v46, %v1086_v8  ;;  %v1212_v25 = vadd.f32 %v2802_v46, %v1211_v9  ;;  %v3180_v1 = vld [vmem:[%s3457_s2] ss:$0 sm:$0xff] }
 0x13c   :  { %v1642_v37 = vmax.f32 %v1334_v30, 0.0  ;;  %v1692_v0 = vmax.f32 %v1459_v57, 0.0 }
 0x13d   :  { %v1885_v18 = vmul.f32 0.25, %v1836_v14  ;;  %v1543_v19 = vmax.f32 %v1087_v15, 0.0  ;;  %2435 = vmatmul.msk.bf16.gmra.mxu0 %vm720_vm2, %v2533_v5  ;;  %2460 = vmatmul.msk.bf16.gmra.mxu1 %vm720_vm2, %v2558_v6  ;;  %v1593_v34 = vmax.f32 %v1212_v25, 0.0 }
 0x13e   :  { %2485 = vmatmul.msk.bf16.gmra.mxu2 %vm720_vm2, %v2583_v11  ;;  %2510 = vmatmul.msk.bf16.gmra.mxu3 %vm720_vm2, %v2608_v12 }
 0x13f   :  { %v1934_v21 = vpack.c.bf16 %v1885_v18, %v1885_v18  ;;  %v1739_v22 = vadd.f32 %v1592_v17, %v1543_v19 }
 0x141   :  { %1984 = vst.msk [vmem:[%s3459_s3 + $0x54] sm:$0xf] %vm1962_vm3, %v1934_v21  ;;  %v1788_v24 = vadd.f32 %v1739_v22, %v1641_v20  ;;  %v1336_v26 = vpop.f32.mrf.mxu2  ;;  %v1461_v27 = vpop.f32.mrf.mxu3  ;;  %v2535_v22 = vld [vmem:[%s3458_s0 + $0xa8] sm:$0xff] }
 0x142   :  { %v1088_v28 = vpop.f32.mrf.mxu0  ;;  %v1213_v29 = vpop.f32.mrf.mxu1  ;;  %v1337_v53 = vadd.f32 %v2802_v46, %v1336_v26  ;;  %v1462_v11 = vadd.f32 %v3180_v1, %v1461_v27  ;;  %v2585_v27 = vld [vmem:[%s3458_s0 + $0x238] sm:$0xff] }
 0x143   :  { %v1837_v31 = vadd.f32 %v1788_v24, %v1690_v23  ;;  %v1089_v32 = vadd.f32 %v2802_v46, %v1088_v28  ;;  %v1214_v41 = vadd.f32 %v2802_v46, %v1213_v29  ;;  %v2560_v23 = vld [vmem:[%s3458_s0 + $0x170] sm:$0xff]  ;;  %v2610_v28 = vld [vmem:[%s3458_s0 + $0x300] sm:$0xff] }
 0x144   :  { %v1643_v61 = vmax.f32 %v1337_v53, 0.0  ;;  %v1693_v18 = vmax.f32 %v1462_v11, 0.0 }
 0x145   :  { %v1886_v35 = vmul.f32 0.25, %v1837_v31  ;;  %v1544_v36 = vmax.f32 %v1089_v32, 0.0  ;;  %v1594_v58 = vmax.f32 %v1214_v41, 0.0 }
 0x147   :  { %v1935_v38 = vpack.c.bf16 %v1886_v35, %v1886_v35  ;;  %v1740_v39 = vadd.f32 %v1593_v34, %v1544_v36 }
 0x149   :  { %1985 = vst.msk [vmem:[%s3459_s3 + $0x58] sm:$0xf] %vm1962_vm3, %v1935_v38  ;;  %v1789_v43 = vadd.f32 %v1740_v39, %v1642_v37  ;;  %v1338_v44 = vpop.f32.mrf.mxu2  ;;  %v1463_v48 = vpop.f32.mrf.mxu3 }
 0x14a   :  { %v1091_v49 = vpop.f32.mrf.mxu0  ;;  %v1216_v50 = vpop.f32.mrf.mxu1  ;;  %v1339_v7 = vadd.f32 %v3180_v1, %v1338_v44  ;;  %v1464_v32 = vadd.f32 %v3180_v1, %v1463_v48 }
 0x14b   :  { %v1838_v54 = vadd.f32 %v1789_v43, %v1691_v40  ;;  %v1092_v56 = vadd.f32 %v2802_v46, %v1091_v49  ;;  %v1217_v2 = vadd.f32 %v3180_v1, %v1216_v50 }
 0x14c   :  { %v1644_v15 = vmax.f32 %v1339_v7, 0.0  ;;  %v1694_v39 = vmax.f32 %v1464_v32, 0.0 }
 0x14d   :  { %v1887_v59 = vmul.f32 0.25, %v1838_v54  ;;  %v1545_v60 = vmax.f32 %v1092_v56, 0.0  ;;  %2436 = vmatmul.msk.bf16.gmra.mxu0 %vm720_vm2, %v2534_v45  ;;  %2461 = vmatmul.msk.bf16.gmra.mxu1 %vm720_vm2, %v2559_v47  ;;  %v1595_v12 = vmax.f32 %v1217_v2, 0.0 }
 0x14e   :  { %2486 = vmatmul.msk.bf16.gmra.mxu2 %vm720_vm2, %v2584_v51  ;;  %2511 = vmatmul.msk.bf16.gmra.mxu3 %vm720_vm2, %v2609_v52 }
 0x14f   :  { %v1936_v62 = vpack.c.bf16 %v1887_v59, %v1887_v59  ;;  %v1741_v63 = vadd.f32 %v1594_v58, %v1545_v60 }
 0x151   :  { %1986 = vst.msk [vmem:[%s3459_s3 + $0x5c] sm:$0xf] %vm1962_vm3, %v1936_v62  ;;  %v1790_v46 = vadd.f32 %v1741_v63, %v1643_v61  ;;  %v1341_v3 = vpop.f32.mrf.mxu2  ;;  %v1466_v4 = vpop.f32.mrf.mxu3  ;;  %v2536_v63 = vld [vmem:[%s3458_s0 + $0xb0] sm:$0xff] }
 0x152   :  { %v1093_v5 = vpop.f32.mrf.mxu0  ;;  %v1218_v6 = vpop.f32.mrf.mxu1  ;;  %v1342_v29 = vadd.f32 %v3180_v1, %v1341_v3  ;;  %v1467_v51 = vadd.f32 %v3180_v1, %v1466_v4  ;;  %v2586_v4 = vld [vmem:[%s3458_s0 + $0x240] sm:$0xff] }
 0x153   :  { %v1839_v8 = vadd.f32 %v1790_v46, %v1692_v0  ;;  %v1094_v9 = vadd.f32 %v3180_v1, %v1093_v5  ;;  %v1219_v19 = vadd.f32 %v3180_v1, %v1218_v6  ;;  %v2561_v0 = vld [vmem:[%s3458_s0 + $0x178] sm:$0xff]  ;;  %v2611_v5 = vld [vmem:[%s3458_s0 + $0x308] sm:$0xff] }
 0x154   :  { %v1645_v36 = vmax.f32 %v1342_v29, 0.0  ;;  %v1695_v59 = vmax.f32 %v1467_v51, 0.0 }
 0x155   :  { %v1888_v13 = vmul.f32 0.25, %v1839_v8  ;;  %v1546_v14 = vmax.f32 %v1094_v9, 0.0  ;;  %v1596_v33 = vmax.f32 %v1219_v19, 0.0 }
 0x157   :  { %v1937_v16 = vpack.c.bf16 %v1888_v13, %v1888_v13  ;;  %v1742_v17 = vadd.f32 %v1595_v12, %v1546_v14 }
 0x159   :  { %1987 = vst.msk [vmem:[%s3459_s3 + $0x60] sm:$0xf] %vm1962_vm3, %v1937_v16  ;;  %v1791_v20 = vadd.f32 %v1742_v17, %v1644_v15  ;;  %v1343_v21 = vpop.f32.mrf.mxu2  ;;  %v1468_v24 = vpop.f32.mrf.mxu3 }
 0x15a   :  { %v1096_v25 = vpop.f32.mrf.mxu0  ;;  %v1221_v26 = vpop.f32.mrf.mxu1  ;;  %v1344_v48 = vadd.f32 %v3180_v1, %v1343_v21  ;;  %v1469_v9 = vadd.f32 %v3180_v1, %v1468_v24 }
 0x15b   :  { %v1840_v30 = vadd.f32 %v1791_v20, %v1693_v18  ;;  %v1097_v31 = vadd.f32 %v3180_v1, %v1096_v25  ;;  %v1222_v40 = vadd.f32 %v3180_v1, %v1221_v26 }
 0x15c   :  { %v1646_v56 = vmax.f32 %v1344_v48, 0.0  ;;  %v1696_v17 = vmax.f32 %v1469_v9, 0.0 }
 0x15d   :  { %v1889_v34 = vmul.f32 0.25, %v1840_v30  ;;  %v1547_v35 = vmax.f32 %v1097_v31, 0.0  ;;  %2437 = vmatmul.msk.bf16.gmra.mxu0 %vm720_vm2, %v2535_v22  ;;  %2462 = vmatmul.msk.bf16.gmra.mxu1 %vm720_vm2, %v2560_v23  ;;  %v1597_v52 = vmax.f32 %v1222_v40, 0.0 }
 0x15e   :  { %2487 = vmatmul.msk.bf16.gmra.mxu2 %vm720_vm2, %v2585_v27  ;;  %2512 = vmatmul.msk.bf16.gmra.mxu3 %vm720_vm2, %v2610_v28 }
 0x15f   :  { %v1938_v37 = vpack.c.bf16 %v1889_v34, %v1889_v34  ;;  %v1743_v38 = vadd.f32 %v1596_v33, %v1547_v35 }
 0x161   :  { %1988 = vst.msk [vmem:[%s3459_s3 + $0x64] sm:$0xf] %vm1962_vm3, %v1938_v37  ;;  %v1792_v41 = vadd.f32 %v1743_v38, %v1645_v36  ;;  %v1346_v43 = vpop.f32.mrf.mxu2  ;;  %v1471_v44 = vpop.f32.mrf.mxu3  ;;  %v2537_v38 = vld [vmem:[%s3458_s0 + $0xb8] sm:$0xff] }
 0x162   :  { %v1098_v45 = vpop.f32.mrf.mxu0  ;;  %v1223_v47 = vpop.f32.mrf.mxu1  ;;  %v1347_v6 = vadd.f32 %v3180_v1, %v1346_v43  ;;  %v1472_v27 = vadd.f32 %v3180_v1, %v1471_v44  ;;  %v2587_v44 = vld [vmem:[%s3458_s0 + $0x248] sm:$0xff] }
 0x163   :  { %v1841_v49 = vadd.f32 %v1792_v41, %v1694_v39  ;;  %v1099_v50 = vadd.f32 %v3180_v1, %v1098_v45  ;;  %v1224_v60 = vadd.f32 %v3180_v1, %v1223_v47  ;;  %v2562_v39 = vld [vmem:[%s3458_s0 + $0x180] sm:$0xff] }
 0x164   :  { %v1647_v14 = vmax.f32 %v1347_v6, 0.0  ;;  %v1697_v34 = vmax.f32 %v1472_v27, 0.0 }
 0x165   :  { %v1890_v53 = vmul.f32 0.25, %v1841_v49  ;;  %v1548_v54 = vmax.f32 %v1099_v50, 0.0  ;;  %v1598_v11 = vmax.f32 %v1224_v60, 0.0 }
 0x167   :  { %v1939_v57 = vpack.c.bf16 %v1890_v53, %v1890_v53  ;;  %v1744_v58 = vadd.f32 %v1597_v52, %v1548_v54 }
 0x169   :  { %1989 = vst.msk [vmem:[%s3459_s3 + $0x68] sm:$0xf] %vm1962_vm3, %v1939_v57  ;;  %v1793_v61 = vadd.f32 %v1744_v58, %v1646_v56  ;;  %v1348_v62 = vpop.f32.mrf.mxu2  ;;  %v1473_v46 = vpop.f32.mrf.mxu3 }
 0x16a   :  { %v1101_v2 = vpop.f32.mrf.mxu0  ;;  %v1226_v3 = vpop.f32.mrf.mxu1  ;;  %v1349_v24 = vadd.f32 %v3180_v1, %v1348_v62  ;;  %v1474_v49 = vadd.f32 %v3180_v1, %v1473_v46 }
 0x16b   :  { %v1842_v7 = vadd.f32 %v1793_v61, %v1695_v59  ;;  %v1102_v8 = vadd.f32 %v3180_v1, %v1101_v2  ;;  %v1227_v18 = vadd.f32 %v3180_v1, %v1226_v3 }
 0x16c   :  { %v1648_v31 = vmax.f32 %v1349_v24, 0.0  ;;  %v1698_v57 = vmax.f32 %v1474_v49, 0.0 }
 0x16d   :  { %v1891_v12 = vmul.f32 0.25, %v1842_v7  ;;  %v1549_v13 = vmax.f32 %v1102_v8, 0.0  ;;  %2438 = vmatmul.msk.bf16.gmra.mxu0 %vm720_vm2, %v2536_v63  ;;  %2463 = vmatmul.msk.bf16.gmra.mxu1 %vm720_vm2, %v2561_v0  ;;  %v1599_v28 = vmax.f32 %v1227_v18, 0.0 }
 0x16e   :  { %2488 = vmatmul.msk.bf16.gmra.mxu2 %vm720_vm2, %v2586_v4  ;;  %2513 = vmatmul.msk.bf16.gmra.mxu3 %vm720_vm2, %v2611_v5 }
 0x16f   :  { %v1940_v15 = vpack.c.bf16 %v1891_v12, %v1891_v12  ;;  %v1745_v16 = vadd.f32 %v1598_v11, %v1549_v13 }
 0x171   :  { %1990 = vst.msk [vmem:[%s3459_s3 + $0x6c] sm:$0xf] %vm1962_vm3, %v1940_v15  ;;  %v1794_v19 = vadd.f32 %v1745_v16, %v1647_v14  ;;  %v1351_v20 = vpop.f32.mrf.mxu2  ;;  %v1476_v21 = vpop.f32.mrf.mxu3  ;;  %v2538_v15 = vld [vmem:[%s3458_s0 + $0xc0] sm:$0xff]  ;;  %v2563_v16 = vld [vmem:[%s3458_s0 + $0x188] sm:$0xff] }
 0x172   :  { %v1103_v22 = vpop.f32.mrf.mxu0  ;;  %v1228_v23 = vpop.f32.mrf.mxu1  ;;  %v1352_v45 = vadd.f32 %v3180_v1, %v1351_v20  ;;  %v1477_v3 = vadd.f32 %v3180_v1, %v1476_v21  ;;  %v2588_v20 = vld [vmem:[%s3458_s0 + $0x250] sm:$0xff] }
 0x173   :  { %v1843_v25 = vadd.f32 %v1794_v19, %v1696_v17  ;;  %v1104_v26 = vadd.f32 %v3180_v1, %v1103_v22  ;;  %v1229_v35 = vadd.f32 %v3180_v1, %v1228_v23 }
 0x174   :  { %v1649_v53 = vmax.f32 %v1352_v45, 0.0  ;;  %v1699_v11 = vmax.f32 %v1477_v3, 0.0 }
 0x175   :  { %v1892_v29 = vmul.f32 0.25, %v1843_v25  ;;  %v1550_v30 = vmax.f32 %v1104_v26, 0.0  ;;  %v1600_v50 = vmax.f32 %v1229_v35, 0.0 }
 0x177   :  { %v1941_v32 = vpack.c.bf16 %v1892_v29, %v1892_v29  ;;  %v1746_v33 = vadd.f32 %v1599_v28, %v1550_v30 }
 0x179   :  { %1991 = vst.msk [vmem:[%s3459_s3 + $0x70] sm:$0xf] %vm1962_vm3, %v1941_v32  ;;  %v1795_v36 = vadd.f32 %v1746_v33, %v1648_v31  ;;  %v1353_v37 = vpop.f32.mrf.mxu2  ;;  %v1478_v40 = vpop.f32.mrf.mxu3 }
 0x17a   :  { %v1106_v41 = vpop.f32.mrf.mxu0  ;;  %v1231_v43 = vpop.f32.mrf.mxu1  ;;  %v1354_v0 = vadd.f32 %v3180_v1, %v1353_v37  ;;  %v1479_v24 = vadd.f32 %v3180_v1, %v1478_v40 }
 0x17b   :  { %v1844_v47 = vadd.f32 %v1795_v36, %v1697_v34  ;;  %v1107_v48 = vadd.f32 %v3180_v1, %v1106_v41  ;;  %v1232_v58 = vadd.f32 %v3180_v1, %v1231_v43 }
 0x17c   :  { %v1650_v7 = vmax.f32 %v1354_v0, 0.0  ;;  %v1700_v31 = vmax.f32 %v1479_v24, 0.0 }
 0x17d   :  { %v1893_v51 = vmul.f32 0.25, %v1844_v47  ;;  %v1551_v52 = vmax.f32 %v1107_v48, 0.0  ;;  %2439 = vmatmul.msk.bf16.gmra.mxu0 %vm720_vm2, %v2537_v38  ;;  %2464 = vmatmul.msk.bf16.gmra.mxu1 %vm720_vm2, %v2562_v39  ;;  %v1601_v4 = vmax.f32 %v1232_v58, 0.0 }
 0x17e   :  { %2489 = vmatmul.msk.bf16.gmra.mxu2 %vm720_vm2, %v2587_v44 }
 0x17f   :  { %v1942_v54 = vpack.c.bf16 %v1893_v51, %v1893_v51  ;;  %v1747_v56 = vadd.f32 %v1600_v50, %v1551_v52 }
 0x181   :  { %1992 = vst.msk [vmem:[%s3459_s3 + $0x74] sm:$0xf] %vm1962_vm3, %v1942_v54  ;;  %v1796_v59 = vadd.f32 %v1747_v56, %v1649_v53  ;;  %v1356_v60 = vpop.f32.mrf.mxu2  ;;  %v1481_v61 = vpop.f32.mrf.mxu3 }
 0x182   :  { %v1108_v62 = vpop.f32.mrf.mxu0  ;;  %v1233_v63 = vpop.f32.mrf.mxu1  ;;  %v1357_v21 = vadd.f32 %v3180_v1, %v1356_v60  ;;  %v1482_v41 = vadd.f32 %v3180_v1, %v1481_v61 }
 0x183   :  { %v1845_v46 = vadd.f32 %v1796_v59, %v1698_v57  ;;  %v1109_v2 = vadd.f32 %v3180_v1, %v1108_v62  ;;  %v1234_v12 = vadd.f32 %v3180_v1, %v1233_v63 }
 0x184   :  { %v1651_v28 = vmax.f32 %v1357_v21, 0.0  ;;  %v1701_v50 = vmax.f32 %v1482_v41, 0.0 }
 0x185   :  { %v1894_v5 = vmul.f32 0.25, %v1845_v46  ;;  %v1552_v6 = vmax.f32 %v1109_v2, 0.0  ;;  %v1602_v25 = vmax.f32 %v1234_v12, 0.0 }
 0x187   :  { %v1943_v8 = vpack.c.bf16 %v1894_v5, %v1894_v5  ;;  %v1748_v9 = vadd.f32 %v1601_v4, %v1552_v6 }
 0x189   :  { %1993 = vst.msk [vmem:[%s3459_s3 + $0x78] sm:$0xf] %vm1962_vm3, %v1943_v8  ;;  %v1797_v13 = vadd.f32 %v1748_v9, %v1650_v7  ;;  %v1358_v14 = vpop.f32.mrf.mxu2  ;;  %v1483_v17 = vpop.f32.mrf.mxu3 }
 0x18a   :  { %v1111_v18 = vpop.f32.mrf.mxu0  ;;  %v1236_v19 = vpop.f32.mrf.mxu1  ;;  %v1359_v38 = vadd.f32 %v3180_v1, %v1358_v14  ;;  %v1484_v61 = vadd.f32 %v3180_v1, %v1483_v17 }
 0x18b   :  { %v1846_v22 = vadd.f32 %v1797_v13, %v1699_v11  ;;  %v1112_v23 = vadd.f32 %v3180_v1, %v1111_v18  ;;  %v1237_v32 = vadd.f32 %v3180_v1, %v1236_v19 }
 0x18c   :  { %v1652_v47 = vmax.f32 %v1359_v38, 0.0  ;;  %v1702_v4 = vmax.f32 %v1484_v61, 0.0 }
 0x18d   :  { %v1895_v26 = vmul.f32 0.25, %v1846_v22  ;;  %v1553_v27 = vmax.f32 %v1112_v23, 0.0  ;;  %2440 = vmatmul.msk.bf16.gmra.mxu0 %vm720_vm2, %v2538_v15  ;;  %2465 = vmatmul.msk.bf16.gmra.mxu1 %vm720_vm2, %v2563_v16  ;;  %v1603_v43 = vmax.f32 %v1237_v32, 0.0 }
 0x18e   :  { %2490 = vmatmul.msk.bf16.gmra.mxu2 %vm720_vm2, %v2588_v20 }
 0x18f   :  { %v1944_v29 = vpack.c.bf16 %v1895_v26, %v1895_v26  ;;  %v1749_v30 = vadd.f32 %v1602_v25, %v1553_v27 }
 0x191   :  { %1994 = vst.msk [vmem:[%s3459_s3 + $0x7c] sm:$0xf] %vm1962_vm3, %v1944_v29  ;;  %v1798_v33 = vadd.f32 %v1749_v30, %v1651_v28  ;;  %v1361_v34 = vpop.f32.mrf.mxu2  ;;  %v1486_v35 = vpop.f32.mrf.mxu3 }
 0x192   :  { %v1113_v36 = vpop.f32.mrf.mxu0  ;;  %v1238_v37 = vpop.f32.mrf.mxu1  ;;  %v1362_v58 = vadd.f32 %v3180_v1, %v1361_v34  ;;  %v1487_v15 = vadd.f32 %v3180_v1, %v1486_v35 }
 0x193   :  { %v1847_v39 = vadd.f32 %v1798_v33, %v1700_v31  ;;  %v1114_v40 = vadd.f32 %v3180_v1, %v1113_v36  ;;  %v1239_v51 = vadd.f32 %v3180_v1, %v1238_v37 }
 0x194   :  { %v1653_v46 = vmax.f32 %v1362_v58, 0.0  ;;  %v1703_v22 = vmax.f32 %v1487_v15, 0.0 }
 0x195   :  { %v1896_v44 = vmul.f32 0.25, %v1847_v39  ;;  %v1554_v45 = vmax.f32 %v1114_v40, 0.0  ;;  %v1604_v62 = vmax.f32 %v1239_v51, 0.0 }
 0x197   :  { %v1945_v48 = vpack.c.bf16 %v1896_v44, %v1896_v44  ;;  %v1750_v49 = vadd.f32 %v1603_v43, %v1554_v45 }
 0x199   :  { %1995 = vst.msk [vmem:[%s3459_s3 + $0x80] sm:$0xf] %vm1962_vm3, %v1945_v48  ;;  %v1799_v52 = vadd.f32 %v1750_v49, %v1652_v47  ;;  %v1363_v53 = vpop.f32.mrf.mxu2  ;;  %v1488_v54 = vpop.f32.mrf.mxu3 }
 0x19a   :  { %v1116_v56 = vpop.f32.mrf.mxu0  ;;  %v1241_v57 = vpop.f32.mrf.mxu1  ;;  %v1364_v12 = vadd.f32 %v3180_v1, %v1363_v53  ;;  %v1489_v32 = vadd.f32 %v3180_v1, %v1488_v54 }
 0x19b   :  { %v1848_v59 = vadd.f32 %v1799_v52, %v1701_v50  ;;  %v1117_v60 = vadd.f32 %v3180_v1, %v1116_v56  ;;  %v1242_v5 = vadd.f32 %v3180_v1, %v1241_v57 }
 0x19c   :  { %v1654_v19 = vmax.f32 %v1364_v12, 0.0  ;;  %v1704_v39 = vmax.f32 %v1489_v32, 0.0 }
 0x19d   :  { %v1897_v63 = vmul.f32 0.25, %v1848_v59  ;;  %v1555_v0 = vmax.f32 %v1117_v60, 0.0  ;;  %v1605_v16 = vmax.f32 %v1242_v5, 0.0 }
 0x19f   :  { %v1946_v2 = vpack.c.bf16 %v1897_v63, %v1897_v63  ;;  %v1751_v3 = vadd.f32 %v1604_v62, %v1555_v0 }
 0x1a1   :  { %1996 = vst.msk [vmem:[%s3459_s3 + $0x84] sm:$0xf] %vm1962_vm3, %v1946_v2  ;;  %v1800_v6 = vadd.f32 %v1751_v3, %v1653_v46  ;;  %v1366_v7 = vpop.f32.mrf.mxu2  ;;  %v1491_v8 = vpop.f32.mrf.mxu3 }
 0x1a2   :  { %v1118_v9 = vpop.f32.mrf.mxu0  ;;  %v1243_v11 = vpop.f32.mrf.mxu1  ;;  %v1367_v29 = vadd.f32 %v3180_v1, %v1366_v7  ;;  %v1492_v51 = vadd.f32 %v3180_v1, %v1491_v8 }
 0x1a3   :  { %v1849_v13 = vadd.f32 %v1800_v6, %v1702_v4  ;;  %v1119_v14 = vadd.f32 %v3180_v1, %v1118_v9  ;;  %v1244_v23 = vadd.f32 %v3180_v1, %v1243_v11 }
 0x1a4   :  { %v1655_v36 = vmax.f32 %v1367_v29, 0.0  ;;  %v1705_v59 = vmax.f32 %v1492_v51, 0.0 }
 0x1a5   :  { %v1898_v17 = vmul.f32 0.25, %v1849_v13  ;;  %v1556_v18 = vmax.f32 %v1119_v14, 0.0  ;;  %v1606_v33 = vmax.f32 %v1244_v23, 0.0 }
 0x1a7   :  { %v1947_v20 = vpack.c.bf16 %v1898_v17, %v1898_v17  ;;  %v1752_v21 = vadd.f32 %v1605_v16, %v1556_v18 }
 0x1a9   :  { %1997 = vst.msk [vmem:[%s3459_s3 + $0x88] sm:$0xf] %vm1962_vm3, %v1947_v20  ;;  %v1801_v24 = vadd.f32 %v1752_v21, %v1654_v19  ;;  %v1368_v25 = vpop.f32.mrf.mxu2  ;;  %v1493_v26 = vpop.f32.mrf.mxu3 }
 0x1aa   :  { %v1121_v27 = vpop.f32.mrf.mxu0  ;;  %v1246_v28 = vpop.f32.mrf.mxu1  ;;  %v1369_v48 = vadd.f32 %v3180_v1, %v1368_v25  ;;  %v1494_v5 = vadd.f32 %v3180_v1, %v1493_v26 }
 0x1ab   :  { %v1850_v30 = vadd.f32 %v1801_v24, %v1703_v22  ;;  %v1122_v31 = vadd.f32 %v3180_v1, %v1121_v27  ;;  %v1247_v40 = vadd.f32 %v3180_v1, %v1246_v28 }
 0x1ac   :  { %v1656_v56 = vmax.f32 %v1369_v48, 0.0  ;;  %v1706_v13 = vmax.f32 %v1494_v5, 0.0 }
 0x1ad   :  { %v1899_v34 = vmul.f32 0.25, %v1850_v30  ;;  %v1557_v35 = vmax.f32 %v1122_v31, 0.0  ;;  %v1607_v52 = vmax.f32 %v1247_v40, 0.0 }
 0x1af   :  { %v1948_v37 = vpack.c.bf16 %v1899_v34, %v1899_v34  ;;  %v1753_v38 = vadd.f32 %v1606_v33, %v1557_v35 }
 0x1b1   :  { %1998 = vst.msk [vmem:[%s3459_s3 + $0x8c] sm:$0xf] %vm1962_vm3, %v1948_v37  ;;  %v1802_v41 = vadd.f32 %v1753_v38, %v1655_v36  ;;  %v1371_v43 = vpop.f32.mrf.mxu2  ;;  %v1496_v44 = vpop.f32.mrf.mxu3 }
 0x1b2   :  { %v1123_v45 = vpop.f32.mrf.mxu0  ;;  %v1248_v47 = vpop.f32.mrf.mxu1  ;;  %v1372_v2 = vadd.f32 %v3180_v1, %v1371_v43  ;;  %v1497_v23 = vadd.f32 %v3180_v1, %v1496_v44 }
 0x1b3   :  { %v1851_v49 = vadd.f32 %v1802_v41, %v1704_v39  ;;  %v1124_v50 = vadd.f32 %v3180_v1, %v1123_v45  ;;  %v1249_v60 = vadd.f32 %v3180_v1, %v1248_v47 }
 0x1b4   :  { %v1657_v9 = vmax.f32 %v1372_v2, 0.0  ;;  %v1707_v30 = vmax.f32 %v1497_v23, 0.0 }
 0x1b5   :  { %v1900_v53 = vmul.f32 0.25, %v1851_v49  ;;  %v1558_v54 = vmax.f32 %v1124_v50, 0.0  ;;  %v1608_v6 = vmax.f32 %v1249_v60, 0.0 }
 0x1b7   :  { %v1949_v57 = vpack.c.bf16 %v1900_v53, %v1900_v53  ;;  %v1754_v58 = vadd.f32 %v1607_v52, %v1558_v54 }
 0x1b9   :  { %1999 = vst.msk [vmem:[%s3459_s3 + $0x90] sm:$0xf] %vm1962_vm3, %v1949_v57  ;;  %v1803_v61 = vadd.f32 %v1754_v58, %v1656_v56  ;;  %v1373_v62 = vpop.f32.mrf.mxu2  ;;  %v1498_v63 = vpop.f32.mrf.mxu3 }
 0x1ba   :  { %v1126_v0 = vpop.f32.mrf.mxu0  ;;  %v1251_v46 = vpop.f32.mrf.mxu1  ;;  %v1374_v20 = vadd.f32 %v3180_v1, %v1373_v62  ;;  %v1499_v39 = vadd.f32 %v3180_v1, %v1498_v63 }
 0x1bb   :  { %v1852_v3 = vadd.f32 %v1803_v61, %v1705_v59  ;;  %v1127_v4 = vadd.f32 %v3180_v1, %v1126_v0  ;;  %v1252_v14 = vadd.f32 %v3180_v1, %v1251_v46 }
 0x1bc   :  { %v1658_v27 = vmax.f32 %v1374_v20, 0.0  ;;  %v1708_v49 = vmax.f32 %v1499_v39, 0.0 }
 0x1bd   :  { %v1901_v7 = vmul.f32 0.25, %v1852_v3  ;;  %v1559_v8 = vmax.f32 %v1127_v4, 0.0  ;;  %v1609_v24 = vmax.f32 %v1252_v14, 0.0 }
 0x1bf   :  { %v1950_v11 = vpack.c.bf16 %v1901_v7, %v1901_v7  ;;  %v1755_v12 = vadd.f32 %v1608_v6, %v1559_v8 }
 0x1c1   :  { %2000 = vst.msk [vmem:[%s3459_s3 + $0x94] sm:$0xf] %vm1962_vm3, %v1950_v11  ;;  %v1804_v15 = vadd.f32 %v1755_v12, %v1657_v9  ;;  %v1376_v16 = vpop.f32.mrf.mxu2  ;;  %v1501_v17 = vpop.f32.mrf.mxu3 }
 0x1c2   :  { %v1128_v18 = vpop.f32.mrf.mxu0  ;;  %v1253_v19 = vpop.f32.mrf.mxu1  ;;  %v1377_v36 = vadd.f32 %v3180_v1, %v1376_v16  ;;  %v1502_v59 = vadd.f32 %v3180_v1, %v1501_v17 }
 0x1c3   :  { %v1853_v21 = vadd.f32 %v1804_v15, %v1706_v13  ;;  %v1129_v22 = vadd.f32 %v3180_v1, %v1128_v18  ;;  %v1254_v31 = vadd.f32 %v3180_v1, %v1253_v19 }
 0x1c4   :  { %v1659_v45 = vmax.f32 %v1377_v36, 0.0  ;;  %v1709_v3 = vmax.f32 %v1502_v59, 0.0 }
 0x1c5   :  { %v1902_v25 = vmul.f32 0.25, %v1853_v21  ;;  %v1560_v26 = vmax.f32 %v1129_v22, 0.0  ;;  %v1610_v41 = vmax.f32 %v1254_v31, 0.0 }
 0x1c7   :  { %v1951_v28 = vpack.c.bf16 %v1902_v25, %v1902_v25  ;;  %v1756_v29 = vadd.f32 %v1609_v24, %v1560_v26 }
 0x1c9   :  { %2001 = vst.msk [vmem:[%s3459_s3 + $0x98] sm:$0xf] %vm1962_vm3, %v1951_v28  ;;  %v1805_v32 = vadd.f32 %v1756_v29, %v1658_v27  ;;  %v1378_v33 = vpop.f32.mrf.mxu2  ;;  %v1503_v40 = vpop.f32.mrf.mxu3 }
 0x1ca   :  { %v1131_v34 = vpop.f32.mrf.mxu0  ;;  %v1256_v35 = vpop.f32.mrf.mxu1  ;;  %v1379_v56 = vadd.f32 %v3180_v1, %v1378_v33  ;;  %v1504_v13 = vadd.f32 %v3180_v1, %v1503_v40 }
 0x1cb   :  { %v1854_v37 = vadd.f32 %v1805_v32, %v1707_v30  ;;  %v1132_v38 = vadd.f32 %v3180_v1, %v1131_v34  ;;  %v1257_v50 = vadd.f32 %v3180_v1, %v1256_v35 }
 0x1cc   :  { %v1660_v0 = vmax.f32 %v1379_v56, 0.0  ;;  %v1710_v20 = vmax.f32 %v1504_v13, 0.0 }
 0x1cd   :  { %v1903_v43 = vmul.f32 0.25, %v1854_v37  ;;  %v1561_v44 = vmax.f32 %v1132_v38, 0.0  ;;  %v1611_v60 = vmax.f32 %v1257_v50, 0.0 }
 0x1cf   :  { %v1952_v47 = vpack.c.bf16 %v1903_v43, %v1903_v43  ;;  %v1757_v48 = vadd.f32 %v1610_v41, %v1561_v44 }
 0x1d1   :  { %2002 = vst.msk [vmem:[%s3459_s3 + $0x9c] sm:$0xf] %vm1962_vm3, %v1952_v47  ;;  %v1806_v51 = vadd.f32 %v1757_v48, %v1659_v45  ;;  %v1381_v52 = vpop.f32.mrf.mxu2  ;;  %v1506_v63 = vpop.f32.mrf.mxu3 }
 0x1d2   :  { %v1133_v53 = vpop.f32.mrf.mxu0  ;;  %v1258_v54 = vpop.f32.mrf.mxu1  ;;  %v1382_v9 = vadd.f32 %v3180_v1, %v1381_v52  ;;  %v1507_v30 = vadd.f32 %v3180_v1, %v1506_v63 }
 0x1d3   :  { %v1855_v57 = vadd.f32 %v1806_v51, %v1708_v49  ;;  %v1134_v58 = vadd.f32 %v3180_v1, %v1133_v53  ;;  %v1259_v4 = vadd.f32 %v3180_v1, %v1258_v54 }
 0x1d4   :  { %v1661_v17 = vmax.f32 %v1382_v9, 0.0  ;;  %v1711_v37 = vmax.f32 %v1507_v30, 0.0 }
 0x1d5   :  { %v1904_v61 = vmul.f32 0.25, %v1855_v57  ;;  %v1562_v62 = vmax.f32 %v1134_v58, 0.0  ;;  %v1612_v14 = vmax.f32 %v1259_v4, 0.0 }
 0x1d7   :  { %v1953_v46 = vpack.c.bf16 %v1904_v61, %v1904_v61  ;;  %v1758_v2 = vadd.f32 %v1611_v60, %v1562_v62 }
 0x1d9   :  { %2003 = vst.msk [vmem:[%s3459_s3 + $0xa0] sm:$0xf] %vm1962_vm3, %v1953_v46  ;;  %v1807_v5 = vadd.f32 %v1758_v2, %v1660_v0  ;;  %v1383_v6 = vpop.f32.mrf.mxu2  ;;  %v1508_v21 = vpop.f32.mrf.mxu3 }
 0x1da   :  { %v1136_v7 = vpop.f32.mrf.mxu0  ;;  %v1261_v8 = vpop.f32.mrf.mxu1  ;;  %v1384_v27 = vadd.f32 %v3180_v1, %v1383_v6  ;;  %v1509_v49 = vadd.f32 %v3180_v1, %v1508_v21 }
 0x1db   :  { %v1856_v11 = vadd.f32 %v1807_v5, %v1709_v3  ;;  %v1137_v12 = vadd.f32 %v3180_v1, %v1136_v7  ;;  %v1262_v22 = vadd.f32 %v3180_v1, %v1261_v8 }
 0x1dc   :  { %v1662_v34 = vmax.f32 %v1384_v27, 0.0  ;;  %v1712_v57 = vmax.f32 %v1509_v49, 0.0 }
 0x1dd   :  { %v1905_v15 = vmul.f32 0.25, %v1856_v11  ;;  %v1563_v16 = vmax.f32 %v1137_v12, 0.0  ;;  %v1613_v31 = vmax.f32 %v1262_v22, 0.0 }
 0x1df   :  { %v1954_v18 = vpack.c.bf16 %v1905_v15, %v1905_v15  ;;  %v1759_v19 = vadd.f32 %v1612_v14, %v1563_v16 }
 0x1e1   :  { %2004 = vst.msk [vmem:[%s3459_s3 + $0xa4] sm:$0xf] %vm1962_vm3, %v1954_v18  ;;  %v1808_v23 = vadd.f32 %v1759_v19, %v1661_v17  ;;  %v1386_v24 = vpop.f32.mrf.mxu2  ;;  %v1511_v41 = vpop.f32.mrf.mxu3 }
 0x1e2   :  { %v1138_v25 = vpop.f32.mrf.mxu0  ;;  %v1263_v26 = vpop.f32.mrf.mxu1  ;;  %v1387_v45 = vadd.f32 %v3180_v1, %v1386_v24  ;;  %v1512_v2 = vadd.f32 %v3180_v1, %v1511_v41 }
 0x1e3   :  { %v1857_v28 = vadd.f32 %v1808_v23, %v1710_v20  ;;  %v1139_v29 = vadd.f32 %v3180_v1, %v1138_v25  ;;  %v1264_v38 = vadd.f32 %v3180_v1, %v1263_v26 }
 0x1e4   :  { %v1663_v53 = vmax.f32 %v1387_v45, 0.0  ;;  %v1713_v11 = vmax.f32 %v1512_v2, 0.0 }
 0x1e5   :  { %v1906_v32 = vmul.f32 0.25, %v1857_v28  ;;  %v1564_v33 = vmax.f32 %v1139_v29, 0.0  ;;  %v1614_v50 = vmax.f32 %v1264_v38, 0.0 }
 0x1e7   :  { %v1955_v35 = vpack.c.bf16 %v1906_v32, %v1906_v32  ;;  %v1760_v36 = vadd.f32 %v1613_v31, %v1564_v33 }
 0x1e9   :  { %2005 = vst.msk [vmem:[%s3459_s3 + $0xa8] sm:$0xf] %vm1962_vm3, %v1955_v35  ;;  %v1809_v39 = vadd.f32 %v1760_v36, %v1662_v34  ;;  %v1388_v40 = vpop.f32.mrf.mxu2  ;;  %v1513_v3 = vpop.f32.mrf.mxu3 }
 0x1ea   :  { %v1141_v43 = vpop.f32.mrf.mxu0  ;;  %v1266_v44 = vpop.f32.mrf.mxu1  ;;  %v1389_v63 = vadd.f32 %v3180_v1, %v1388_v40  ;;  %v1514_v20 = vadd.f32 %v3180_v1, %v1513_v3 }
 0x1eb   :  { %v1858_v47 = vadd.f32 %v1809_v39, %v1711_v37  ;;  %v1142_v48 = vadd.f32 %v3180_v1, %v1141_v43  ;;  %v1267_v58 = vadd.f32 %v3180_v1, %v1266_v44 }
 0x1ec   :  { %v1664_v7 = vmax.f32 %v1389_v63, 0.0  ;;  %v1714_v28 = vmax.f32 %v1514_v20, 0.0 }
 0x1ed   :  { %v1907_v51 = vmul.f32 0.25, %v1858_v47  ;;  %v1565_v52 = vmax.f32 %v1142_v48, 0.0  ;;  %v1615_v4 = vmax.f32 %v1267_v58, 0.0 }
 0x1ef   :  { %v1956_v54 = vpack.c.bf16 %v1907_v51, %v1907_v51  ;;  %v1761_v56 = vadd.f32 %v1614_v50, %v1565_v52 }
 0x1f1   :  { %2006 = vst.msk [vmem:[%s3459_s3 + $0xac] sm:$0xf] %vm1962_vm3, %v1956_v54  ;;  %v1810_v59 = vadd.f32 %v1761_v56, %v1663_v53  ;;  %v1391_v60 = vpop.f32.mrf.mxu2  ;;  %v1516_v24 = vpop.f32.mrf.mxu3 }
 0x1f2   :  { %v1143_v61 = vpop.f32.mrf.mxu0  ;;  %v1268_v62 = vpop.f32.mrf.mxu1  ;;  %v1392_v17 = vadd.f32 %v3180_v1, %v1391_v60  ;;  %v1517_v37 = vadd.f32 %v3180_v1, %v1516_v24 }
 0x1f3   :  { %v1859_v0 = vadd.f32 %v1810_v59, %v1712_v57  ;;  %v1144_v46 = vadd.f32 %v3180_v1, %v1143_v61  ;;  %v1269_v12 = vadd.f32 %v3180_v1, %v1268_v62 }
 0x1f4   :  { %v1665_v25 = vmax.f32 %v1392_v17, 0.0  ;;  %v1715_v45 = vmax.f32 %v1517_v37, 0.0 }
 0x1f5   :  { %v1908_v5 = vmul.f32 0.25, %v1859_v0  ;;  %v1566_v6 = vmax.f32 %v1144_v46, 0.0  ;;  %v1616_v21 = vmax.f32 %v1269_v12, 0.0  ;;  %v1032_v46 = vadd.f32 %v3180_v1, %v2787_v42 }
 0x1f7   :  { %v1957_v8 = vpack.c.bf16 %v1908_v5, %v1908_v5  ;;  %v1762_v9 = vadd.f32 %v1615_v4, %v1566_v6  ;;  %v1521_v12 = vmax.f32 %v1032_v46, 0.0 }
 0x1f9   :  { %2007 = vst.msk [vmem:[%s3459_s3 + $0xb0] sm:$0xf] %vm1962_vm3, %v1957_v8  ;;  %v1811_v13 = vadd.f32 %v1762_v9, %v1664_v7  ;;  %v1393_v14 = vpop.f32.mrf.mxu2  ;;  %v1518_v47 = vpop.f32.mrf.mxu3 }
 0x1fa   :  { %v1146_v15 = vpop.f32.mrf.mxu0  ;;  %v1271_v16 = vpop.f32.mrf.mxu1  ;;  %v1394_v34 = vadd.f32 %v3180_v1, %v1393_v14  ;;  %v1519_v57 = vadd.f32 %v3180_v1, %v1518_v47 }
 0x1fb   :  { %v1860_v18 = vadd.f32 %v1811_v13, %v1713_v11  ;;  %v1147_v19 = vadd.f32 %v3180_v1, %v1146_v15  ;;  %v1272_v29 = vadd.f32 %v3180_v1, %v1271_v16 }
 0x1fc   :  { %v1666_v41 = vmax.f32 %v1394_v34, 0.0  ;;  %v1716_v0 = vmax.f32 %v1519_v57, 0.0 }
 0x1fd   :  { %v1909_v22 = vmul.f32 0.25, %v1860_v18  ;;  %v1567_v23 = vmax.f32 %v1147_v19, 0.0  ;;  %v1617_v38 = vmax.f32 %v1272_v29, 0.0 }
 0x1ff   :  { %v1958_v26 = vpack.c.bf16 %v1909_v22, %v1909_v22  ;;  %v1763_v27 = vadd.f32 %v1616_v21, %v1567_v23 }
 0x201   :  { %2008 = vst.msk [vmem:[%s3459_s3 + $0xb4] sm:$0xf] %vm1962_vm3, %v1958_v26  ;;  %v1812_v30 = vadd.f32 %v1763_v27, %v1665_v25  ;;  %v1396_v31 = vpop.f32.mrf.mxu2 }
 0x202   :  { %v1148_v32 = vpop.f32.mrf.mxu0  ;;  %v1273_v33 = vpop.f32.mrf.mxu1  ;;  %v1397_v53 = vadd.f32 %v3180_v1, %v1396_v31 }
 0x203   :  { %v1861_v35 = vadd.f32 %v1812_v30, %v1714_v28  ;;  %v1149_v36 = vadd.f32 %v3180_v1, %v1148_v32  ;;  %v1274_v48 = vadd.f32 %v3180_v1, %v1273_v33 }
 0x204   :  { %v1667_v61 = vmax.f32 %v1397_v53, 0.0 }
 0x205   :  { %v1910_v39 = vmul.f32 0.25, %v1861_v35  ;;  %v1568_v40 = vmax.f32 %v1149_v36, 0.0  ;;  %v1618_v58 = vmax.f32 %v1274_v48, 0.0 }
 0x207   :  { %v1959_v43 = vpack.c.bf16 %v1910_v39, %v1910_v39  ;;  %v1764_v44 = vadd.f32 %v1617_v38, %v1568_v40 }
 0x209   :  { %2009 = vst.msk [vmem:[%s3459_s3 + $0xb8] sm:$0xf] %vm1962_vm3, %v1959_v43  ;;  %v1813_v49 = vadd.f32 %v1764_v44, %v1666_v41  ;;  %v1398_v50 = vpop.f32.mrf.mxu2 }
 0x20a   :  { %v1151_v51 = vpop.f32.mrf.mxu0  ;;  %v1276_v52 = vpop.f32.mrf.mxu1  ;;  %v1399_v42 = vadd.f32 %v3180_v1, %v1398_v50 }
 0x20b   :  { %v1862_v54 = vadd.f32 %v1813_v49, %v1715_v45  ;;  %v1152_v56 = vadd.f32 %v3180_v1, %v1151_v51  ;;  %v1277_v4 = vadd.f32 %v3180_v1, %v1276_v52 }
 0x20c   :  { %v1668_v21 = vmax.f32 %v1399_v42, 0.0 }
 0x20d   :  { %v1911_v59 = vmul.f32 0.25, %v1862_v54  ;;  %v1569_v60 = vmax.f32 %v1152_v56, 0.0  ;;  %v1619_v16 = vmax.f32 %v1277_v4, 0.0 }
 0x20f   :  { %v1960_v62 = vpack.c.bf16 %v1911_v59, %v1911_v59  ;;  %v1765_v63 = vadd.f32 %v1618_v58, %v1569_v60 }
 0x211   :  { %2010 = vst.msk [vmem:[%s3459_s3 + $0xbc] sm:$0xf] %vm1962_vm3, %v1960_v62  ;;  %v1814_v2 = vadd.f32 %v1765_v63, %v1667_v61  ;;  %v1401_v3 = vpop.f32.mrf.mxu2 }
 0x212   :  { %v1153_v5 = vpop.f32.mrf.mxu0  ;;  %v1278_v6 = vpop.f32.mrf.mxu1  ;;  %v1402_v8 = vadd.f32 %v3180_v1, %v1401_v3 }
 0x213   :  { %v1863_v7 = vadd.f32 %v1814_v2, %v1716_v0  ;;  %v1154_v9 = vadd.f32 %v3180_v1, %v1153_v5  ;;  %v1279_v11 = vadd.f32 %v3180_v1, %v1278_v6 }
 0x214   :  { %v1669_v18 = vmax.f32 %v1402_v8, 0.0 }
 0x215   :  { %v1912_v13 = vmul.f32 0.25, %v1863_v7  ;;  %v1570_v14 = vmax.f32 %v1154_v9, 0.0  ;;  %v1620_v15 = vmax.f32 %v1279_v11, 0.0 }
 0x217   :  { %v1961_v17 = vpack.c.bf16 %v1912_v13, %v1912_v13  ;;  %v1717_v19 = vadd.f32 %v1570_v14, %v1521_v12  ;;  %v1767_v20 = vadd.f32 %v2806_v55, %v1620_v15 }
 0x219   :  { %2011 = vst.msk [vmem:[%s3459_s3 + $0xc0] sm:$0xf] %vm1962_vm3, %v1961_v17  ;;  %v1766_v22 = vadd.f32 %v1717_v19, %v1619_v16  ;;  %v1816_v23 = vadd.f32 %v1767_v20, %v1669_v18  ;;  %v1403_v24 = vpop.f32.mrf.mxu2 }
 0x21a   :  { %v1404_v25 = vadd.f32 %v3180_v1, %v1403_v24 }
 0x21b   :  { %v1815_v26 = vadd.f32 %v1766_v22, %v1668_v21  ;;  %v1865_v27 = vmul.f32 0.25, %v1816_v23 }
 0x21c   :  { %v1670_v28 = vmax.f32 %v1404_v25, 0.0 }
 0x21d   :  { %v1864_v29 = vmul.f32 0.25, %v1815_v26  ;;  %v1914_v30 = vpack.c.bf16 %v1865_v27, %v1865_v27 }
 0x21e   :  { %v1817_v31 = vadd.f32 %v2828_v10, %v1670_v28 }
 0x21f   :  { %v1913_v32 = vpack.c.bf16 %v1864_v29, %v1864_v29  ;;  %1964 = vst.msk [vmem:[%s3459_s3 + $0x4] sm:$0xf] %vm1962_vm3, %v1914_v30 }
 0x220   :  { %v1866_v55 = vmul.f32 0.25, %v1817_v31 }
 0x221   :  { %1963 = vst.msk [vmem:[%s3459_s3] sm:$0xf] %vm1962_vm3, %v1913_v32 }
 0x222   :  { %v1915_v1 = vpack.c.bf16 %v1866_v55, %v1866_v55 }
 0x224   :  { %1965 = vst.msk [vmem:[%s3459_s3 + $0x8] sm:$0xf] %vm1962_vm3, %v1915_v1 }

// kernel: lenet_forward.3
= control target key start
LH: loop header
LB: loop body
LE: loop exit
PB: predicated region body
PF: predicated region fallthrough
CT: control target
= control target key end

     0   :  { %vm815_vm0 = vcmask 1042432   ;;  %s4583_s0 = inlined_call_operand.vmem [shape: bf16[800,150], index: 0, kind: input, shape index: {}]   ;;  %s4584_s1 = inlined_call_operand.vmem [shape: bf16[150,16], index: 1, kind: input, shape index: {}]   ;;  %s4585_s2 = inlined_call_operand.vmem [shape: f32[1,16], index: 2, kind: input, shape index: {}]   ;;  %s4586_s3 = inlined_call_operand.vmem [shape: bf16[25,16,120], index: 3, kind: input, shape index: {}]   ;;  %s4587_s4 = inlined_call_operand.vmem [shape: f32[1,120], index: 4, kind: input, shape index: {}]   ;;  %s4588_s5 = inlined_call_operand.vmem [shape: bf16[120,84], index: 5, kind: input, shape index: {}]   ;;  %s4589_s6 = inlined_call_operand.vmem [shape: f32[1,84], index: 6, kind: input, shape index: {}]   ;;  %s4590_s7 = inlined_call_operand.vmem [shape: bf16[84,10], index: 7, kind: input, shape index: {}]   ;;  %s4591_s8 = inlined_call_operand.vmem [shape: f32[1,10], index: 8, kind: input, shape index: {}]   ;;  %s4592_s9 = inlined_call_operand.hbm [shape: f32[2,10], index: 9, kind: output, shape index: {}]  }
   0x1   :  { %v3207_v0 = vld [vmem:[%s4584_s1 + $0x38] sm:$0xff]  ;;  %v152_v1 = vld [vmem:[%s4584_s1 + $0x48] sm:$0x7]  ;;  %v3206_v3 = vld [vmem:[%s4584_s1 + $0x30] sm:$0xff] }
   0x2   :  { %v644_v2 = vunpack.c.l.b16 %v152_v1  ;;  %819 = vmatpush.bf16.msra.mxu0 %v3207_v0  ;;  %3246 = vmatpush.bf16.msra.mxu3 %v3207_v0  ;;  %v3208_v6 = vld [vmem:[%s4584_s1 + $0x40] sm:$0xff]  ;;  %v3205_v7 = vld [vmem:[%s4584_s1 + $0x28] sm:$0xff] }
   0x3   :  { %v3100_v8 = vld [vmem:[%s4583_s0 + $0x4] sm:$0xf]  ;;  %v2395_v9 = vld [vmem:[%s4583_s0 + $0x8] sm:$0xf0] }
   0x4   :  { %v654_v4 = vpack.c.b16 %v644_v2, %v644_v2 }
   0x6   :  { %v817_v5 = vsel %vm815_vm0, %v654_v4, 0  ;;  %820 = vmatpush.bf16.msra.mxu0 %v3206_v3  ;;  %3247 = vmatpush.bf16.msra.mxu3 %v3206_v3 }
   0x7   :  { %1084 = vmatpush.bf16.msra.mxu1 %v817_v5  ;;  %3254 = vmatpush.bf16.msra.mxu2 %v817_v5 }
   0x8   :  { %14 = vsyncpa [#allocation3], 0  ;;  %v2398_v10 = vor.u32 %v3100_v8, %v2395_v9  ;;  %vm664_vm1 = vcmask 179200   ;;  %v3204_v11 = vld [vmem:[%s4584_s1 + $0x20] sm:$0xff]  ;;  %v3203_v12 = vld [vmem:[%s4584_s1 + $0x18] sm:$0xff]  ;;  %vm1550_vm2 = vcmask 130048  }
   0x9   :  { %v3202_v13 = vld [vmem:[%s4584_s1 + $0x10] sm:$0xff]  ;;  %v3201_v14 = vld [vmem:[%s4584_s1 + $0x8] sm:$0xff]  ;;  %v2403_v16 = vld [vmem:[%s4583_s0 + $0x18] sm:$0xf0]  ;;  %vm2285_vm3 = vcmask 1043456   ;;  %vm2356_vm4 = vcmask 1041408  }
   0xa   :  { %821 = vmatpush.bf16.msra.mxu0 %v3205_v7  ;;  %3248 = vmatpush.bf16.msra.mxu3 %v3205_v7  ;;  %v3102_v15 = vld [vmem:[%s4583_s0 + $0x14] sm:$0xf]  ;;  %v3200_v18 = vld [vmem:[%s4584_s1] sm:$0xff]  ;;  %v3101_v20 = vld [vmem:[%s4583_s0 + $0x4] sm:$0xf0]  ;;  %vm2281_vm5 = vcmask 982016  }
   0xb   :  { %1085 = vmatpush.bf16.msra.mxu1 %v3208_v6  ;;  %3255 = vmatpush.bf16.msra.mxu2 %v3208_v6  ;;  %v2406_v17 = vor.u32 %v3102_v15, %v2403_v16  ;;  %v2393_v19 = vld [vmem:[%s4583_s0] sm:$0xf]  ;;  %v3104_v22 = vld [vmem:[%s4583_s0 + $0x24] sm:$0xf]  ;;  %v2411_v23 = vld [vmem:[%s4583_s0 + $0x28] sm:$0xf0] }
   0xc   :  { %v2394_v21 = vor.u32 %v3101_v20, %v2393_v19  ;;  %v2414_v24 = vor.u32 %v3104_v22, %v2411_v23  ;;  %v2401_v25 = vld [vmem:[%s4583_s0 + $0x10] sm:$0xf]  ;;  %v3103_v26 = vld [vmem:[%s4583_s0 + $0x14] sm:$0xf0]  ;;  %v3106_v28 = vld [vmem:[%s4583_s0 + $0x34] sm:$0xf] }
   0xd   :  { %v2402_v27 = vor.u32 %v3103_v26, %v2401_v25  ;;  %v2419_v29 = vld [vmem:[%s4583_s0 + $0x38] sm:$0xf0]  ;;  %v2409_v31 = vld [vmem:[%s4583_s0 + $0x20] sm:$0xf]  ;;  %v3105_v32 = vld [vmem:[%s4583_s0 + $0x24] sm:$0xf0] }
   0xe   :  { %2827 = vmatmul.msk.bf16.vlgmr.msra.gmra.mxu1 %vm664_vm1, %v2398_v10  ;;  %822 = vmatpush.bf16.msra.mxu0 %v3204_v11  ;;  %v2422_v30 = vor.u32 %v3106_v28, %v2419_v29  ;;  %v2410_v33 = vor.u32 %v3105_v32, %v2409_v31  ;;  %v3108_v34 = vld [vmem:[%s4583_s0 + $0x44] sm:$0xf]  ;;  %v2427_v35 = vld [vmem:[%s4583_s0 + $0x48] sm:$0xf0]  ;;  %v2417_v37 = vld [vmem:[%s4583_s0 + $0x30] sm:$0xf] }
   0xf   :  { %3249 = vmatpush.bf16.msra.mxu3 %v3204_v11  ;;  %v2430_v36 = vor.u32 %v3108_v34, %v2427_v35  ;;  %v3107_v38 = vld [vmem:[%s4583_s0 + $0x34] sm:$0xf0]  ;;  %v3110_v40 = vld [vmem:[%s4583_s0 + $0x54] sm:$0xf]  ;;  %v2435_v41 = vld [vmem:[%s4583_s0 + $0x58] sm:$0xf0] }
  0x10   :  { %v2418_v39 = vor.u32 %v3107_v38, %v2417_v37  ;;  %v2438_v42 = vor.u32 %v3110_v40, %v2435_v41  ;;  %v2425_v43 = vld [vmem:[%s4583_s0 + $0x40] sm:$0xf]  ;;  %v3109_v44 = vld [vmem:[%s4583_s0 + $0x44] sm:$0xf0]  ;;  %v3112_v46 = vld [vmem:[%s4583_s0 + $0x64] sm:$0xf] }
  0x11   :  { %v2426_v45 = vor.u32 %v3109_v44, %v2425_v43  ;;  %v2443_v47 = vld [vmem:[%s4583_s0 + $0x68] sm:$0xf0]  ;;  %v2433_v49 = vld [vmem:[%s4583_s0 + $0x50] sm:$0xf]  ;;  %v3111_v50 = vld [vmem:[%s4583_s0 + $0x54] sm:$0xf0] }
  0x12   :  { %823 = vmatpush.bf16.msra.mxu0 %v3203_v12  ;;  %v2446_v48 = vor.u32 %v3112_v46, %v2443_v47  ;;  %v2649_v51 = vld [vmem:[%s4583_s0 + $0x200] sm:$0xf]  ;;  %v3165_v52 = vld [vmem:[%s4583_s0 + $0x204] sm:$0xf0]  ;;  %v2434_v53 = vor.u32 %v3111_v50, %v2433_v49  ;;  %v3114_v55 = vld [vmem:[%s4583_s0 + $0x74] sm:$0xf] }
  0x13   :  { %3250 = vmatpush.bf16.msra.mxu3 %v3203_v12  ;;  %v2650_v54 = vor.u32 %v3165_v52, %v2649_v51  ;;  %v2451_v56 = vld [vmem:[%s4583_s0 + $0x78] sm:$0xf0]  ;;  %v2441_v58 = vld [vmem:[%s4583_s0 + $0x60] sm:$0xf]  ;;  %v3113_v59 = vld [vmem:[%s4583_s0 + $0x64] sm:$0xf0] }
  0x14   :  { %v2454_v57 = vor.u32 %v3114_v55, %v2451_v56  ;;  %v2657_v60 = vld [vmem:[%s4583_s0 + $0x210] sm:$0xf]  ;;  %v3167_v61 = vld [vmem:[%s4583_s0 + $0x214] sm:$0xf0]  ;;  %v2442_v62 = vor.u32 %v3113_v59, %v2441_v58  ;;  %v3166_v0 = vld [vmem:[%s4583_s0 + $0x214] sm:$0xf] }
  0x15   :  { %v2658_v63 = vor.u32 %v3167_v61, %v2657_v60  ;;  %v2659_v1 = vld [vmem:[%s4583_s0 + $0x218] sm:$0xf0]  ;;  %v3116_v3 = vld [vmem:[%s4583_s0 + $0x84] sm:$0xf]  ;;  %v2459_v4 = vld [vmem:[%s4583_s0 + $0x88] sm:$0xf0] }
  0x16   :  { %824 = vmatpush.bf16.msra.mxu0 %v3202_v13  ;;  %v2662_v2 = vor.u32 %v3166_v0, %v2659_v1  ;;  %v2462_v5 = vor.u32 %v3116_v3, %v2459_v4  ;;  %v2449_v7 = vld [vmem:[%s4583_s0 + $0x70] sm:$0xf]  ;;  %v3115_v8 = vld [vmem:[%s4583_s0 + $0x74] sm:$0xf0]  ;;  %v2665_v9 = vld [vmem:[%s4583_s0 + $0x220] sm:$0xf] }
  0x17   :  { %3251 = vmatpush.bf16.msra.mxu3 %v3202_v13  ;;  %v3169_v10 = vld [vmem:[%s4583_s0 + $0x224] sm:$0xf0]  ;;  %v2450_v11 = vor.u32 %v3115_v8, %v2449_v7  ;;  %v3168_v13 = vld [vmem:[%s4583_s0 + $0x224] sm:$0xf]  ;;  %v3527_v23 = vld [vmem:[%s4585_s2] ss:$0 sm:$0xff] }
  0x18   :  { %2860 = vmatmul.msk.bf16.vlgmr.msra.gmra.mxu2 %vm664_vm1, %v2662_v2  ;;  %v2666_v12 = vor.u32 %v3169_v10, %v2665_v9  ;;  %v3117_v22 = vld [vmem:[%s4583_s0 + $0x84] sm:$0xf0]  ;;  %v3171_v25 = vld [vmem:[%s4583_s0 + $0x234] sm:$0xf0]  ;;  %v3170_v29 = vld [vmem:[%s4583_s0 + $0x234] sm:$0xf] }
  0x19   :  { %v2675_v31 = vld [vmem:[%s4583_s0 + $0x238] sm:$0xf0]  ;;  %v2475_v37 = vld [vmem:[%s4583_s0 + $0xa8] sm:$0xf0]  ;;  %v3119_v43 = vld [vmem:[%s4583_s0 + $0x94] sm:$0xf0] }
  0x1a   :  { %825 = vmatpush.bf16.msra.mxu0 %v3201_v14  ;;  %v2678_v32 = vor.u32 %v3170_v29, %v2675_v31  ;;  %v2681_v44 = vld [vmem:[%s4583_s0 + $0x240] sm:$0xf]  ;;  %v3172_v49 = vld [vmem:[%s4583_s0 + $0x244] sm:$0xf]  ;;  %v2683_v51 = vld [vmem:[%s4583_s0 + $0x248] sm:$0xf0] }
  0x1b   :  { %3252 = vmatpush.bf16.msra.mxu3 %v3201_v14  ;;  %v2667_v14 = vld [vmem:[%s4583_s0 + $0x228] sm:$0xf0]  ;;  %v2686_v52 = vor.u32 %v3172_v49, %v2683_v51  ;;  %v3122_v56 = vld [vmem:[%s4583_s0 + $0xb4] sm:$0xf]  ;;  %v2689_v0 = vld [vmem:[%s4583_s0 + $0x250] sm:$0xf] }
  0x1c   :  { %v2670_v15 = vor.u32 %v3168_v13, %v2667_v14  ;;  %v3175_v1 = vld [vmem:[%s4583_s0 + $0x254] sm:$0xf0]  ;;  %v2691_v7 = vld [vmem:[%s4583_s0 + $0x258] sm:$0xf0]  ;;  %v2491_v13 = vld [vmem:[%s4583_s0 + $0xc8] sm:$0xf0] }
  0x1d   :  { %v2690_v3 = vor.u32 %v3175_v1, %v2689_v0  ;;  %v3127_v0 = vld [vmem:[%s4583_s0 + $0xd4] sm:$0xf0]  ;;  %v2713_v1 = vld [vmem:[%s4583_s0 + $0x280] sm:$0xf]  ;;  %vm2352_vm6 = vcmask 687104   ;;  %s3288_s21 = smov [#allocation2]  }
  0x1e   :  { %2828 = vmatmul.msk.bf16.gmra.mxu1 %vm664_vm1, %v2406_v17  ;;  %826 = vmatpush.bf16.msra.mxu0 %v3200_v18  ;;  %v3118_v17 = vld [vmem:[%s4583_s0 + $0x94] sm:$0xf]  ;;  %s2380_s1 = sshll.u32 %s3288_s21, 4  ;;  %s2382_s23 = sshll.u32 %s4592_s9, 4  ;;  %vm2373_vm7 = vcmask 74752   ;;  %s2381_s1 = int_to_ptr.vmem [resolvable:$true] %s2380_s1  ;;  %s2383_s23 = int_to_ptr.hbm [resolvable:$true] %s2382_s23 }
  0x1f   :  { %3253 = vmatpush.bf16.msra.mxu3 %v3200_v18  ;;  %v2467_v18 = vld [vmem:[%s4583_s0 + $0x98] sm:$0xf0] }
  0x20   :  { %v2470_v19 = vor.u32 %v3118_v17, %v2467_v18  ;;  %v2481_v18 = vld [vmem:[%s4583_s0 + $0xb0] sm:$0xf] }
  0x21   :  { %827 = vmatmul.bf16.vlgmr.msra.gmra.mxu0 %v2394_v21  ;;  %v2457_v21 = vld [vmem:[%s4583_s0 + $0x80] sm:$0xf] }
  0x22   :  { %987 = vmatmul.bf16.vlgmr.msra.gmra.mxu3 %v2650_v54  ;;  %v2458_v26 = vor.u32 %v3117_v22, %v2457_v21  ;;  %v3177_v21 = vld [vmem:[%s4583_s0 + $0x264] sm:$0xf0] }
  0x28   :  { %2861 = vmatmul.msk.bf16.gmra.mxu2 %vm664_vm1, %v2670_v15 }
  0x2e   :  { %2829 = vmatmul.msk.bf16.gmra.mxu1 %vm664_vm1, %v2414_v24  ;;  %v2673_v24 = vld [vmem:[%s4583_s0 + $0x230] sm:$0xf] }
  0x31   :  { %832 = vmatmul.bf16.gmra.mxu0 %v2402_v27  ;;  %v2674_v27 = vor.u32 %v3171_v25, %v2673_v24 }
  0x32   :  { %992 = vmatmul.bf16.gmra.mxu3 %v2658_v63  ;;  %v3121_v63 = vld [vmem:[%s4583_s0 + $0xa4] sm:$0xf0] }
  0x38   :  { %2862 = vmatmul.msk.bf16.gmra.mxu2 %vm664_vm1, %v2678_v32 }
  0x3e   :  { %2830 = vmatmul.msk.bf16.gmra.mxu1 %vm664_vm1, %v2422_v30 }
  0x41   :  { %837 = vmatmul.bf16.gmra.mxu0 %v2410_v33 }
  0x42   :  { %997 = vmatmul.bf16.gmra.mxu3 %v2666_v12  ;;  %v3124_v12 = vld [vmem:[%s4583_s0 + $0xc4] sm:$0xf] }
  0x48   :  { %2863 = vmatmul.msk.bf16.gmra.mxu2 %vm664_vm1, %v2686_v52 }
  0x4e   :  { %2831 = vmatmul.msk.bf16.gmra.mxu1 %vm664_vm1, %v2430_v36  ;;  %v3120_v36 = vld [vmem:[%s4583_s0 + $0xa4] sm:$0xf] }
  0x4f   :  { %v2478_v40 = vor.u32 %v3120_v36, %v2475_v37 }
  0x51   :  { %842 = vmatmul.bf16.gmra.mxu0 %v2418_v39 }
  0x52   :  { %1002 = vmatmul.bf16.gmra.mxu3 %v2674_v27 }
  0x5e   :  { %2832 = vmatmul.msk.bf16.gmra.mxu1 %vm664_vm1, %v2438_v42  ;;  %v2465_v42 = vld [vmem:[%s4583_s0 + $0x90] sm:$0xf] }
  0x5f   :  { %v2466_v46 = vor.u32 %v3119_v43, %v2465_v42  ;;  %v3125_v42 = vld [vmem:[%s4583_s0 + $0xc4] sm:$0xf0]  ;;  %v2705_v43 = vld [vmem:[%s4583_s0 + $0x270] sm:$0xf] }
  0x61   :  { %847 = vmatmul.bf16.gmra.mxu0 %v2426_v45  ;;  %v3173_v45 = vld [vmem:[%s4583_s0 + $0x244] sm:$0xf0] }
  0x62   :  { %v2682_v47 = vor.u32 %v3173_v45, %v2681_v44  ;;  %v3179_v44 = vld [vmem:[%s4583_s0 + $0x274] sm:$0xf0] }
  0x64   :  { %1007 = vmatmul.bf16.gmra.mxu3 %v2682_v47 }
  0x6e   :  { %2833 = vmatmul.msk.bf16.gmra.mxu1 %vm664_vm1, %v2446_v48 }
  0x71   :  { %852 = vmatmul.bf16.gmra.mxu0 %v2434_v53 }
  0x74   :  { %1012 = vmatmul.bf16.gmra.mxu3 %v2690_v3 }
  0x7e   :  { %2834 = vmatmul.msk.bf16.gmra.mxu1 %vm664_vm1, %v2454_v57  ;;  %v2483_v57 = vld [vmem:[%s4583_s0 + $0xb8] sm:$0xf0] }
  0x7f   :  { %v2486_v60 = vor.u32 %v3122_v56, %v2483_v57  ;;  %v3128_v56 = vld [vmem:[%s4583_s0 + $0xe4] sm:$0xf]  ;;  %v2507_v57 = vld [vmem:[%s4583_s0 + $0xe8] sm:$0xf0] }
  0x81   :  { %857 = vmatmul.bf16.gmra.mxu0 %v2442_v62  ;;  %v2473_v62 = vld [vmem:[%s4583_s0 + $0xa0] sm:$0xf] }
  0x82   :  { %v2474_v2 = vor.u32 %v3121_v63, %v2473_v62  ;;  %v2497_v63 = vld [vmem:[%s4583_s0 + $0xd0] sm:$0xf] }
  0x83   :  { %v2498_v3 = vor.u32 %v3127_v0, %v2497_v63 }
  0x8b   :  { %v1087_v6 = vpop.f32.mrf.mxu1 }
  0x8e   :  { %2835 = vmatmul.msk.bf16.gmra.mxu1 %vm664_vm1, %v2462_v5  ;;  %v3174_v5 = vld [vmem:[%s4583_s0 + $0x254] sm:$0xf] }
  0x8f   :  { %v2694_v8 = vor.u32 %v3174_v5, %v2691_v7 }
  0x91   :  { %862 = vmatmul.bf16.gmra.mxu0 %v2450_v11  ;;  %2864 = vmatmul.msk.bf16.gmra.mxu2 %vm664_vm1, %v2694_v8  ;;  %v2715_v8 = vld [vmem:[%s4583_s0 + $0x288] sm:$0xf0] }
  0x93   :  { %v1089_v16 = vpop.f32.mrf.mxu1 }
  0x9b   :  { %v1092_v20 = vpop.f32.mrf.mxu1 }
  0x9e   :  { %2836 = vmatmul.msk.bf16.gmra.mxu1 %vm664_vm1, %v2470_v19  ;;  %v828_v28 = vpop.f32.mrf.mxu0  ;;  %v3123_v19 = vld [vmem:[%s4583_s0 + $0xb4] sm:$0xf0] }
  0x9f   :  { %v829_v30 = vadd.f32 %v3527_v23, %v828_v28  ;;  %v2482_v22 = vor.u32 %v3123_v19, %v2481_v18  ;;  %v2699_v28 = vld [vmem:[%s4583_s0 + $0x268] sm:$0xf0] }
  0xa1   :  { %v3543_v33 = vadd.f32 %v1087_v6, %v829_v30  ;;  %867 = vmatmul.bf16.gmra.mxu0 %v2458_v26  ;;  %v3176_v26 = vld [vmem:[%s4583_s0 + $0x264] sm:$0xf] }
  0xa2   :  { %v2702_v29 = vor.u32 %v3176_v26, %v2699_v28  ;;  %v2721_v26 = vld [vmem:[%s4583_s0 + $0x290] sm:$0xf] }
  0xa3   :  { %v1094_v34 = vpop.f32.mrf.mxu1 }
  0xa4   :  { %2865 = vmatmul.msk.bf16.gmra.mxu2 %vm664_vm1, %v2702_v29 }
  0xa6   :  { %v830_v35 = vpop.f32.mrf.mxu0 }
  0xa7   :  { %v831_v38 = vadd.f32 %v3527_v23, %v830_v35  ;;  %v2499_v35 = vld [vmem:[%s4583_s0 + $0xd8] sm:$0xf0] }
  0xa9   :  { %v3553_v39 = vadd.f32 %v1089_v16, %v831_v38  ;;  %v2494_v16 = vor.u32 %v3124_v12, %v2491_v13  ;;  %v3706_v13 = vpop.f32.mrf.mxu3 }
  0xaa   :  { %4593 = vst [vmem:[#allocation5_spill] sm:$0xff] %v3706_v13  ;;  %v2787_v13 = vld [vmem:[%s4583_s0 + $0x318] sm:$0xf0] }
  0xab   :  { %v1097_v41 = vpop.f32.mrf.mxu1 }
  0xae   :  { %2837 = vmatmul.msk.bf16.gmra.mxu1 %vm664_vm1, %v2478_v40  ;;  %v833_v48 = vpop.f32.mrf.mxu0 }
  0xaf   :  { %v834_v50 = vadd.f32 %v3527_v23, %v833_v48  ;;  %v3178_v48 = vld [vmem:[%s4583_s0 + $0x274] sm:$0xf] }
  0xb1   :  { %v3575_v53 = vadd.f32 %v1092_v20, %v834_v50  ;;  %872 = vmatmul.bf16.gmra.mxu0 %v2466_v46  ;;  %v2697_v20 = vld [vmem:[%s4583_s0 + $0x260] sm:$0xf]  ;;  %v2706_v46 = vor.u32 %v3179_v44, %v2705_v43  ;;  %v2707_v50 = vld [vmem:[%s4583_s0 + $0x278] sm:$0xf0]  ;;  %v1252_v43 = vpop.f32.mrf.mxu2 }
  0xb2   :  { %v2698_v24 = vor.u32 %v3177_v21, %v2697_v20  ;;  %v2710_v51 = vor.u32 %v3178_v48, %v2707_v50 }
  0xb3   :  { %v1099_v54 = vpop.f32.mrf.mxu1 }
  0xb4   :  { %1017 = vmatmul.bf16.gmra.mxu3 %v2698_v24  ;;  %2866 = vmatmul.msk.bf16.gmra.mxu2 %vm664_vm1, %v2710_v51  ;;  %v3129_v24 = vld [vmem:[%s4583_s0 + $0xe4] sm:$0xf0] }
  0xb6   :  { %v835_v55 = vpop.f32.mrf.mxu0 }
  0xb7   :  { %v836_v58 = vadd.f32 %v3527_v23, %v835_v55 }
  0xb9   :  { %v3585_v59 = vadd.f32 %v1094_v34, %v836_v58  ;;  %v3126_v34 = vld [vmem:[%s4583_s0 + $0xd4] sm:$0xf]  ;;  %v1254_v63 = vpop.f32.mrf.mxu2 }
  0xba   :  { %v2502_v38 = vor.u32 %v3126_v34, %v2499_v35  ;;  %v2723_v35 = vld [vmem:[%s4583_s0 + $0x298] sm:$0xf0] }
  0xbb   :  { %v1102_v61 = vpop.f32.mrf.mxu1 }
  0xbe   :  { %2838 = vmatmul.msk.bf16.gmra.mxu1 %vm664_vm1, %v2486_v60  ;;  %v838_v4 = vpop.f32.mrf.mxu0 }
  0xbf   :  { %v839_v6 = vadd.f32 %v3527_v23, %v838_v4 }
  0xc1   :  { %v3607_v9 = vadd.f32 %v1097_v41, %v839_v6  ;;  %877 = vmatmul.bf16.gmra.mxu0 %v2474_v2  ;;  %v2489_v41 = vld [vmem:[%s4583_s0 + $0xc0] sm:$0xf]  ;;  %v3181_v2 = vld [vmem:[%s4583_s0 + $0x284] sm:$0xf0]  ;;  %v3180_v6 = vld [vmem:[%s4583_s0 + $0x284] sm:$0xf] }
  0xc2   :  { %v2490_v45 = vor.u32 %v3125_v42, %v2489_v41  ;;  %v2714_v4 = vor.u32 %v3181_v2, %v2713_v1 }
  0xc3   :  { %v1104_v10 = vpop.f32.mrf.mxu1 }
  0xc4   :  { %1022 = vmatmul.bf16.gmra.mxu3 %v2706_v46  ;;  %v2523_v46 = vld [vmem:[%s4583_s0 + $0x108] sm:$0xf0] }
  0xc6   :  { %v840_v11 = vpop.f32.mrf.mxu0 }
  0xc7   :  { %v841_v14 = vadd.f32 %v3527_v23, %v840_v11 }
  0xc9   :  { %v3617_v15 = vadd.f32 %v1099_v54, %v841_v14 }
  0xcb   :  { %v1107_v17 = vpop.f32.mrf.mxu1 }
  0xce   :  { %2839 = vmatmul.msk.bf16.gmra.mxu1 %vm664_vm1, %v2494_v16  ;;  %v843_v25 = vpop.f32.mrf.mxu0  ;;  %v3130_v16 = vld [vmem:[%s4583_s0 + $0xf4] sm:$0xf] }
  0xcf   :  { %v844_v27 = vadd.f32 %v3527_v23, %v843_v25  ;;  %v3723_v25 = vpop.f32.mrf.mxu3 }
  0xd0   :  { %4594 = vst [vmem:[#allocation6_spill] sm:$0xff] %v3723_v25 }
  0xd1   :  { %v3639_v30 = vadd.f32 %v1102_v61, %v844_v27  ;;  %882 = vmatmul.bf16.gmra.mxu0 %v2482_v22  ;;  %v2510_v61 = vor.u32 %v3128_v56, %v2507_v57  ;;  %v2505_v22 = vld [vmem:[%s4583_s0 + $0xe0] sm:$0xf]  ;;  %v3183_v27 = vld [vmem:[%s4583_s0 + $0x294] sm:$0xf0] }
  0xd2   :  { %v2506_v28 = vor.u32 %v3129_v24, %v2505_v22  ;;  %v2722_v29 = vor.u32 %v3183_v27, %v2721_v26 }
  0xd3   :  { %v1109_v31 = vpop.f32.mrf.mxu1 }
  0xd4   :  { %1027 = vmatmul.bf16.gmra.mxu3 %v2714_v4 }
  0xd6   :  { %v845_v32 = vpop.f32.mrf.mxu0 }
  0xd7   :  { %v846_v36 = vadd.f32 %v3527_v23, %v845_v32  ;;  %v3182_v32 = vld [vmem:[%s4583_s0 + $0x294] sm:$0xf]  ;;  %v993_v41 = vpop.f32.mrf.mxu3 }
  0xd8   :  { %v994_v42 = vadd.f32 %v3527_v23, %v993_v41 }
  0xd9   :  { %v3649_v37 = vadd.f32 %v1104_v10, %v846_v36  ;;  %v2718_v10 = vor.u32 %v3180_v6, %v2715_v8  ;;  %v2726_v36 = vor.u32 %v3182_v32, %v2723_v35  ;;  %v2737_v35 = vld [vmem:[%s4583_s0 + $0x2b0] sm:$0xf] }
  0xdb   :  { %v1112_v40 = vpop.f32.mrf.mxu1  ;;  %2867 = vmatmul.msk.bf16.gmra.mxu2 %vm664_vm1, %v2718_v10 }
  0xde   :  { %2840 = vmatmul.msk.bf16.gmra.mxu1 %vm664_vm1, %v2502_v38  ;;  %v848_v47 = vpop.f32.mrf.mxu0 }
  0xdf   :  { %v849_v49 = vadd.f32 %v3527_v23, %v848_v47  ;;  %v3749_v47 = vadd.f32 %v1252_v43, %v994_v42  ;;  %v995_v56 = vpop.f32.mrf.mxu3 }
  0xe0   :  { %v996_v57 = vadd.f32 %v3527_v23, %v995_v56 }
  0xe1   :  { %v3671_v52 = vadd.f32 %v1107_v17, %v849_v49  ;;  %887 = vmatmul.bf16.gmra.mxu0 %v2490_v45  ;;  %v2515_v17 = vld [vmem:[%s4583_s0 + $0xf8] sm:$0xf0]  ;;  %v3132_v45 = vld [vmem:[%s4583_s0 + $0x104] sm:$0xf] }
  0xe2   :  { %v2518_v20 = vor.u32 %v3130_v16, %v2515_v17  ;;  %v2526_v50 = vor.u32 %v3132_v45, %v2523_v46  ;;  %v3768_v2 = vadd.f32 %v1254_v63, %v996_v57  ;;  %v3210_v16 = vld [vmem:[%s4586_s3 + $0x8] sm:$0xff]  ;;  %v1257_v17 = vpop.f32.mrf.mxu2  ;;  %v3186_v45 = vld [vmem:[%s4583_s0 + $0x2b4] sm:$0xf] }
  0xe3   :  { %v1114_v54 = vpop.f32.mrf.mxu1  ;;  %1561 = vmatpush.bf16.msrb.mxu2 %v3210_v16  ;;  %v2539_v63 = vld [vmem:[%s4583_s0 + $0x128] sm:$0xf0] }
  0xe4   :  { %1032 = vmatmul.bf16.gmra.mxu3 %v2722_v29  ;;  %v2521_v29 = vld [vmem:[%s4583_s0 + $0x100] sm:$0xf] }
  0xe6   :  { %v850_v55 = vpop.f32.mrf.mxu0 }
  0xe7   :  { %v851_v58 = vadd.f32 %v3527_v23, %v850_v55  ;;  %v3131_v55 = vld [vmem:[%s4583_s0 + $0xf4] sm:$0xf0]  ;;  %v998_v10 = vpop.f32.mrf.mxu3 }
  0xe9   :  { %v3681_v60 = vadd.f32 %v1109_v31, %v851_v58  ;;  %v2729_v58 = vld [vmem:[%s4583_s0 + $0x2a0] sm:$0xf] }
  0xea   :  { %v1259_v41 = vpop.f32.mrf.mxu2 }
  0xeb   :  { %v1117_v62 = vpop.f32.mrf.mxu1  ;;  %2868 = vmatmul.msk.bf16.gmra.mxu2 %vm664_vm1, %v2726_v36  ;;  %v3187_v36 = vld [vmem:[%s4583_s0 + $0x2b4] sm:$0xf0] }
  0xec   :  { %v2738_v42 = vor.u32 %v3187_v36, %v2737_v35 }
  0xee   :  { %2841 = vmatmul.msk.bf16.gmra.mxu1 %vm664_vm1, %v2510_v61  ;;  %v853_v5 = vpop.f32.mrf.mxu0  ;;  %v3185_v61 = vld [vmem:[%s4583_s0 + $0x2a4] sm:$0xf0] }
  0xef   :  { %v854_v7 = vadd.f32 %v3527_v23, %v853_v5  ;;  %v2730_v0 = vor.u32 %v3185_v61, %v2729_v58  ;;  %v2731_v5 = vld [vmem:[%s4583_s0 + $0x2a8] sm:$0xf0]  ;;  %v1000_v32 = vpop.f32.mrf.mxu3 }
  0xf1   :  { %v3703_v11 = vadd.f32 %v1112_v40, %v854_v7  ;;  %892 = vmatmul.bf16.gmra.mxu0 %v2498_v3  ;;  %v3184_v3 = vld [vmem:[%s4583_s0 + $0x2a4] sm:$0xf] }
  0xf2   :  { %v2734_v6 = vor.u32 %v3184_v3, %v2731_v5  ;;  %v1262_v58 = vpop.f32.mrf.mxu2  ;;  %v2529_v5 = vld [vmem:[%s4583_s0 + $0x110] sm:$0xf] }
  0xf3   :  { %v1119_v12 = vpop.f32.mrf.mxu1 }
  0xf4   :  { %1037 = vmatmul.bf16.gmra.mxu3 %v2730_v0 }
  0xf6   :  { %v855_v14 = vpop.f32.mrf.mxu0 }
  0xf7   :  { %v856_v18 = vadd.f32 %v3527_v23, %v855_v14  ;;  %v3209_v14 = vld [vmem:[%s4586_s3] sm:$0xff]  ;;  %v1003_v56 = vpop.f32.mrf.mxu3 }
  0xf8   :  { %1583 = vmatpush.bf16.msrb.mxu3 %v3209_v14  ;;  %v1004_v57 = vadd.f32 %v3527_v23, %v1003_v56  ;;  %v2745_v14 = vld [vmem:[%s4583_s0 + $0x2c0] sm:$0xf] }
  0xf9   :  { %v3715_v19 = vadd.f32 %v1114_v54, %v856_v18  ;;  %v2513_v54 = vld [vmem:[%s4583_s0 + $0xf0] sm:$0xf]  ;;  %v2537_v56 = vld [vmem:[%s4583_s0 + $0x120] sm:$0xf] }
  0xfa   :  { %v3831_v0 = vadd.f32 %v1262_v58, %v1004_v57  ;;  %v3137_v57 = vld [vmem:[%s4583_s0 + $0x124] sm:$0xf0] }
  0xfb   :  { %v1122_v21 = vpop.f32.mrf.mxu1  ;;  %2869 = vmatmul.msk.bf16.gmra.mxu2 %vm664_vm1, %v2734_v6  ;;  %v3135_v6 = vld [vmem:[%s4583_s0 + $0x114] sm:$0xf0] }
  0xfc   :  { %v2530_v16 = vor.u32 %v3135_v6, %v2529_v5 }
  0xfe   :  { %2842 = vmatmul.msk.bf16.gmra.mxu1 %vm664_vm1, %v2518_v20  ;;  %v858_v31 = vpop.f32.mrf.mxu0  ;;  %v3134_v20 = vld [vmem:[%s4583_s0 + $0x114] sm:$0xf] }
  0xff   :  { %v859_v34 = vadd.f32 %v3527_v23, %v858_v31  ;;  %v3133_v31 = vld [vmem:[%s4583_s0 + $0x104] sm:$0xf0] }
 0x101   :  { %v3739_v38 = vadd.f32 %v1117_v62, %v859_v34  ;;  %897 = vmatmul.bf16.gmra.mxu0 %v2506_v28  ;;  %v2514_v62 = vor.u32 %v3131_v55, %v2513_v54  ;;  %v1001_v34 = vadd.f32 %v3527_v23, %v1000_v32 }
 0x103   :  { %v1124_v40 = vpop.f32.mrf.mxu1 }
 0x104   :  { %1042 = vmatmul.bf16.gmra.mxu3 %v2738_v42  ;;  %v3138_v42 = vld [vmem:[%s4583_s0 + $0x134] sm:$0xf] }
 0x106   :  { %v860_v44 = vpop.f32.mrf.mxu0 }
 0x107   :  { %v861_v48 = vadd.f32 %v3527_v23, %v860_v44  ;;  %v3812_v44 = vadd.f32 %v1259_v41, %v1001_v34 }
 0x109   :  { %v3752_v49 = vadd.f32 %v1119_v12, %v861_v48  ;;  %v999_v12 = vadd.f32 %v3527_v23, %v998_v10  ;;  %v2739_v48 = vld [vmem:[%s4583_s0 + $0x2b8] sm:$0xf0]  ;;  %v1005_v10 = vpop.f32.mrf.mxu3 }
 0x10b   :  { %v1127_v51 = vpop.f32.mrf.mxu1  ;;  %v3793_v22 = vadd.f32 %v1257_v17, %v999_v12  ;;  %v1006_v12 = vadd.f32 %v3527_v23, %v1005_v10  ;;  %v1264_v17 = vpop.f32.mrf.mxu2  ;;  %v3190_v10 = vld [vmem:[%s4583_s0 + $0x2d4] sm:$0xf] }
 0x10e   :  { %2843 = vmatmul.msk.bf16.gmra.mxu1 %vm664_vm1, %v2526_v50  ;;  %v863_v1 = vpop.f32.mrf.mxu0  ;;  %v2742_v50 = vor.u32 %v3186_v45, %v2739_v48 }
 0x10f   :  { %v864_v4 = vadd.f32 %v3527_v23, %v863_v1 }
 0x110   :  { %2870 = vmatmul.msk.bf16.gmra.mxu2 %vm664_vm1, %v2742_v50 }
 0x111   :  { %v3777_v7 = vadd.f32 %v1122_v21, %v864_v4  ;;  %902 = vmatmul.bf16.gmra.mxu0 %v2514_v62  ;;  %v2531_v21 = vld [vmem:[%s4583_s0 + $0x118] sm:$0xf0]  ;;  %v3136_v62 = vld [vmem:[%s4583_s0 + $0x124] sm:$0xf]  ;;  %v1008_v35 = vpop.f32.mrf.mxu3 }
 0x112   :  { %v2534_v27 = vor.u32 %v3134_v20, %v2531_v21  ;;  %v2542_v3 = vor.u32 %v3136_v62, %v2539_v63  ;;  %v3850_v21 = vadd.f32 %v1264_v17, %v1006_v12  ;;  %v1009_v36 = vadd.f32 %v3527_v23, %v1008_v35  ;;  %v2753_v62 = vld [vmem:[%s4583_s0 + $0x2d0] sm:$0xf] }
 0x113   :  { %v1129_v8 = vpop.f32.mrf.mxu1  ;;  %v2538_v63 = vor.u32 %v3137_v57, %v2537_v56 }
 0x116   :  { %v865_v18 = vpop.f32.mrf.mxu0 }
 0x117   :  { %v866_v24 = vadd.f32 %v3527_v23, %v865_v18 }
 0x119   :  { %v3796_v26 = vadd.f32 %v1124_v40, %v866_v24  ;;  %v2522_v40 = vor.u32 %v3133_v31, %v2521_v29  ;;  %v3188_v24 = vld [vmem:[%s4583_s0 + $0x2c4] sm:$0xf]  ;;  %v2747_v29 = vld [vmem:[%s4583_s0 + $0x2c8] sm:$0xf0]  ;;  %v1010_v58 = vpop.f32.mrf.mxu3 }
 0x11a   :  { %v2750_v31 = vor.u32 %v3188_v24, %v2747_v29  ;;  %v3140_v29 = vld [vmem:[%s4583_s0 + $0x144] sm:$0xf] }
 0x11b   :  { %v1132_v28 = vpop.f32.mrf.mxu1 }
 0x11e   :  { %2844 = vmatmul.msk.bf16.gmra.mxu1 %vm664_vm1, %v2534_v27  ;;  %v868_v43 = vpop.f32.mrf.mxu0 }
 0x11f   :  { %v869_v46 = vadd.f32 %v3527_v23, %v868_v43  ;;  %v2547_v43 = vld [vmem:[%s4583_s0 + $0x138] sm:$0xf0] }
 0x120   :  { %2871 = vmatmul.msk.bf16.gmra.mxu2 %vm664_vm1, %v2750_v31  ;;  %v2550_v48 = vor.u32 %v3138_v42, %v2547_v43  ;;  %v2555_v31 = vld [vmem:[%s4583_s0 + $0x148] sm:$0xf0]  ;;  %v2545_v42 = vld [vmem:[%s4583_s0 + $0x130] sm:$0xf]  ;;  %v3139_v43 = vld [vmem:[%s4583_s0 + $0x134] sm:$0xf0] }
 0x121   :  { %v3821_v54 = vadd.f32 %v1127_v51, %v869_v46  ;;  %907 = vmatmul.bf16.gmra.mxu0 %v2522_v40  ;;  %v1267_v40 = vpop.f32.mrf.mxu2  ;;  %v2546_v56 = vor.u32 %v3139_v43, %v2545_v42  ;;  %v2769_v43 = vld [vmem:[%s4583_s0 + $0x2f0] sm:$0xf] }
 0x122   :  { %v3869_v45 = vadd.f32 %v1267_v40, %v1009_v36  ;;  %v2558_v40 = vor.u32 %v3140_v29, %v2555_v31 }
 0x123   :  { %v1134_v55 = vpop.f32.mrf.mxu1 }
 0x126   :  { %v870_v61 = vpop.f32.mrf.mxu0 }
 0x127   :  { %v871_v51 = vadd.f32 %v3527_v23, %v870_v61  ;;  %v1011_v61 = vadd.f32 %v3527_v23, %v1010_v58 }
 0x129   :  { %v3834_v1 = vadd.f32 %v1129_v8, %v871_v51  ;;  %v3189_v8 = vld [vmem:[%s4583_s0 + $0x2c4] sm:$0xf0]  ;;  %v1269_v51 = vpop.f32.mrf.mxu2 }
 0x12a   :  { %v2746_v18 = vor.u32 %v3189_v8, %v2745_v14  ;;  %v3888_v6 = vadd.f32 %v1269_v51, %v1011_v61  ;;  %v2755_v14 = vld [vmem:[%s4583_s0 + $0x2d8] sm:$0xf0] }
 0x12b   :  { %v1137_v4 = vpop.f32.mrf.mxu1  ;;  %v2758_v8 = vor.u32 %v3190_v10, %v2755_v14 }
 0x12c   :  { %1047 = vmatmul.bf16.gmra.mxu3 %v2746_v18  ;;  %v1013_v18 = vpop.f32.mrf.mxu3 }
 0x12e   :  { %2845 = vmatmul.msk.bf16.gmra.mxu1 %vm664_vm1, %v2542_v3  ;;  %v873_v20 = vpop.f32.mrf.mxu0 }
 0x12f   :  { %v874_v27 = vadd.f32 %v3527_v23, %v873_v20  ;;  %v1014_v20 = vadd.f32 %v3527_v23, %v1013_v18 }
 0x130   :  { %2872 = vmatmul.msk.bf16.gmra.mxu2 %vm664_vm1, %v2758_v8 }
 0x131   :  { %v3859_v32 = vadd.f32 %v1132_v28, %v874_v27  ;;  %912 = vmatmul.bf16.gmra.mxu0 %v2530_v16  ;;  %v1272_v24 = vpop.f32.mrf.mxu2 }
 0x132   :  { %v3907_v35 = vadd.f32 %v1272_v24, %v1014_v20  ;;  %v3142_v20 = vld [vmem:[%s4583_s0 + $0x154] sm:$0xf]  ;;  %v2563_v24 = vld [vmem:[%s4583_s0 + $0x158] sm:$0xf0] }
 0x133   :  { %v1139_v34 = vpop.f32.mrf.mxu1  ;;  %v2566_v29 = vor.u32 %v3142_v20, %v2563_v24  ;;  %v3144_v20 = vld [vmem:[%s4583_s0 + $0x164] sm:$0xf]  ;;  %v2571_v24 = vld [vmem:[%s4583_s0 + $0x168] sm:$0xf0] }
 0x136   :  { %v875_v41 = vpop.f32.mrf.mxu0 }
 0x137   :  { %v876_v28 = vadd.f32 %v3527_v23, %v875_v41 }
 0x139   :  { %v3872_v46 = vadd.f32 %v1134_v55, %v876_v28  ;;  %v3191_v55 = vld [vmem:[%s4583_s0 + $0x2d4] sm:$0xf0]  ;;  %v1015_v28 = vpop.f32.mrf.mxu3  ;;  %v1274_v58 = vpop.f32.mrf.mxu2 }
 0x13a   :  { %v2754_v3 = vor.u32 %v3191_v55, %v2753_v62  ;;  %v1016_v57 = vadd.f32 %v3527_v23, %v1015_v28  ;;  %v3192_v55 = vld [vmem:[%s4583_s0 + $0x2e4] sm:$0xf] }
 0x13b   :  { %v1142_v50 = vpop.f32.mrf.mxu1 }
 0x13c   :  { %1052 = vmatmul.bf16.gmra.mxu3 %v2754_v3  ;;  %v3930_v51 = vadd.f32 %v1274_v58, %v1016_v57  ;;  %v2763_v3 = vld [vmem:[%s4583_s0 + $0x2e8] sm:$0xf0]  ;;  %v3194_v57 = vld [vmem:[%s4583_s0 + $0x2f4] sm:$0xf] }
 0x13e   :  { %2846 = vmatmul.msk.bf16.gmra.mxu1 %vm664_vm1, %v2550_v48  ;;  %v878_v5 = vpop.f32.mrf.mxu0  ;;  %v2761_v48 = vld [vmem:[%s4583_s0 + $0x2e0] sm:$0xf] }
 0x13f   :  { %v879_v12 = vadd.f32 %v3527_v23, %v878_v5  ;;  %v2766_v5 = vor.u32 %v3192_v55, %v2763_v3 }
 0x141   :  { %v3897_v16 = vadd.f32 %v1137_v4, %v879_v12  ;;  %917 = vmatmul.bf16.gmra.mxu0 %v2538_v63  ;;  %2873 = vmatmul.msk.bf16.gmra.mxu2 %vm664_vm1, %v2766_v5  ;;  %v3938_v14 = vpop.f32.mrf.mxu3  ;;  %v3940_v8 = vpop.f32.mrf.mxu2 }
 0x143   :  { %v1144_v17 = vpop.f32.mrf.mxu1 }
 0x146   :  { %v880_v27 = vpop.f32.mrf.mxu0 }
 0x147   :  { %v881_v4 = vadd.f32 %v3527_v23, %v880_v27 }
 0x149   :  { %v3910_v36 = vadd.f32 %v1139_v34, %v881_v4  ;;  %v3193_v34 = vld [vmem:[%s4583_s0 + $0x2e4] sm:$0xf0]  ;;  %v2553_v4 = vld [vmem:[%s4583_s0 + $0x140] sm:$0xf]  ;;  %v3957_v42 = vpop.f32.mrf.mxu3 }
 0x14a   :  { %v2762_v61 = vor.u32 %v3193_v34, %v2761_v48  ;;  %v3966_v48 = vpop.f32.mrf.mxu2 }
 0x14b   :  { %v1147_v41 = vpop.f32.mrf.mxu1 }
 0x14c   :  { %1057 = vmatmul.bf16.gmra.mxu3 %v2762_v61  ;;  %v2771_v61 = vld [vmem:[%s4583_s0 + $0x2f8] sm:$0xf0] }
 0x14e   :  { %2847 = vmatmul.msk.bf16.gmra.mxu1 %vm664_vm1, %v2558_v40  ;;  %v883_v62 = vpop.f32.mrf.mxu0  ;;  %v3141_v40 = vld [vmem:[%s4583_s0 + $0x144] sm:$0xf0] }
 0x14f   :  { %v884_v63 = vadd.f32 %v3527_v23, %v883_v62  ;;  %v2554_v28 = vor.u32 %v3141_v40, %v2553_v4  ;;  %v2774_v62 = vor.u32 %v3194_v57, %v2771_v61  ;;  %v2561_v40 = vld [vmem:[%s4583_s0 + $0x150] sm:$0xf] }
 0x151   :  { %v3935_v10 = vadd.f32 %v1142_v50, %v884_v63  ;;  %922 = vmatmul.bf16.gmra.mxu0 %v2546_v56  ;;  %2874 = vmatmul.msk.bf16.gmra.mxu2 %vm664_vm1, %v2774_v62  ;;  %v3978_v3 = vpop.f32.mrf.mxu3 }
 0x152   :  { %v3980_v5 = vpop.f32.mrf.mxu2 }
 0x153   :  { %v1149_v12 = vpop.f32.mrf.mxu1 }
 0x156   :  { %v885_v18 = vpop.f32.mrf.mxu0 }
 0x157   :  { %v886_v50 = vadd.f32 %v3527_v23, %v885_v18 }
 0x159   :  { %v3949_v27 = vadd.f32 %v1144_v17, %v886_v50  ;;  %v3195_v17 = vld [vmem:[%s4583_s0 + $0x2f4] sm:$0xf0] }
 0x15a   :  { %v2770_v34 = vor.u32 %v3195_v17, %v2769_v43  ;;  %v3143_v43 = vld [vmem:[%s4583_s0 + $0x154] sm:$0xf0]  ;;  %v3995_v17 = vpop.f32.mrf.mxu3  ;;  %v4007_v61 = vpop.f32.mrf.mxu2 }
 0x15b   :  { %v1152_v31 = vpop.f32.mrf.mxu1 }
 0x15c   :  { %1062 = vmatmul.bf16.gmra.mxu3 %v2770_v34 }
 0x15e   :  { %2848 = vmatmul.msk.bf16.gmra.mxu1 %vm664_vm1, %v2566_v29  ;;  %v888_v56 = vpop.f32.mrf.mxu0  ;;  %v2574_v29 = vor.u32 %v3144_v20, %v2571_v24  ;;  %v2779_v24 = vld [vmem:[%s4583_s0 + $0x308] sm:$0xf0] }
 0x15f   :  { %v889_v58 = vadd.f32 %v3527_v23, %v888_v56  ;;  %v2777_v56 = vld [vmem:[%s4583_s0 + $0x300] sm:$0xf] }
 0x161   :  { %v3975_v55 = vadd.f32 %v1147_v41, %v889_v58  ;;  %927 = vmatmul.bf16.gmra.mxu0 %v2554_v28  ;;  %v1337_v28 = vmax.f32 %v3543_v33, 0.0  ;;  %v2562_v58 = vor.u32 %v3143_v43, %v2561_v40  ;;  %v3196_v33 = vld [vmem:[%s4583_s0 + $0x304] sm:$0xf]  ;;  %v1338_v43 = vmax.f32 %v3553_v39, 0.0  ;;  %v2569_v39 = vld [vmem:[%s4583_s0 + $0x160] sm:$0xf] }
 0x162   :  { %v4017_v40 = vpop.f32.mrf.mxu3 }
 0x163   :  { %v1154_v63 = vpop.f32.mrf.mxu1 }
 0x166   :  { %v890_v18 = vpop.f32.mrf.mxu0 }
 0x167   :  { %v891_v41 = vadd.f32 %v3527_v23, %v890_v18 }
 0x169   :  { %v1150_v50 = vadd.f32 %v1149_v12, %v891_v41  ;;  %v3197_v12 = vld [vmem:[%s4583_s0 + $0x304] sm:$0xf0]  ;;  %v2782_v41 = vor.u32 %v3196_v33, %v2779_v24 }
 0x16a   :  { %v2778_v62 = vor.u32 %v3197_v12, %v2777_v56  ;;  %v4022_v56 = vpop.f32.mrf.mxu2  ;;  %v3145_v24 = vld [vmem:[%s4583_s0 + $0x164] sm:$0xf0] }
 0x16b   :  { %v1157_v4 = vpop.f32.mrf.mxu1  ;;  %v1362_v34 = vmax.f32 %v1150_v50, 0.0  ;;  %2875 = vmatmul.msk.bf16.gmra.mxu2 %vm664_vm1, %v2782_v41  ;;  %4595 = vst [vmem:[#allocation7_spill] sm:$0xff] %v4022_v56  ;;  %v4037_v41 = vpop.f32.mrf.mxu3 }
 0x16c   :  { %1067 = vmatmul.bf16.gmra.mxu3 %v2778_v62  ;;  %v3146_v62 = vld [vmem:[%s4583_s0 + $0x174] sm:$0xf]  ;;  %4596 = vst [vmem:[#allocation8_spill] sm:$0xff] %v4037_v41 }
 0x16d   :  { %v4004_v57 = vadd.f32 %v1362_v34, %v1337_v28 }
 0x16e   :  { %2849 = vmatmul.msk.bf16.gmra.mxu1 %vm664_vm1, %v2574_v29  ;;  %v893_v18 = vpop.f32.mrf.mxu0 }
 0x16f   :  { %v894_v20 = vadd.f32 %v3527_v23, %v893_v18 }
 0x171   :  { %v1153_v50 = vadd.f32 %v1152_v31, %v894_v20  ;;  %932 = vmatmul.bf16.gmra.mxu0 %v2562_v58  ;;  %v2579_v31 = vld [vmem:[%s4583_s0 + $0x178] sm:$0xf0] }
 0x172   :  { %v2582_v33 = vor.u32 %v3146_v62, %v2579_v31  ;;  %v2570_v62 = vor.u32 %v3145_v24, %v2569_v39  ;;  %v4049_v31 = vpop.f32.mrf.mxu2  ;;  %v1340_v24 = vmax.f32 %v3585_v59, 0.0  ;;  %v2577_v59 = vld [vmem:[%s4583_s0 + $0x170] sm:$0xf] }
 0x173   :  { %v1159_v29 = vpop.f32.mrf.mxu1  ;;  %v1363_v28 = vmax.f32 %v1153_v50, 0.0  ;;  %v1339_v50 = vmax.f32 %v3575_v53, 0.0  ;;  %4597 = vst [vmem:[#allocation9_spill] sm:$0xff] %v4049_v31  ;;  %v3198_v53 = vld [vmem:[%s4583_s0 + $0x314] sm:$0xf]  ;;  %v4059_v39 = vpop.f32.mrf.mxu3 }
 0x174   :  { %4598 = vst [vmem:[#allocation10_spill] sm:$0xff] %v4059_v39 }
 0x175   :  { %v4020_v34 = vadd.f32 %v1363_v28, %v1338_v43  ;;  %v2785_v28 = vld [vmem:[%s4583_s0 + $0x310] sm:$0xf] }
 0x176   :  { %v895_v12 = vpop.f32.mrf.mxu0 }
 0x177   :  { %v896_v58 = vadd.f32 %v3527_v23, %v895_v12 }
 0x179   :  { %v1155_v18 = vadd.f32 %v1154_v63, %v896_v58  ;;  %v3199_v63 = vld [vmem:[%s4583_s0 + $0x314] sm:$0xf0] }
 0x17a   :  { %v2786_v58 = vor.u32 %v3199_v63, %v2785_v28  ;;  %v4064_v31 = vpop.f32.mrf.mxu2 }
 0x17b   :  { %v1162_v20 = vpop.f32.mrf.mxu1  ;;  %v1364_v43 = vmax.f32 %v1155_v18, 0.0  ;;  %4599 = vst [vmem:[#allocation11_spill] sm:$0xff] %v4064_v31 }
 0x17c   :  { %1072 = vmatmul.bf16.gmra.mxu3 %v2786_v58  ;;  %v3148_v58 = vld [vmem:[%s4583_s0 + $0x184] sm:$0xf] }
 0x17d   :  { %v4046_v12 = vadd.f32 %v1364_v43, %v1339_v50  ;;  %v2790_v50 = vor.u32 %v3198_v53, %v2787_v13  ;;  %v2587_v13 = vld [vmem:[%s4583_s0 + $0x188] sm:$0xf0] }
 0x17e   :  { %2850 = vmatmul.msk.bf16.gmra.mxu1 %vm664_vm1, %v2582_v33  ;;  %v898_v25 = vpop.f32.mrf.mxu0  ;;  %v2590_v53 = vor.u32 %v3148_v58, %v2587_v13 }
 0x17f   :  { %v899_v18 = vadd.f32 %v3527_v23, %v898_v25  ;;  %2876 = vmatmul.msk.bf16.gmra.mxu2 %vm664_vm1, %v2790_v50  ;;  %v3147_v50 = vld [vmem:[%s4583_s0 + $0x174] sm:$0xf0] }
 0x181   :  { %v1158_v43 = vadd.f32 %v1157_v4, %v899_v18  ;;  %937 = vmatmul.bf16.gmra.mxu0 %v2570_v62 }
 0x183   :  { %v1164_v33 = vpop.f32.mrf.mxu1  ;;  %v1365_v28 = vmax.f32 %v1158_v43, 0.0  ;;  %v4079_v43 = vpop.f32.mrf.mxu3 }
 0x184   :  { %4600 = vst [vmem:[#allocation12_spill] sm:$0xff] %v4079_v43  ;;  %v1342_v43 = vmax.f32 %v3617_v15, 0.0  ;;  %v2585_v15 = vld [vmem:[%s4583_s0 + $0x180] sm:$0xf] }
 0x185   :  { %v4062_v63 = vadd.f32 %v1365_v28, %v1340_v24  ;;  %v1341_v24 = vmax.f32 %v3607_v9, 0.0 }
 0x186   :  { %v900_v25 = vpop.f32.mrf.mxu0 }
 0x187   :  { %v901_v4 = vadd.f32 %v3527_v23, %v900_v25  ;;  %v4085_v25 = vpop.f32.mrf.mxu2 }
 0x188   :  { %4601 = vst [vmem:[#allocation13_spill] sm:$0xff] %v4085_v25 }
 0x189   :  { %v1160_v62 = vadd.f32 %v1159_v29, %v901_v4  ;;  %v2578_v29 = vor.u32 %v3147_v50, %v2577_v59 }
 0x18b   :  { %v1167_v18 = vpop.f32.mrf.mxu1  ;;  %v1366_v28 = vmax.f32 %v1160_v62, 0.0  ;;  %v4088_v41 = vpop.f32.mrf.mxu3 }
 0x18c   :  { %4602 = vst [vmem:[#allocation14_spill] sm:$0xff] %v4088_v41 }
 0x18d   :  { %v4082_v31 = vadd.f32 %v1366_v28, %v1341_v24 }
 0x18e   :  { %2851 = vmatmul.msk.bf16.gmra.mxu1 %vm664_vm1, %v2590_v53  ;;  %v903_v58 = vpop.f32.mrf.mxu0  ;;  %v3150_v53 = vld [vmem:[%s4583_s0 + $0x194] sm:$0xf] }
 0x18f   :  { %v904_v13 = vadd.f32 %v3527_v23, %v903_v58  ;;  %v4093_v62 = vpop.f32.mrf.mxu2  ;;  %v1343_v58 = vmax.f32 %v3639_v30, 0.0 }
 0x190   :  { %4603 = vst [vmem:[#allocation15_spill] sm:$0xff] %v4093_v62 }
 0x191   :  { %v1163_v4 = vadd.f32 %v1162_v20, %v904_v13  ;;  %942 = vmatmul.bf16.gmra.mxu0 %v2578_v29  ;;  %v2595_v20 = vld [vmem:[%s4583_s0 + $0x198] sm:$0xf0] }
 0x192   :  { %v2598_v28 = vor.u32 %v3150_v53, %v2595_v20 }
 0x193   :  { %v1169_v39 = vpop.f32.mrf.mxu1  ;;  %v1367_v56 = vmax.f32 %v1163_v4, 0.0 }
 0x195   :  { %v4091_v9 = vadd.f32 %v1367_v56, %v1342_v43  ;;  %v3149_v56 = vld [vmem:[%s4583_s0 + $0x184] sm:$0xf0]  ;;  %v4108_v43 = vpop.f32.mrf.mxu3 }
 0x196   :  { %v905_v24 = vpop.f32.mrf.mxu0  ;;  %4604 = vst [vmem:[#allocation16_spill] sm:$0xff] %v4108_v43  ;;  %v1344_v43 = vmax.f32 %v3649_v37, 0.0  ;;  %v2593_v37 = vld [vmem:[%s4583_s0 + $0x190] sm:$0xf] }
 0x197   :  { %v906_v59 = vadd.f32 %v3527_v23, %v905_v24  ;;  %v4114_v24 = vpop.f32.mrf.mxu2 }
 0x198   :  { %4605 = vst [vmem:[#allocation17_spill] sm:$0xff] %v4114_v24 }
 0x199   :  { %v1165_v50 = vadd.f32 %v1164_v33, %v906_v59  ;;  %v2586_v33 = vor.u32 %v3149_v56, %v2585_v15 }
 0x19b   :  { %v1172_v29 = vpop.f32.mrf.mxu1  ;;  %v1368_v13 = vmax.f32 %v1165_v50, 0.0 }
 0x19d   :  { %v4111_v4 = vadd.f32 %v1368_v13, %v1343_v58  ;;  %v4117_v41 = vpop.f32.mrf.mxu3 }
 0x19e   :  { %2852 = vmatmul.msk.bf16.gmra.mxu1 %vm664_vm1, %v2598_v28  ;;  %v908_v53 = vpop.f32.mrf.mxu0  ;;  %4606 = vst [vmem:[#allocation18_spill] sm:$0xff] %v4117_v41  ;;  %v3152_v28 = vld [vmem:[%s4583_s0 + $0x1a4] sm:$0xf]  ;;  %v1346_v41 = vmax.f32 %v3681_v60, 0.0 }
 0x19f   :  { %v909_v20 = vadd.f32 %v3527_v23, %v908_v53  ;;  %v4122_v50 = vpop.f32.mrf.mxu2  ;;  %v1345_v53 = vmax.f32 %v3671_v52, 0.0 }
 0x1a0   :  { %4607 = vst [vmem:[#allocation19_spill] sm:$0xff] %v4122_v50 }
 0x1a1   :  { %v1168_v59 = vadd.f32 %v1167_v18, %v909_v20  ;;  %947 = vmatmul.bf16.gmra.mxu0 %v2586_v33  ;;  %v2603_v18 = vld [vmem:[%s4583_s0 + $0x1a8] sm:$0xf0] }
 0x1a2   :  { %v2606_v13 = vor.u32 %v3152_v28, %v2603_v18 }
 0x1a3   :  { %v1174_v62 = vpop.f32.mrf.mxu1  ;;  %v1369_v25 = vmax.f32 %v1168_v59, 0.0 }
 0x1a5   :  { %v4120_v30 = vadd.f32 %v1369_v25, %v1344_v43  ;;  %v3151_v25 = vld [vmem:[%s4583_s0 + $0x194] sm:$0xf0]  ;;  %v4137_v43 = vpop.f32.mrf.mxu3 }
 0x1a6   :  { %v910_v58 = vpop.f32.mrf.mxu0  ;;  %4608 = vst [vmem:[#allocation20_spill] sm:$0xff] %v4137_v43 }
 0x1a7   :  { %v911_v15 = vadd.f32 %v3527_v23, %v910_v58  ;;  %v4143_v28 = vpop.f32.mrf.mxu2 }
 0x1a8   :  { %4609 = vst [vmem:[#allocation21_spill] sm:$0xff] %v4143_v28 }
 0x1a9   :  { %v1170_v56 = vadd.f32 %v1169_v39, %v911_v15  ;;  %v2594_v39 = vor.u32 %v3151_v25, %v2593_v37  ;;  %v2611_v37 = vld [vmem:[%s4583_s0 + $0x1b8] sm:$0xf0] }
 0x1ab   :  { %v1177_v33 = vpop.f32.mrf.mxu1  ;;  %v1370_v20 = vmax.f32 %v1170_v56, 0.0 }
 0x1ad   :  { %v4140_v59 = vadd.f32 %v1370_v20, %v1345_v53 }
 0x1ae   :  { %2853 = vmatmul.msk.bf16.gmra.mxu1 %vm664_vm1, %v2606_v13  ;;  %v913_v58 = vpop.f32.mrf.mxu0  ;;  %v3154_v13 = vld [vmem:[%s4583_s0 + $0x1b4] sm:$0xf] }
 0x1af   :  { %v914_v18 = vadd.f32 %v3527_v23, %v913_v58  ;;  %v4147_v43 = vpop.f32.mrf.mxu3  ;;  %v4158_v25 = vpop.f32.mrf.mxu2  ;;  %v2614_v60 = vor.u32 %v3154_v13, %v2611_v37 }
 0x1b0   :  { %4610 = vst [vmem:[#allocation22_spill] sm:$0xff] %v4147_v43 }
 0x1b1   :  { %v1173_v15 = vadd.f32 %v1172_v29, %v914_v18  ;;  %952 = vmatmul.bf16.gmra.mxu0 %v2594_v39  ;;  %4611 = vst [vmem:[#allocation23_spill] sm:$0xff] %v4158_v25  ;;  %v1347_v39 = vmax.f32 %v3703_v11, 0.0 }
 0x1b3   :  { %v1179_v50 = vpop.f32.mrf.mxu1  ;;  %v1371_v24 = vmax.f32 %v1173_v15, 0.0 }
 0x1b5   :  { %v4149_v52 = vadd.f32 %v1371_v24, %v1346_v41  ;;  %v2601_v41 = vld [vmem:[%s4583_s0 + $0x1a0] sm:$0xf]  ;;  %v3153_v24 = vld [vmem:[%s4583_s0 + $0x1a4] sm:$0xf0] }
 0x1b6   :  { %v915_v56 = vpop.f32.mrf.mxu0 }
 0x1b7   :  { %v916_v29 = vadd.f32 %v3527_v23, %v915_v56  ;;  %v2602_v23 = vor.u32 %v3153_v24, %v2601_v41  ;;  %v4175_v56 = vld [vmem:[%s4585_s2] ss:$0 sm:$0xff]  ;;  %v4178_v11 = vpop.f32.mrf.mxu2  ;;  %v3156_v24 = vld [vmem:[%s4583_s0 + $0x1c4] sm:$0xf] }
 0x1b8   :  { %4613 = vst [vmem:[#allocation25_spill] sm:$0xff] %v4178_v11 }
 0x1b9   :  { %v1175_v53 = vadd.f32 %v1174_v62, %v916_v29  ;;  %v4170_v62 = vpop.f32.mrf.mxu3 }
 0x1ba   :  { %4612 = vst [vmem:[#allocation24_spill] sm:$0xff] %v4170_v62 }
 0x1bb   :  { %v1182_v20 = vpop.f32.mrf.mxu1  ;;  %v1372_v58 = vmax.f32 %v1175_v53, 0.0  ;;  %v1348_v53 = vmax.f32 %v3715_v19, 0.0  ;;  %v2609_v19 = vld [vmem:[%s4583_s0 + $0x1b0] sm:$0xf] }
 0x1bd   :  { %v4167_v18 = vadd.f32 %v1372_v58, %v1347_v39  ;;  %v2619_v58 = vld [vmem:[%s4583_s0 + $0x1c8] sm:$0xf0] }
 0x1be   :  { %2854 = vmatmul.msk.bf16.gmra.mxu1 %vm664_vm1, %v2614_v60  ;;  %v918_v15 = vpop.f32.mrf.mxu0 }
 0x1bf   :  { %v919_v13 = vadd.f32 %v4175_v56, %v918_v15  ;;  %v4199_v43 = vpop.f32.mrf.mxu2 }
 0x1c0   :  { %4616 = vst [vmem:[#allocation28_spill] sm:$0xff] %v4199_v43  ;;  %v1352_v43 = vmax.f32 %v3796_v26, 0.0 }
 0x1c1   :  { %v1178_v37 = vadd.f32 %v1177_v33, %v919_v13  ;;  %957 = vmatmul.bf16.gmra.mxu0 %v2602_v23  ;;  %v4190_v23 = vpop.f32.mrf.mxu3  ;;  %v2622_v13 = vor.u32 %v3156_v24, %v2619_v58 }
 0x1c2   :  { %4615 = vst [vmem:[#allocation27_spill] sm:$0xff] %v4190_v23 }
 0x1c3   :  { %v1184_v29 = vpop.f32.mrf.mxu1  ;;  %v1373_v39 = vmax.f32 %v1178_v37, 0.0  ;;  %v3155_v37 = vld [vmem:[%s4583_s0 + $0x1b4] sm:$0xf0] }
 0x1c5   :  { %v4181_v60 = vadd.f32 %v1373_v39, %v1348_v53  ;;  %v1349_v53 = vmax.f32 %v3739_v38, 0.0 }
 0x1c6   :  { %v920_v41 = vpop.f32.mrf.mxu0 }
 0x1c7   :  { %4614 = vst [vmem:[#allocation26_spill] sm:$0xff] %v4181_v60  ;;  %v921_v33 = vadd.f32 %v4175_v56, %v920_v41  ;;  %v1350_v60 = vmax.f32 %v3752_v49, 0.0  ;;  %v2617_v49 = vld [vmem:[%s4583_s0 + $0x1c0] sm:$0xf] }
 0x1c9   :  { %v1180_v15 = vadd.f32 %v1179_v50, %v921_v33  ;;  %v2610_v50 = vor.u32 %v3155_v37, %v2609_v19  ;;  %v1055_v23 = vpop.f32.mrf.mxu3  ;;  %v1314_v19 = vpop.f32.mrf.mxu2 }
 0x1cb   :  { %v1187_v25 = vpop.f32.mrf.mxu1  ;;  %v1374_v39 = vmax.f32 %v1180_v15, 0.0  ;;  %v3158_v15 = vld [vmem:[%s4583_s0 + $0x1d4] sm:$0xf] }
 0x1cd   :  { %v4201_v28 = vadd.f32 %v1374_v39, %v1349_v53 }
 0x1ce   :  { %2855 = vmatmul.msk.bf16.gmra.mxu1 %vm664_vm1, %v2622_v13  ;;  %v923_v41 = vpop.f32.mrf.mxu0  ;;  %v2627_v13 = vld [vmem:[%s4583_s0 + $0x1d8] sm:$0xf0] }
 0x1cf   :  { %4617 = vst [vmem:[#allocation29_spill] sm:$0xff] %v4201_v28  ;;  %v924_v24 = vadd.f32 %v4175_v56, %v923_v41  ;;  %v2630_v53 = vor.u32 %v3158_v15, %v2627_v13 }
 0x1d1   :  { %v1183_v58 = vadd.f32 %v1182_v20, %v924_v24  ;;  %962 = vmatmul.bf16.gmra.mxu0 %v2610_v50  ;;  %v4222_v41 = vpop.f32.mrf.mxu3  ;;  %v4228_v15 = vpop.f32.mrf.mxu2 }
 0x1d2   :  { %4619 = vst [vmem:[#allocation31_spill] sm:$0xff] %v4222_v41 }
 0x1d3   :  { %v1189_v33 = vpop.f32.mrf.mxu1  ;;  %v1375_v11 = vmax.f32 %v1183_v58, 0.0  ;;  %4620 = vst [vmem:[#allocation32_spill] sm:$0xff] %v4228_v15 }
 0x1d5   :  { %v4206_v62 = vadd.f32 %v1375_v11, %v1350_v60  ;;  %v3157_v11 = vld [vmem:[%s4583_s0 + $0x1c4] sm:$0xf0]  ;;  %v1351_v60 = vmax.f32 %v3777_v7, 0.0  ;;  %v1056_v7 = vadd.f32 %v4175_v56, %v1055_v23 }
 0x1d6   :  { %v925_v38 = vpop.f32.mrf.mxu0  ;;  %v2618_v24 = vor.u32 %v3157_v11, %v2617_v49  ;;  %v2635_v49 = vld [vmem:[%s4583_s0 + $0x1e8] sm:$0xf0] }
 0x1d7   :  { %4618 = vst [vmem:[#allocation30_spill] sm:$0xff] %v4206_v62  ;;  %v926_v20 = vadd.f32 %v4175_v56, %v925_v38  ;;  %v1315_v26 = vadd.f32 %v1314_v19, %v1056_v7 }
 0x1d9   :  { %v1185_v37 = vadd.f32 %v1184_v29, %v926_v20  ;;  %v1060_v11 = vpop.f32.mrf.mxu3  ;;  %v1319_v23 = vpop.f32.mrf.mxu2 }
 0x1db   :  { %v1192_v39 = vpop.f32.mrf.mxu1  ;;  %v1376_v50 = vmax.f32 %v1185_v37, 0.0 }
 0x1dd   :  { %v4225_v58 = vadd.f32 %v1376_v50, %v1351_v60 }
 0x1de   :  { %2856 = vmatmul.msk.bf16.gmra.mxu1 %vm664_vm1, %v2630_v53  ;;  %v928_v29 = vpop.f32.mrf.mxu0  ;;  %v3160_v53 = vld [vmem:[%s4583_s0 + $0x1e4] sm:$0xf] }
 0x1df   :  { %v929_v38 = vadd.f32 %v4175_v56, %v928_v29  ;;  %v2638_v50 = vor.u32 %v3160_v53, %v2635_v49  ;;  %v1353_v29 = vmax.f32 %v3821_v54, 0.0  ;;  %v1354_v54 = vmax.f32 %v3834_v1, 0.0 }
 0x1e1   :  { %v1188_v13 = vadd.f32 %v1187_v25, %v929_v38  ;;  %967 = vmatmul.bf16.gmra.mxu0 %v2618_v24  ;;  %v4251_v49 = vpop.f32.mrf.mxu3 }
 0x1e3   :  { %v1194_v20 = vpop.f32.mrf.mxu1  ;;  %v1377_v62 = vmax.f32 %v1188_v13, 0.0  ;;  %v1403_v13 = vmax.f32 %v3749_v47, 0.0  ;;  %v4256_v47 = vpop.f32.mrf.mxu2 }
 0x1e5   :  { %v4232_v37 = vadd.f32 %v1377_v62, %v1352_v43  ;;  %v2625_v43 = vld [vmem:[%s4583_s0 + $0x1d0] sm:$0xf]  ;;  %v3159_v62 = vld [vmem:[%s4583_s0 + $0x1d4] sm:$0xf0] }
 0x1e6   :  { %v930_v41 = vpop.f32.mrf.mxu0  ;;  %v2626_v19 = vor.u32 %v3159_v62, %v2625_v43  ;;  %v1061_v43 = vadd.f32 %v4175_v56, %v1060_v11  ;;  %v3162_v62 = vld [vmem:[%s4583_s0 + $0x1f4] sm:$0xf]  ;;  %v2633_v11 = vld [vmem:[%s4583_s0 + $0x1e0] sm:$0xf] }
 0x1e7   :  { %4621 = vst [vmem:[#allocation33_spill] sm:$0xff] %v4232_v37  ;;  %v931_v25 = vadd.f32 %v4175_v56, %v930_v41 }
 0x1e9   :  { %v1190_v60 = vadd.f32 %v1189_v33, %v931_v25  ;;  %v1428_v33 = vmax.f32 %v1315_v26, 0.0 }
 0x1eb   :  { %v1197_v24 = vpop.f32.mrf.mxu1  ;;  %v1378_v38 = vmax.f32 %v1190_v60, 0.0 }
 0x1ed   :  { %v1453_v15 = vadd.f32 %v1378_v38, %v1353_v29 }
 0x1ee   :  { %2857 = vmatmul.msk.bf16.gmra.mxu1 %vm664_vm1, %v2638_v50  ;;  %v933_v41 = vpop.f32.mrf.mxu0  ;;  %v1404_v50 = vmax.f32 %v3768_v2, 0.0 }
 0x1ef   :  { %v1478_v7 = vadd.f32 %v1453_v15, %v1403_v13  ;;  %v934_v53 = vadd.f32 %v4175_v56, %v933_v41  ;;  %v1320_v13 = vadd.f32 %v1319_v23, %v1061_v43  ;;  %v1355_v41 = vmax.f32 %v3859_v32, 0.0 }
 0x1f0   :  { %v1356_v32 = vmax.f32 %v3872_v46, 0.0 }
 0x1f1   :  { %v4253_v25 = vadd.f32 %v1478_v7, %v1428_v33  ;;  %v1193_v37 = vadd.f32 %v1192_v39, %v934_v53  ;;  %972 = vmatmul.bf16.gmra.mxu0 %v2626_v19  ;;  %v2643_v39 = vld [vmem:[%s4583_s0 + $0x1f8] sm:$0xf0]  ;;  %v3161_v33 = vld [vmem:[%s4583_s0 + $0x1e4] sm:$0xf0]  ;;  %v1065_v19 = vpop.f32.mrf.mxu3  ;;  %v1405_v53 = vmax.f32 %v3793_v22, 0.0  ;;  %v1406_v22 = vmax.f32 %v3812_v44, 0.0 }
 0x1f2   :  { %v2646_v38 = vor.u32 %v3162_v62, %v2643_v39  ;;  %v2634_v23 = vor.u32 %v3161_v33, %v2633_v11  ;;  %v3164_v33 = vld [vmem:[%s4583_s0 + $0x204] sm:$0xf] }
 0x1f3   :  { %v1199_v28 = vpop.f32.mrf.mxu1  ;;  %v1379_v60 = vmax.f32 %v1193_v37, 0.0 }
 0x1f5   :  { %v1454_v26 = vadd.f32 %v1379_v60, %v1354_v54 }
 0x1f6   :  { %v935_v15 = vpop.f32.mrf.mxu0 }
 0x1f7   :  { %v4266_v29 = vadd.f32 %v1454_v26, %v1404_v50  ;;  %v936_v1 = vadd.f32 %v4175_v56, %v935_v15  ;;  %v1324_v50 = vpop.f32.mrf.mxu2 }
 0x1f9   :  { %v1195_v37 = vadd.f32 %v1194_v20, %v936_v1  ;;  %v1430_v20 = vmax.f32 %v1320_v13, 0.0  ;;  %v1066_v13 = vadd.f32 %v4175_v56, %v1065_v19  ;;  %v2641_v19 = vld [vmem:[%s4583_s0 + $0x1f0] sm:$0xf] }
 0x1fb   :  { %v1202_v2 = vpop.f32.mrf.mxu1  ;;  %v1380_v7 = vmax.f32 %v1195_v37, 0.0  ;;  %v4282_v37 = vpop.f32.mrf.mxu3 }
 0x1fd   :  { %v1455_v54 = vadd.f32 %v1380_v7, %v1355_v41 }
 0x1fe   :  { %2858 = vmatmul.msk.bf16.gmra.mxu1 %vm664_vm1, %v2646_v38  ;;  %v938_v60 = vpop.f32.mrf.mxu0 }
 0x1ff   :  { %v1480_v26 = vadd.f32 %v1455_v54, %v1405_v53  ;;  %v939_v43 = vadd.f32 %v4175_v56, %v938_v60  ;;  %v4295_v7 = vpop.f32.mrf.mxu2  ;;  %v1325_v54 = vadd.f32 %v1324_v50, %v1066_v13  ;;  %v1357_v60 = vmax.f32 %v3897_v16, 0.0 }
 0x200   :  { %v1358_v16 = vmax.f32 %v3910_v36, 0.0 }
 0x201   :  { %v4279_v15 = vadd.f32 %v1480_v26, %v1430_v20  ;;  %v1198_v62 = vadd.f32 %v1197_v24, %v939_v43  ;;  %977 = vmatmul.bf16.gmra.mxu0 %v2634_v23  ;;  %v2651_v24 = vld [vmem:[%s4583_s0 + $0x208] sm:$0xf0]  ;;  %v3163_v23 = vld [vmem:[%s4583_s0 + $0x1f4] sm:$0xf0]  ;;  %v1407_v43 = vmax.f32 %v3831_v0, 0.0  ;;  %v1408_v0 = vmax.f32 %v3850_v21, 0.0 }
 0x202   :  { %v2654_v44 = vor.u32 %v3164_v33, %v2651_v24  ;;  %v1409_v21 = vmax.f32 %v3869_v45, 0.0 }
 0x203   :  { %v1204_v39 = vpop.f32.mrf.mxu1  ;;  %v1381_v1 = vmax.f32 %v1198_v62, 0.0 }
 0x205   :  { %v1456_v38 = vadd.f32 %v1381_v1, %v1356_v32  ;;  %v2642_v32 = vor.u32 %v3163_v23, %v2641_v19  ;;  %v1070_v1 = vpop.f32.mrf.mxu3 }
 0x206   :  { %v940_v11 = vpop.f32.mrf.mxu0 }
 0x207   :  { %v4292_v41 = vadd.f32 %v1456_v38, %v1406_v22  ;;  %v941_v46 = vadd.f32 %v4175_v56, %v940_v11  ;;  %v1329_v24 = vpop.f32.mrf.mxu2 }
 0x209   :  { %v1200_v53 = vadd.f32 %v1199_v28, %v941_v46  ;;  %v1432_v28 = vmax.f32 %v1325_v54, 0.0 }
 0x20b   :  { %v1207_v20 = vpop.f32.mrf.mxu1  ;;  %v1382_v26 = vmax.f32 %v1200_v53, 0.0 }
 0x20d   :  { %v1457_v62 = vadd.f32 %v1382_v26, %v1357_v60  ;;  %v4315_v60 = vpop.f32.mrf.mxu3 }
 0x20e   :  { %2859 = vmatmul.msk.bf16.gmra.mxu1 %vm664_vm1, %v2654_v44  ;;  %v943_v50 = vpop.f32.mrf.mxu0  ;;  %v1071_v44 = vadd.f32 %v4175_v56, %v1070_v1 }
 0x20f   :  { %v1482_v22 = vadd.f32 %v1457_v62, %v1407_v43  ;;  %v944_v38 = vadd.f32 %v4175_v56, %v943_v50  ;;  %v1359_v62 = vmax.f32 %v3935_v10, 0.0  ;;  %v4318_v36 = vpop.f32.mrf.mxu2  ;;  %v1410_v10 = vmax.f32 %v3888_v6, 0.0 }
 0x210   :  { %v1411_v6 = vmax.f32 %v3907_v35, 0.0  ;;  %v1019_v35 = vadd.f32 %v4175_v56, %v3938_v14 }
 0x211   :  { %v4307_v13 = vadd.f32 %v1482_v22, %v1432_v28  ;;  %v1203_v11 = vadd.f32 %v1202_v2, %v944_v38  ;;  %982 = vmatmul.bf16.gmra.mxu0 %v2642_v32  ;;  %v1330_v2 = vadd.f32 %v1329_v24, %v1071_v44  ;;  %v1360_v24 = vmax.f32 %v3949_v27, 0.0  ;;  %v3211_v27 = vld [vmem:[%s4586_s3 + $0x10] sm:$0xff] }
 0x212   :  { %1609 = vmatpush.bf16.msra.mxu2 %v3211_v27 }
 0x213   :  { %v1209_v33 = vpop.f32.mrf.mxu1  ;;  %v1383_v46 = vmax.f32 %v1203_v11, 0.0  ;;  %v1434_v50 = vmax.f32 %v1330_v2, 0.0 }
 0x215   :  { %v1458_v53 = vadd.f32 %v1383_v46, %v1358_v16 }
 0x216   :  { %v945_v54 = vpop.f32.mrf.mxu0 }
 0x217   :  { %v4312_v19 = vadd.f32 %v1458_v53, %v1408_v0  ;;  %v946_v23 = vadd.f32 %v4175_v56, %v945_v54  ;;  %v1334_v54 = vpop.f32.mrf.mxu2 }
 0x219   :  { %v1205_v26 = vadd.f32 %v1204_v39, %v946_v23  ;;  %v1075_v39 = vpop.f32.mrf.mxu3 }
 0x21a   :  { %v1076_v44 = vadd.f32 %v4175_v56, %v1075_v39 }
 0x21b   :  { %v1212_v43 = vpop.f32.mrf.mxu1  ;;  %v1384_v28 = vmax.f32 %v1205_v26, 0.0 }
 0x21d   :  { %v1459_v32 = vadd.f32 %v1384_v28, %v1359_v62  ;;  %v1335_v62 = vadd.f32 %v1334_v54, %v1076_v44  ;;  %v1278_v54 = vadd.f32 %v3940_v8, %v1019_v35  ;;  %v3214_v8 = vld [vmem:[%s4586_s3 + $0x28] sm:$0xff] }
 0x21e   :  { %v948_v1 = vpop.f32.mrf.mxu0 }
 0x21f   :  { %v1484_v22 = vadd.f32 %v1459_v32, %v1409_v21  ;;  %v949_v38 = vadd.f32 %v4175_v56, %v948_v1 }
 0x221   :  { %v4322_v11 = vadd.f32 %v1484_v22, %v1434_v50  ;;  %v1208_v16 = vadd.f32 %v1207_v20, %v949_v38  ;;  %v1361_v20 = vmax.f32 %v3975_v55, 0.0  ;;  %v1436_v50 = vmax.f32 %v1335_v62, 0.0 }
 0x223   :  { %v1214_v46 = vpop.f32.mrf.mxu1  ;;  %v1385_v0 = vmax.f32 %v1208_v16, 0.0 }
 0x225   :  { %v1460_v53 = vadd.f32 %v1385_v0, %v1360_v24  ;;  %v1412_v0 = vmax.f32 %v3930_v51, 0.0  ;;  %v1021_v51 = vadd.f32 %v4175_v56, %v3957_v42  ;;  %v3213_v42 = vld [vmem:[%s4586_s3 + $0x20] sm:$0xff] }
 0x226   :  { %v950_v45 = vpop.f32.mrf.mxu0 }
 0x227   :  { %v4327_v23 = vadd.f32 %v1460_v53, %v1410_v10  ;;  %v951_v26 = vadd.f32 %v4175_v56, %v950_v45 }
 0x229   :  { %v1210_v2 = vadd.f32 %v1209_v33, %v951_v26  ;;  %v3212_v33 = vld [vmem:[%s4586_s3 + $0x18] sm:$0xff] }
 0x22a   :  { %1636 = vmatpush.bf16.msra.mxu3 %v3212_v33  ;;  %v1024_v33 = vadd.f32 %v4175_v56, %v3978_v3 }
 0x22b   :  { %v1217_v28 = vpop.f32.mrf.mxu1  ;;  %v1386_v21 = vmax.f32 %v1210_v2, 0.0 }
 0x22d   :  { %v1461_v32 = vadd.f32 %v1386_v21, %v1361_v20  ;;  %v1413_v21 = vmax.f32 %v1278_v54, 0.0 }
 0x22e   :  { %v953_v1 = vpop.f32.mrf.mxu0 }
 0x22f   :  { %v1486_v22 = vadd.f32 %v1461_v32, %v1411_v6  ;;  %v954_v38 = vadd.f32 %v4175_v56, %v953_v1 }
 0x231   :  { %v4339_v16 = vadd.f32 %v1486_v22, %v1436_v50  ;;  %v1213_v55 = vadd.f32 %v1212_v43, %v954_v38 }
 0x233   :  { %v1219_v39 = vpop.f32.mrf.mxu1  ;;  %v1387_v24 = vmax.f32 %v1213_v55, 0.0 }
 0x235   :  { %v1462_v10 = vadd.f32 %v4004_v57, %v1387_v24 }
 0x236   :  { %v955_v53 = vpop.f32.mrf.mxu0 }
 0x237   :  { %v1487_v44 = vadd.f32 %v1462_v10, %v1412_v0  ;;  %v956_v45 = vadd.f32 %v4175_v56, %v955_v53  ;;  %v1283_v0 = vadd.f32 %v3980_v5, %v1024_v33  ;;  %v3215_v5 = vld [vmem:[%s4586_s3 + $0x30] sm:$0xff] }
 0x239   :  { %v1512_v26 = vmul.f32 0.25, %v1487_v44  ;;  %v1215_v2 = vadd.f32 %v1214_v46, %v956_v45  ;;  %v1280_v46 = vadd.f32 %v3966_v48, %v1021_v51  ;;  %v1415_v44 = vmax.f32 %v1283_v0, 0.0 }
 0x23a   :  { %v1026_v45 = vadd.f32 %v4175_v56, %v3995_v17  ;;  %v3216_v17 = vld [vmem:[%s4586_s3 + $0x38] sm:$0xff] }
 0x23b   :  { %v1222_v62 = vpop.f32.mrf.mxu1  ;;  %v1537_v43 = vpack.c.bf16 %v1512_v26, %v1512_v26  ;;  %v1388_v20 = vmax.f32 %v1215_v2, 0.0  ;;  %v1414_v38 = vmax.f32 %v1280_v46, 0.0  ;;  %v4622_v46 = vld [vmem:[#allocation7_spill] sm:$0xff] }
 0x23d   :  { %v1463_v14 = vadd.f32 %v4020_v34, %v1388_v20  ;;  %2888 = vmatmul.msk.bf16.vlgmr.msrb.gmra.mxu3 %vm1550_vm2, %v1537_v43  ;;  %v1285_v43 = vadd.f32 %v4007_v61, %v1026_v45  ;;  %v3218_v45 = vld [vmem:[%s4586_s3 + $0x48] sm:$0xff] }
 0x23e   :  { %v958_v57 = vpop.f32.mrf.mxu0  ;;  %1690 = vmatpush.bf16.msrb.mxu3 %v3214_v8 }
 0x23f   :  { %v1488_v27 = vadd.f32 %v1463_v14, %v1413_v21  ;;  %v959_v6 = vadd.f32 %v4175_v56, %v958_v57  ;;  %v1416_v57 = vmax.f32 %v1285_v43, 0.0 }
 0x241   :  { %v1513_v32 = vmul.f32 0.25, %v1488_v27  ;;  %v1218_v50 = vadd.f32 %v1217_v28, %v959_v6  ;;  %v1029_v27 = vadd.f32 %v4175_v56, %v4017_v40 }
 0x243   :  { %v1224_v1 = vpop.f32.mrf.mxu1  ;;  %v1540_v34 = vpack.c.bf16 %v1513_v32, %v1513_v32  ;;  %v1389_v22 = vmax.f32 %v1218_v50, 0.0  ;;  %v1288_v32 = vadd.f32 %v4622_v46, %v1029_v27  ;;  %v4627_v27 = vld [vmem:[#allocation12_spill] sm:$0xff] }
 0x245   :  { %v1464_v55 = vadd.f32 %v4046_v12, %v1389_v22  ;;  %2883 = vmatmul.msk.bf16.vlgmr.msrb.gmra.mxu2 %vm1550_vm2, %v1540_v34  ;;  %v1417_v22 = vmax.f32 %v1288_v32, 0.0  ;;  %v4628_v32 = vld [vmem:[#allocation13_spill] sm:$0xff] }
 0x246   :  { %v960_v24 = vpop.f32.mrf.mxu0  ;;  %1663 = vmatpush.bf16.msrb.mxu2 %v3213_v42 }
 0x247   :  { %v1489_v48 = vadd.f32 %v1464_v55, %v1414_v38  ;;  %v961_v28 = vadd.f32 %v4175_v56, %v960_v24  ;;  %v4623_v38 = vld [vmem:[#allocation8_spill] sm:$0xff] }
 0x248   :  { %v1031_v40 = vadd.f32 %v4175_v56, %v4623_v38 }
 0x249   :  { %v1220_v35 = vadd.f32 %v1219_v39, %v961_v28  ;;  %v1514_v12 = vmul.f32 0.25, %v1489_v48  ;;  %v4624_v28 = vld [vmem:[#allocation9_spill] sm:$0xff] }
 0x24a   :  { %v1290_v0 = vadd.f32 %v4624_v28, %v1031_v40  ;;  %v3220_v40 = vld [vmem:[%s4586_s3 + $0x58] sm:$0xff] }
 0x24b   :  { %v1227_v10 = vpop.f32.mrf.mxu1  ;;  %v1390_v53 = vmax.f32 %v1220_v35, 0.0  ;;  %v1589_v39 = vpack.c.bf16 %v1514_v12, %v1514_v12 }
 0x24c   :  { %v1418_v12 = vmax.f32 %v1290_v0, 0.0 }
 0x24d   :  { %v1465_v3 = vadd.f32 %v4062_v63, %v1390_v53 }
 0x24e   :  { %v963_v54 = vpop.f32.mrf.mxu0 }
 0x24f   :  { %v1490_v26 = vadd.f32 %v1465_v3, %v1415_v44  ;;  %v964_v2 = vadd.f32 %v4175_v56, %v963_v54 }
 0x251   :  { %v1515_v20 = vmul.f32 0.25, %v1490_v26  ;;  %v1223_v21 = vadd.f32 %v1222_v62, %v964_v2  ;;  %v4625_v26 = vld [vmem:[#allocation10_spill] sm:$0xff] }
 0x252   :  { %v1034_v2 = vadd.f32 %v4175_v56, %v4625_v26 }
 0x253   :  { %v1229_v51 = vpop.f32.mrf.mxu1  ;;  %v1616_v63 = vpack.c.bf16 %v1515_v20, %v1515_v20  ;;  %v1391_v14 = vmax.f32 %v1223_v21, 0.0 }
 0x255   :  { %v1466_v61 = vadd.f32 %v4082_v31, %v1391_v14  ;;  %2895 = vmatmul.msk.bf16.vlgmr.msra.gmra.mxu2 %vm1550_vm2, %v1589_v39  ;;  %2902 = vmatmul.msk.bf16.vlgmr.msra.gmra.mxu3 %vm1550_vm2, %v1616_v63 }
 0x256   :  { %v965_v62 = vpop.f32.mrf.mxu0  ;;  %1717 = vmatpush.bf16.msra.mxu2 %v3215_v5  ;;  %1744 = vmatpush.bf16.msra.mxu3 %v3216_v17  ;;  %v4626_v5 = vld [vmem:[#allocation11_spill] sm:$0xff] }
 0x257   :  { %v1491_v6 = vadd.f32 %v1466_v61, %v1416_v57  ;;  %v966_v8 = vadd.f32 %v4175_v56, %v965_v62  ;;  %v1293_v17 = vadd.f32 %v4626_v5, %v1034_v2  ;;  %v1036_v61 = vadd.f32 %v4175_v56, %v4627_v27 }
 0x259   :  { %v1225_v50 = vadd.f32 %v1224_v1, %v966_v8  ;;  %v1516_v55 = vmul.f32 0.25, %v1491_v6  ;;  %v3217_v1 = vld [vmem:[%s4586_s3 + $0x40] sm:$0xff]  ;;  %v1419_v57 = vmax.f32 %v1293_v17, 0.0 }
 0x25b   :  { %v1232_v42 = vpop.f32.mrf.mxu1  ;;  %v1392_v34 = vmax.f32 %v1225_v50, 0.0  ;;  %v1643_v3 = vpack.c.bf16 %v1516_v55, %v1516_v55  ;;  %v1295_v50 = vadd.f32 %v4628_v32, %v1036_v61 }
 0x25d   :  { %v1467_v31 = vadd.f32 %v4091_v9, %v1392_v34  ;;  %v1420_v55 = vmax.f32 %v1295_v50, 0.0 }
 0x25e   :  { %v968_v33 = vpop.f32.mrf.mxu0 }
 0x25f   :  { %v1492_v24 = vadd.f32 %v1467_v31, %v1417_v22  ;;  %v969_v48 = vadd.f32 %v4175_v56, %v968_v33 }
 0x261   :  { %v1517_v35 = vmul.f32 0.25, %v1492_v24  ;;  %v1228_v53 = vadd.f32 %v1227_v10, %v969_v48  ;;  %v4629_v24 = vld [vmem:[#allocation14_spill] sm:$0xff] }
 0x262   :  { %v1039_v48 = vadd.f32 %v4175_v56, %v4629_v24 }
 0x263   :  { %v1234_v44 = vpop.f32.mrf.mxu1  ;;  %v1670_v9 = vpack.c.bf16 %v1517_v35, %v1517_v35  ;;  %v1393_v54 = vmax.f32 %v1228_v53, 0.0  ;;  %v4630_v53 = vld [vmem:[#allocation15_spill] sm:$0xff] }
 0x265   :  { %v1468_v43 = vadd.f32 %v4111_v4, %v1393_v54  ;;  %2909 = vmatmul.msk.bf16.vlgmr.msrb.gmra.mxu2 %vm1550_vm2, %v1643_v3  ;;  %2916 = vmatmul.msk.bf16.vlgmr.msrb.gmra.mxu3 %vm1550_vm2, %v1670_v9 }
 0x266   :  { %v970_v10 = vpop.f32.mrf.mxu0  ;;  %1771 = vmatpush.bf16.msrb.mxu2 %v3217_v1  ;;  %1798 = vmatpush.bf16.msrb.mxu3 %v3218_v45  ;;  %v1298_v1 = vadd.f32 %v4630_v53, %v1039_v48 }
 0x267   :  { %v1493_v20 = vadd.f32 %v1468_v43, %v1418_v12  ;;  %v971_v21 = vadd.f32 %v4175_v56, %v970_v10  ;;  %v4631_v12 = vld [vmem:[#allocation16_spill] sm:$0xff] }
 0x268   :  { %v1421_v54 = vmax.f32 %v1298_v1, 0.0  ;;  %v1041_v26 = vadd.f32 %v4175_v56, %v4631_v12 }
 0x269   :  { %v1230_v39 = vadd.f32 %v1229_v51, %v971_v21  ;;  %v1518_v6 = vmul.f32 0.25, %v1493_v20  ;;  %v3219_v51 = vld [vmem:[%s4586_s3 + $0x50] sm:$0xff]  ;;  %v4632_v21 = vld [vmem:[#allocation17_spill] sm:$0xff] }
 0x26a   :  { %v1300_v5 = vadd.f32 %v4632_v21, %v1041_v26 }
 0x26b   :  { %v1237_v63 = vpop.f32.mrf.mxu1  ;;  %v1394_v14 = vmax.f32 %v1230_v39, 0.0  ;;  %v1697_v31 = vpack.c.bf16 %v1518_v6, %v1518_v6 }
 0x26d   :  { %v1469_v4 = vadd.f32 %v4120_v30, %v1394_v14 }
 0x26e   :  { %v973_v62 = vpop.f32.mrf.mxu0 }
 0x26f   :  { %v1494_v8 = vadd.f32 %v1469_v4, %v1419_v57  ;;  %v974_v46 = vadd.f32 %v4175_v56, %v973_v62  ;;  %v3222_v57 = vld [vmem:[%s4586_s3 + $0x68] sm:$0xff]  ;;  %v1422_v4 = vmax.f32 %v1300_v5, 0.0 }
 0x270   :  { %v4633_v62 = vld [vmem:[#allocation18_spill] sm:$0xff] }
 0x271   :  { %v1519_v34 = vmul.f32 0.25, %v1494_v8  ;;  %v1233_v22 = vadd.f32 %v1232_v42, %v974_v46  ;;  %v1044_v6 = vadd.f32 %v4175_v56, %v4633_v62 }
 0x273   :  { %v1239_v38 = vpop.f32.mrf.mxu1  ;;  %v1724_v30 = vpack.c.bf16 %v1519_v34, %v1519_v34  ;;  %v1395_v33 = vmax.f32 %v1233_v22, 0.0  ;;  %v4635_v22 = vld [vmem:[#allocation5_spill] sm:$0xff] }
 0x275   :  { %v1470_v28 = vadd.f32 %v4140_v59, %v1395_v33  ;;  %2923 = vmatmul.msk.bf16.vlgmr.msra.gmra.mxu2 %vm1550_vm2, %v1697_v31  ;;  %2930 = vmatmul.msk.bf16.vlgmr.msra.gmra.mxu3 %vm1550_vm2, %v1724_v30 }
 0x276   :  { %v975_v42 = vpop.f32.mrf.mxu0  ;;  %1825 = vmatpush.bf16.msra.mxu2 %v3219_v51  ;;  %1852 = vmatpush.bf16.msra.mxu3 %v3220_v40  ;;  %v989_v51 = vadd.f32 %v4175_v56, %v4635_v22  ;;  %v4636_v40 = vld [vmem:[#allocation19_spill] sm:$0xff] }
 0x277   :  { %v1495_v0 = vadd.f32 %v1470_v28, %v1420_v55  ;;  %v976_v35 = vadd.f32 %v4175_v56, %v975_v42  ;;  %v1303_v31 = vadd.f32 %v4636_v40, %v1044_v6  ;;  %v4638_v42 = vld [vmem:[#allocation20_spill] sm:$0xff]  ;;  %v4643_v6 = vld [vmem:[#allocation29_spill] sm:$0xff]  ;;  %v4645_v22 = vld [vmem:[#allocation23_spill] sm:$0xff] }
 0x279   :  { %v1235_v45 = vadd.f32 %v1234_v44, %v976_v35  ;;  %v1520_v43 = vmul.f32 0.25, %v1495_v0  ;;  %v3221_v44 = vld [vmem:[%s4586_s3 + $0x60] sm:$0xff]  ;;  %v1423_v28 = vmax.f32 %v1303_v31, 0.0  ;;  %v1046_v0 = vadd.f32 %v4175_v56, %v4638_v42  ;;  %v4639_v35 = vld [vmem:[#allocation26_spill] sm:$0xff] }
 0x27b   :  { %v1242_v3 = vpop.f32.mrf.mxu1  ;;  %v1396_v9 = vmax.f32 %v1235_v45, 0.0  ;;  %v1751_v27 = vpack.c.bf16 %v1520_v43, %v1520_v43  ;;  %v4641_v43 = vld [vmem:[#allocation21_spill] sm:$0xff] }
 0x27d   :  { %v1471_v59 = vadd.f32 %v4149_v52, %v1396_v9 }
 0x27e   :  { %v978_v2 = vpop.f32.mrf.mxu0 }
 0x27f   :  { %v1496_v10 = vadd.f32 %v1471_v59, %v1421_v54  ;;  %v979_v20 = vadd.f32 %v4175_v56, %v978_v2  ;;  %v4640_v59 = vld [vmem:[#allocation6_spill] sm:$0xff] }
 0x280   :  { %v991_v2 = vadd.f32 %v4175_v56, %v4640_v59 }
 0x281   :  { %v1521_v17 = vmul.f32 0.25, %v1496_v10  ;;  %v1238_v39 = vadd.f32 %v1237_v63, %v979_v20  ;;  %v4634_v63 = vld [vmem:[#allocation24_spill] sm:$0xff]  ;;  %v1305_v10 = vadd.f32 %v4641_v43, %v1046_v0 }
 0x282   :  { %v1051_v46 = vadd.f32 %v4175_v56, %v4634_v63  ;;  %v3225_v0 = vld [vmem:[%s4586_s3 + $0x80] sm:$0xff]  ;;  %v3228_v43 = vld [vmem:[%s4586_s3 + $0x98] sm:$0xff] }
 0x283   :  { %v1244_v14 = vpop.f32.mrf.mxu1  ;;  %v1778_v52 = vpack.c.bf16 %v1521_v17, %v1521_v17  ;;  %v1397_v61 = vmax.f32 %v1238_v39, 0.0  ;;  %v3223_v39 = vld [vmem:[%s4586_s3 + $0x70] sm:$0xff] }
 0x285   :  { %v1472_v8 = vadd.f32 %v4167_v18, %v1397_v61  ;;  %2937 = vmatmul.msk.bf16.vlgmr.msrb.gmra.mxu2 %vm1550_vm2, %v1751_v27  ;;  %2944 = vmatmul.msk.bf16.vlgmr.msrb.gmra.mxu3 %vm1550_vm2, %v1778_v52  ;;  %v4637_v18 = vld [vmem:[#allocation25_spill] sm:$0xff]  ;;  %v1424_v61 = vmax.f32 %v1305_v10, 0.0  ;;  %v4650_v10 = vld [vmem:[#allocation32_spill] sm:$0xff] }
 0x286   :  { %v980_v32 = vpop.f32.mrf.mxu0  ;;  %1879 = vmatpush.bf16.msrb.mxu2 %v3221_v44  ;;  %1906 = vmatpush.bf16.msrb.mxu3 %v3222_v57  ;;  %v1310_v33 = vadd.f32 %v4637_v18, %v1051_v46  ;;  %v3224_v44 = vld [vmem:[%s4586_s3 + $0x78] sm:$0xff]  ;;  %v4646_v18 = vld [vmem:[#allocation30_spill] sm:$0xff] }
 0x287   :  { %v1497_v50 = vadd.f32 %v1472_v8, %v1422_v4  ;;  %v981_v34 = vadd.f32 %v4175_v56, %v980_v32  ;;  %v4642_v4 = vld [vmem:[#allocation22_spill] sm:$0xff]  ;;  %v4644_v32 = vld [vmem:[#allocation33_spill] sm:$0xff] }
 0x288   :  { %v1426_v45 = vmax.f32 %v1310_v33, 0.0  ;;  %v1049_v62 = vadd.f32 %v4175_v56, %v4642_v4 }
 0x289   :  { %v1240_v30 = vadd.f32 %v1239_v38, %v981_v34  ;;  %v1522_v54 = vmul.f32 0.25, %v1497_v50 }
 0x28b   :  { %v1247_v55 = vpop.f32.mrf.mxu1  ;;  %v1398_v24 = vmax.f32 %v1240_v30, 0.0 }
 0x28c   :  { %v1248_v48 = vadd.f32 %v1247_v55, %v989_v51  ;;  %v1308_v51 = vadd.f32 %v4645_v22, %v1049_v62 }
 0x28d   :  { %v1473_v53 = vadd.f32 %v4639_v35, %v1398_v24  ;;  %v3226_v35 = vld [vmem:[%s4586_s3 + $0x88] sm:$0xff] }
 0x28e   :  { %v1401_v1 = vmax.f32 %v1248_v48, 0.0  ;;  %v983_v9 = vpop.f32.mrf.mxu0  ;;  %v1425_v30 = vmax.f32 %v1308_v51, 0.0  ;;  %v4647_v48 = vld [vmem:[#allocation27_spill] sm:$0xff] }
 0x28f   :  { %v1498_v12 = vadd.f32 %v1473_v53, %v1423_v28  ;;  %v984_v38 = vadd.f32 %v4175_v56, %v983_v9  ;;  %v1054_v28 = vadd.f32 %v4175_v56, %v4647_v48 }
 0x290   :  { %v1476_v26 = vadd.f32 %v4225_v58, %v1401_v1  ;;  %v1805_v58 = vpack.c.bf16 %v1522_v54, %v1522_v54  ;;  %v4648_v1 = vld [vmem:[#allocation28_spill] sm:$0xff] }
 0x291   :  { %v1523_v20 = vmul.f32 0.25, %v1498_v12  ;;  %v1243_v5 = vadd.f32 %v1242_v3, %v984_v38  ;;  %v4649_v12 = vld [vmem:[#allocation31_spill] sm:$0xff] }
 0x292   :  { %v1501_v21 = vadd.f32 %v1476_v26, %v1426_v45  ;;  %v1313_v45 = vadd.f32 %v4648_v1, %v1054_v28  ;;  %v1059_v26 = vadd.f32 %v4175_v56, %v4649_v12  ;;  %v3233_v28 = vld [vmem:[%s4586_s3 + $0xc0] sm:$0xff]  ;;  %v1534_v1 = vmul.f32 0.25, %v4322_v11 }
 0x293   :  { %v1249_v17 = vpop.f32.mrf.mxu1  ;;  %v1832_v57 = vpack.c.bf16 %v1523_v20, %v1523_v20  ;;  %v1399_v27 = vmax.f32 %v1243_v5, 0.0 }
 0x294   :  { %v1250_v52 = vadd.f32 %v1249_v17, %v991_v2  ;;  %v1427_v9 = vmax.f32 %v1313_v45, 0.0  ;;  %v1526_v38 = vmul.f32 0.25, %v1501_v21  ;;  %v3227_v2 = vld [vmem:[%s4586_s3 + $0x90] sm:$0xff]  ;;  %v1318_v20 = vadd.f32 %v4650_v10, %v1059_v26 }
 0x295   :  { %v1474_v8 = vadd.f32 %v4643_v6, %v1399_v27  ;;  %2951 = vmatmul.msk.bf16.vlgmr.msra.gmra.mxu2 %vm1550_vm2, %v1805_v58  ;;  %2958 = vmatmul.msk.bf16.vlgmr.msra.gmra.mxu3 %vm1550_vm2, %v1832_v57  ;;  %v1064_v57 = vadd.f32 %v4175_v56, %v4251_v49  ;;  %v2129_v12 = vpack.c.bf16 %v1534_v1, %v1534_v1 }
 0x296   :  { %v1402_v3 = vmax.f32 %v1250_v52, 0.0  ;;  %v985_v63 = vpop.f32.mrf.mxu0  ;;  %1933 = vmatpush.bf16.msra.mxu2 %v3223_v39  ;;  %1960 = vmatpush.bf16.msra.mxu3 %v3224_v44  ;;  %v1913_v5 = vpack.c.bf16 %v1526_v38, %v1526_v38  ;;  %v1429_v21 = vmax.f32 %v1318_v20, 0.0  ;;  %v1528_v44 = vmul.f32 0.25, %v4253_v25  ;;  %v3229_v52 = vld [vmem:[%s4586_s3 + $0xa0] sm:$0xff] }
 0x297   :  { %v1499_v46 = vadd.f32 %v1474_v8, %v1424_v61  ;;  %v986_v34 = vadd.f32 %v4175_v56, %v985_v63  ;;  %v3230_v61 = vld [vmem:[%s4586_s3 + $0xa8] sm:$0xff]  ;;  %v1323_v6 = vadd.f32 %v4256_v47, %v1064_v57  ;;  %v1530_v63 = vmul.f32 0.25, %v4279_v15  ;;  %v3231_v47 = vld [vmem:[%s4586_s3 + $0xb0] sm:$0xff] }
 0x298   :  { %v1477_v50 = vadd.f32 %v4644_v32, %v1402_v3  ;;  %v1504_v39 = vadd.f32 %v4266_v29, %v1429_v21  ;;  %v1967_v4 = vpack.c.bf16 %v1528_v44, %v1528_v44  ;;  %v1069_v32 = vadd.f32 %v4175_v56, %v4282_v37 }
 0x299   :  { %v1245_v40 = vadd.f32 %v1244_v14, %v986_v34  ;;  %v1524_v55 = vmul.f32 0.25, %v1499_v46  ;;  %v1431_v49 = vmax.f32 %v1323_v6, 0.0  ;;  %v3232_v34 = vld [vmem:[%s4586_s3 + $0xb8] sm:$0xff]  ;;  %v2021_v22 = vpack.c.bf16 %v1530_v63, %v1530_v63 }
 0x29a   :  { %v1502_v54 = vadd.f32 %v1477_v50, %v1427_v9  ;;  %v1529_v58 = vmul.f32 0.25, %v1504_v39 }
 0x29b   :  { %v1400_v31 = vmax.f32 %v1245_v40, 0.0  ;;  %v1859_v53 = vpack.c.bf16 %v1524_v55, %v1524_v55  ;;  %v1506_v3 = vadd.f32 %v4292_v41, %v1431_v49  ;;  %v1328_v40 = vadd.f32 %v4295_v7, %v1069_v32 }
 0x29c   :  { %v1527_v59 = vmul.f32 0.25, %v1502_v54  ;;  %v1994_v62 = vpack.c.bf16 %v1529_v58, %v1529_v58 }
 0x29d   :  { %v1475_v33 = vadd.f32 %v4646_v18, %v1400_v31  ;;  %v1531_v46 = vmul.f32 0.25, %v1506_v3  ;;  %v1433_v15 = vmax.f32 %v1328_v40, 0.0 }
 0x29e   :  { %v1940_v17 = vpack.c.bf16 %v1527_v59, %v1527_v59 }
 0x29f   :  { %v1500_v24 = vadd.f32 %v1475_v33, %v1425_v30  ;;  %v2048_v51 = vpack.c.bf16 %v1531_v46, %v1531_v46  ;;  %v1508_v30 = vadd.f32 %v4312_v19, %v1433_v15  ;;  %v1532_v33 = vmul.f32 0.25, %v4307_v13 }
 0x2a1   :  { %v1525_v42 = vmul.f32 0.25, %v1500_v24  ;;  %v1533_v55 = vmul.f32 0.25, %v1508_v30  ;;  %v1074_v24 = vadd.f32 %v4175_v56, %v4315_v60  ;;  %v3239_v30 = vld [vmem:[%s4588_s5 + $0x28] sm:$0xff] }
 0x2a3   :  { %v1886_v14 = vpack.c.bf16 %v1525_v42, %v1525_v42  ;;  %v2075_v42 = vpack.c.bf16 %v1532_v33, %v1532_v33 }
 0x2a5   :  { %2965 = vmatmul.msk.bf16.vlgmr.msrb.gmra.mxu2 %vm1550_vm2, %v1859_v53  ;;  %2972 = vmatmul.msk.bf16.vlgmr.msrb.gmra.mxu3 %vm1550_vm2, %v1886_v14 }
 0x2a6   :  { %1987 = vmatpush.bf16.msrb.mxu2 %v3225_v0  ;;  %2014 = vmatpush.bf16.msrb.mxu3 %v3226_v35  ;;  %v2102_v0 = vpack.c.bf16 %v1533_v55, %v1533_v55  ;;  %v1333_v35 = vadd.f32 %v4318_v36, %v1074_v24  ;;  %v3237_v24 = vld [vmem:[%s4588_s5 + $0x18] sm:$0xff] }
 0x2a8   :  { %v1435_v13 = vmax.f32 %v1333_v35, 0.0  ;;  %v3234_v35 = vld [vmem:[%s4588_s5] sm:$0xff] }
 0x2aa   :  { %v1510_v56 = vadd.f32 %v4327_v23, %v1435_v13 }
 0x2ac   :  { %v1535_v45 = vmul.f32 0.25, %v1510_v56  ;;  %v2314_v56 = vld [vmem:[%s4590_s7 + $0x28] sm:$0x3] }
 0x2ae   :  { %v2156_v26 = vpack.c.bf16 %v1535_v45, %v1535_v45 }
 0x2b5   :  { %2979 = vmatmul.msk.bf16.vlgmr.msra.gmra.mxu2 %vm1550_vm2, %v1913_v5  ;;  %2986 = vmatmul.msk.bf16.vlgmr.msra.gmra.mxu3 %vm1550_vm2, %v1940_v17 }
 0x2b6   :  { %2041 = vmatpush.bf16.msra.mxu2 %v3227_v2  ;;  %2068 = vmatpush.bf16.msra.mxu3 %v3228_v43  ;;  %v1536_v43 = vmul.f32 0.25, %v4339_v16 }
 0x2b8   :  { %v2183_v20 = vpack.c.bf16 %v1536_v43, %v1536_v43  ;;  %v3243_v43 = vld [vmem:[%s4590_s7 + $0x10] sm:$0xff] }
 0x2c0   :  { %v1585_v27 = vpop.f32.mrf.mxu3 }
 0x2c5   :  { %2993 = vmatmul.msk.bf16.vlgmr.msrb.gmra.mxu2 %vm1550_vm2, %v1967_v4  ;;  %3000 = vmatmul.msk.bf16.vlgmr.msrb.gmra.mxu3 %vm1550_vm2, %v1994_v62 }
 0x2c6   :  { %2095 = vmatpush.bf16.msrb.mxu2 %v3229_v52  ;;  %2122 = vmatpush.bf16.msrb.mxu3 %v3230_v61 }
 0x2c8   :  { %v1563_v25 = vpop.f32.mrf.mxu2  ;;  %v1587_v29 = vpop.f32.mrf.mxu3 }
 0x2c9   :  { %v1586_v8 = vadd.f32 %v1585_v27, %v1563_v25 }
 0x2d0   :  { %v1565_v50 = vpop.f32.mrf.mxu2 }
 0x2d5   :  { %3007 = vmatmul.msk.bf16.vlgmr.msra.gmra.mxu2 %vm1550_vm2, %v2021_v22  ;;  %3014 = vmatmul.msk.bf16.vlgmr.msra.gmra.mxu3 %vm1550_vm2, %v2048_v51 }
 0x2d6   :  { %2149 = vmatpush.bf16.msra.mxu2 %v3231_v47  ;;  %2176 = vmatpush.bf16.msra.mxu3 %v3232_v34  ;;  %v2231_v47 = vld [vmem:[%s4588_s5 + $0x38] sm:$0xf] }
 0x2d7   :  { %v2265_v34 = vunpack.c.l.b16 %v2231_v47 }
 0x2d8   :  { %v1611_v37 = vpop.f32.mrf.mxu2  ;;  %v1638_v41 = vpop.f32.mrf.mxu3 }
 0x2d9   :  { %v1615_v31 = vadd.f32 %v1611_v37, %v1586_v8  ;;  %v2273_v22 = vpack.c.b16 %v2265_v34, %v2265_v34  ;;  %v3240_v37 = vld [vmem:[%s4588_s5 + $0x30] sm:$0xff] }
 0x2db   :  { %v1642_v18 = vadd.f32 %v1638_v41, %v1615_v31  ;;  %v2287_v15 = vsel %vm2285_vm3, %v2273_v22, 0 }
 0x2e0   :  { %v1613_v7 = vpop.f32.mrf.mxu2  ;;  %v1640_v48 = vpop.f32.mrf.mxu3 }
 0x2e1   :  { %v3236_v7 = vld [vmem:[%s4588_s5 + $0x10] sm:$0xff] }
 0x2e5   :  { %3021 = vmatmul.msk.bf16.vlgmr.msrb.gmra.mxu2 %vm1550_vm2, %v2075_v42  ;;  %3028 = vmatmul.msk.bf16.vlgmr.msrb.gmra.mxu3 %vm1550_vm2, %v2102_v0  ;;  %v3235_v42 = vld [vmem:[%s4588_s5 + $0x8] sm:$0xff] }
 0x2e6   :  { %2203 = vmatpush.bf16.msrb.mxu2 %v3233_v28  ;;  %2289 = vmatpush.bf16.msrb.mxu3 %v2287_v15 }
 0x2e8   :  { %v1665_v19 = vpop.f32.mrf.mxu2  ;;  %v1692_v53 = vpop.f32.mrf.mxu3 }
 0x2e9   :  { %v1669_v14 = vadd.f32 %v1665_v19, %v1642_v18  ;;  %v3238_v18 = vld [vmem:[%s4588_s5 + $0x20] sm:$0xff] }
 0x2ea   :  { %2290 = vmatpush.bf16.msrb.mxu3 %v3240_v37 }
 0x2eb   :  { %v1696_v60 = vadd.f32 %v1692_v53, %v1669_v14 }
 0x2ee   :  { %2291 = vmatpush.bf16.msrb.mxu3 %v3239_v30 }
 0x2f0   :  { %v1667_v9 = vpop.f32.mrf.mxu2  ;;  %v1694_v54 = vpop.f32.mrf.mxu3 }
 0x2f2   :  { %2292 = vmatpush.bf16.msrb.mxu3 %v3238_v18 }
 0x2f5   :  { %3035 = vmatmul.msk.bf16.vlgmr.msra.gmra.mxu2 %vm1550_vm2, %v2129_v12  ;;  %3042 = vmatmul.msk.bf16.vlgmr.msra.gmra.mxu3 %vm1550_vm2, %v2156_v26  ;;  %v3245_v12 = vld [vmem:[%s4590_s7 + $0x20] sm:$0xff] }
 0x2f6   :  { %2293 = vmatpush.bf16.msrb.mxu3 %v3237_v24 }
 0x2f8   :  { %v1719_v36 = vpop.f32.mrf.mxu2  ;;  %v1746_v38 = vpop.f32.mrf.mxu3 }
 0x2f9   :  { %v1723_v59 = vadd.f32 %v1719_v36, %v1696_v60  ;;  %v2340_v60 = vunpack.c.l.b16 %v2314_v56 }
 0x2fa   :  { %2294 = vmatpush.bf16.msrb.mxu3 %v3236_v7 }
 0x2fb   :  { %v1750_v2 = vadd.f32 %v1746_v38, %v1723_v59  ;;  %v2346_v1 = vpack.c.b16 %v2340_v60, %v2340_v60  ;;  %v3244_v59 = vld [vmem:[%s4590_s7 + $0x18] sm:$0xff] }
 0x2fd   :  { %v2358_v9 = vsel %vm2356_vm4, %v2346_v1, 0 }
 0x2fe   :  { %2295 = vmatpush.bf16.msrb.mxu3 %v3235_v42  ;;  %2362 = vmatpush.bf16.msra.mxu2 %v2358_v9 }
 0x300   :  { %v1721_v10 = vpop.f32.mrf.mxu2  ;;  %v1748_v23 = vpop.f32.mrf.mxu3 }
 0x302   :  { %2296 = vmatpush.bf16.msrb.mxu3 %v3234_v35  ;;  %2363 = vmatpush.bf16.msra.mxu2 %v3245_v12 }
 0x305   :  { %3049 = vmatmul.msk.bf16.vlgmr.msrb.gmra.mxu2 %vm1550_vm2, %v2183_v20 }
 0x306   :  { %2364 = vmatpush.bf16.msra.mxu2 %v3244_v59 }
 0x308   :  { %v1773_v11 = vpop.f32.mrf.mxu2  ;;  %v1800_v5 = vpop.f32.mrf.mxu3 }
 0x309   :  { %v1777_v17 = vadd.f32 %v1773_v11, %v1750_v2 }
 0x30a   :  { %2365 = vmatpush.bf16.msra.mxu2 %v3243_v43 }
 0x30b   :  { %v1804_v21 = vadd.f32 %v1800_v5, %v1777_v17  ;;  %v3258_v17 = vld [vmem:[%s4587_s4] ss:$0 sm:$0xff] }
 0x310   :  { %v1775_v39 = vpop.f32.mrf.mxu2  ;;  %v1802_v44 = vpop.f32.mrf.mxu3 }
 0x318   :  { %v1827_v58 = vpop.f32.mrf.mxu2  ;;  %v1854_v57 = vpop.f32.mrf.mxu3 }
 0x319   :  { %v1831_v27 = vadd.f32 %v1827_v58, %v1804_v21 }
 0x31b   :  { %v1858_v52 = vadd.f32 %v1854_v57, %v1831_v27 }
 0x320   :  { %v1829_v61 = vpop.f32.mrf.mxu2  ;;  %v1856_v4 = vpop.f32.mrf.mxu3 }
 0x321   :  { %v3241_v61 = vld [vmem:[%s4590_s7] sm:$0xff] }
 0x322   :  { %v3259_v4 = vld [vmem:[%s4589_s6] ss:$0 sm:$0xff] }
 0x328   :  { %v1881_v62 = vpop.f32.mrf.mxu2  ;;  %v1908_v6 = vpop.f32.mrf.mxu3 }
 0x329   :  { %v1885_v16 = vadd.f32 %v1881_v62, %v1858_v52  ;;  %v3242_v52 = vld [vmem:[%s4590_s7 + $0x8] sm:$0xff] }
 0x32a   :  { %2366 = vmatpush.bf16.msra.mxu2 %v3242_v52 }
 0x32b   :  { %v1912_v49 = vadd.f32 %v1908_v6, %v1885_v16 }
 0x32e   :  { %2367 = vmatpush.bf16.msra.mxu2 %v3241_v61 }
 0x330   :  { %v1883_v25 = vpop.f32.mrf.mxu2  ;;  %v1910_v29 = vpop.f32.mrf.mxu3 }
 0x331   :  { %v3260_v29 = vld [vmem:[%s4591_s8] ss:$0 sm:$0xff] }
 0x338   :  { %v1935_v8 = vpop.f32.mrf.mxu2  ;;  %v1962_v3 = vpop.f32.mrf.mxu3 }
 0x339   :  { %v1939_v0 = vadd.f32 %v1935_v8, %v1912_v49 }
 0x33b   :  { %v1966_v13 = vadd.f32 %v1962_v3, %v1939_v0 }
 0x340   :  { %v1937_v63 = vpop.f32.mrf.mxu2  ;;  %v1964_v46 = vpop.f32.mrf.mxu3 }
 0x348   :  { %v1989_v32 = vpop.f32.mrf.mxu2  ;;  %v2016_v50 = vpop.f32.mrf.mxu3 }
 0x349   :  { %v1993_v14 = vadd.f32 %v1989_v32, %v1966_v13 }
 0x34b   :  { %v2020_v45 = vadd.f32 %v2016_v50, %v1993_v14 }
 0x350   :  { %v1991_v51 = vpop.f32.mrf.mxu2  ;;  %v2018_v40 = vpop.f32.mrf.mxu3 }
 0x358   :  { %v2043_v41 = vpop.f32.mrf.mxu2  ;;  %v2070_v31 = vpop.f32.mrf.mxu3 }
 0x359   :  { %v2047_v54 = vadd.f32 %v2043_v41, %v2020_v45 }
 0x35b   :  { %v2074_v38 = vadd.f32 %v2070_v31, %v2047_v54 }
 0x360   :  { %v2045_v33 = vpop.f32.mrf.mxu2  ;;  %v2072_v55 = vpop.f32.mrf.mxu3 }
 0x368   :  { %v2097_v48 = vpop.f32.mrf.mxu2  ;;  %v2124_v28 = vpop.f32.mrf.mxu3 }
 0x369   :  { %v2101_v2 = vadd.f32 %v2097_v48, %v2074_v38 }
 0x36b   :  { %v2128_v20 = vadd.f32 %v2124_v28, %v2101_v2 }
 0x370   :  { %v2099_v19 = vpop.f32.mrf.mxu2  ;;  %v2126_v53 = vpop.f32.mrf.mxu3 }
 0x378   :  { %v2151_v26 = vpop.f32.mrf.mxu2  ;;  %v2178_v36 = vpop.f32.mrf.mxu3 }
 0x379   :  { %v2155_v11 = vadd.f32 %v2151_v26, %v2128_v20 }
 0x37b   :  { %v2182_v5 = vadd.f32 %v2178_v36, %v2155_v11 }
 0x380   :  { %v2153_v10 = vpop.f32.mrf.mxu2  ;;  %v2180_v23 = vpop.f32.mrf.mxu3 }
 0x388   :  { %v2205_v21 = vpop.f32.mrf.mxu2 }
 0x389   :  { %v2209_v39 = vadd.f32 %v2205_v21, %v2182_v5 }
 0x38b   :  { %v2214_v44 = vadd.f32 %v3258_v17, %v2209_v39 }
 0x38d   :  { %v2215_v58 = vmax.f32 %v2214_v44, 0.0 }
 0x38f   :  { %v2216_v57 = vpack.c.bf16 %v2215_v58, %v2215_v58 }
 0x390   :  { %v2207_v27 = vpop.f32.mrf.mxu2 }
 0x391   :  { %3078 = vmatmul.msk.bf16.vlgmr.msrb.gmra.mxu3 %vm2281_vm5, %v2216_v57 }
 0x414   :  { %v2298_v62 = vpop.f32.mrf.mxu3 }
 0x415   :  { %v2299_v6 = vadd.f32 %v3259_v4, %v2298_v62 }
 0x417   :  { %v2302_v16 = vmax.f32 %v2299_v6, 0.0 }
 0x419   :  { %v2303_v49 = vpack.c.bf16 %v2302_v16, %v2302_v16 }
 0x41b   :  { %3099 = vmatmul.msk.bf16.vlgmr.msra.gmra.mxu2 %vm2352_vm6, %v2303_v49 }
 0x41c   :  { %v2300_v25 = vpop.f32.mrf.mxu3 }
 0x49e   :  { %v2369_v8 = vpop.f32.mrf.mxu2 }
 0x49f   :  { %v2370_v3 = vadd.f32 %v3260_v29, %v2369_v8 }
 0x4a1   :  { %2374 = vst.msk [vmem:[#allocation2] sm:$0x3] %vm2373_vm7, %v2370_v3 }
 0x4a2   :  { %2385 = dma.vmem_to_hbm [thread:$0]  %s2381_s1, 32, %s2383_s23, [#allocation3]  }
 0x4a6   :  { %v2371_v63 = vpop.f32.mrf.mxu2 }
 0x4a7   :  { %3286 = dma.done.wait [#allocation3], 32  }
 0x4a8   :  { %3287 = vsyncadd [#allocation3], 4294967264 }
 0x4a9   :  { %2390 = vsyncpa [#allocation3], 1 }

</bundles_post_ra>
